<compile_context>
chip_gen: v7x
topology: tpu7x:2x2x1
jax: 0.10.0
libtpu: 0.0.40
codegen_flags: <defaults>
</compile_context>

<pallas_src>
import functools

import numpy as np
import jax
import jax.numpy as jnp
from jax import lax
from jax.experimental import pallas as pl
from jax.experimental.pallas import tpu as pltpu


# ----------------------------------------------------------------------------
# Fused Pallas kernel: conv1+relu -> conv2+relu -> conv3+relu -> conv4
# (one image per grid step; all intermediates stay on-chip)
# ----------------------------------------------------------------------------
def _fused_sr_kernel(p1_ref, w1_ref, b1_ref, w2_ref, b2_ref, w3_ref, b3_ref,
                     w4_ref, b4_ref, o_ref, *, H, W):
    HW = H * W
    f32 = jnp.float32
    bf16 = jnp.bfloat16

    def pad1(a):
        # zero-pad the two spatial dims of (H, W, C) by 1 on each side.
        h, w, c = a.shape
        zc = jnp.zeros((h, 1, c), a.dtype)
        mid = jnp.concatenate([zc, a, zc], axis=1)
        zr = jnp.zeros((1, w + 2, c), a.dtype)
        return jnp.concatenate([zr, mid, zr], axis=0)

    def im2col3(a):
        # a: (H+2, W+2, C) -> (H*W, 9*C); tap order (dy, dx, ci) matches the
        # weight slab layout built in the wrapper.
        c = a.shape[-1]
        cols = [a[dy:dy + H, dx:dx + W, :].reshape(HW, c)
                for dy in range(3) for dx in range(3)]
        return jnp.concatenate(cols, axis=-1)

    def conv(patch, w_ref, b_ref, relu):
        # bf16 operands, f32 accumulation on the MXU; bias/ReLU in f32.
        y = jnp.dot(patch, w_ref[...], preferred_element_type=f32) + b_ref[...]
        if relu:
            y = jnp.maximum(y, 0.0)
        return y

    # conv1: 5x5, Cin=1.  Patches are prebuilt (layout glue) -> one K=25 dot.
    a1 = conv(p1_ref[0], w1_ref, b1_ref, True)                 # (HW, 64) f32
    a1 = a1.reshape(H, W, w1_ref.shape[-1]).astype(bf16)

    # conv2: 3x3, 64 -> 64, K = 9*64 = 576.
    a2 = conv(im2col3(pad1(a1)), w2_ref, b2_ref, True)
    a2 = a2.reshape(H, W, w2_ref.shape[-1]).astype(bf16)

    # conv3: 3x3, 64 -> 32, K = 576.
    a3 = conv(im2col3(pad1(a2)), w3_ref, b3_ref, True)
    a3 = a3.reshape(H, W, w3_ref.shape[-1]).astype(bf16)

    # conv4: 3x3, 32 -> r*r, K = 288, no ReLU.
    y4 = conv(im2col3(pad1(a3)), w4_ref, b4_ref, False)        # (HW, r*r) f32
    o_ref[...] = y4.reshape(1, HW, w4_ref.shape[-1])


# ----------------------------------------------------------------------------
# Wrapper: layout prep (weight slabs, conv1 patches) + pallas_call + pixel shuffle
# ----------------------------------------------------------------------------
def _weight_slab(w_oihw):
    cout, cin, kh, kw = w_oihw.shape
    # OIHW -> (kh, kw, cin, cout) -> (kh*kw*cin, cout); row order matches im2col.
    return (jnp.transpose(w_oihw, (2, 3, 1, 0))
            .reshape(kh * kw * cin, cout).astype(jnp.bfloat16))


def _conv1_patches(x_nhwc, kh, kw, pad):
    # im2col for the first conv; pure gather/layout (no FLOPs hoisted).
    N, H, W, C = x_nhwc.shape
    xp = jnp.pad(x_nhwc, ((0, 0), (pad, pad), (pad, pad), (0, 0)))
    cols = [xp[:, dy:dy + H, dx:dx + W, :].reshape(N, H * W, C)
            for dy in range(kh) for dx in range(kw)]
    return jnp.concatenate(cols, axis=-1)          # (N, H*W, kh*kw*C)


def super_resolution_forward(x_nchw, params, upscale_factor):
    N, Cin, H, W = x_nchw.shape
    r = upscale_factor
    rr = r * r
    HW = H * W

    # NCHW -> NHWC (channels on the lane axis), bf16 matmul operands.
    x = jnp.transpose(x_nchw, (0, 2, 3, 1)).astype(jnp.bfloat16)
    p1 = _conv1_patches(x, 5, 5, 2)                # (N, HW, 25*Cin) bf16
    k1 = p1.shape[-1]

    slabs = [_weight_slab(params[f"w{i}"]) for i in (1, 2, 3, 4)]
    biases = [params[f"b{i}"].reshape(1, -1).astype(jnp.float32)
              for i in (1, 2, 3, 4)]

    def const_spec(a):
        nd = a.ndim
        return pl.BlockSpec(a.shape, lambda n, _nd=nd: (0,) * _nd)

    in_specs = [pl.BlockSpec((1, HW, k1), lambda n: (n, 0, 0))]
    args = [p1]
    for wslab, b in zip(slabs, biases):
        in_specs += [const_spec(wslab), const_spec(b)]
        args += [wslab, b]

    kernel = functools.partial(_fused_sr_kernel, H=H, W=W)
    out = pl.pallas_call(
        kernel,
        out_shape=jax.ShapeDtypeStruct((N, HW, rr), jnp.float32),
        grid_spec=pltpu.PrefetchScalarGridSpec(
            num_scalar_prefetch=0,
            grid=(N,),
            in_specs=in_specs,
            out_specs=pl.BlockSpec((1, HW, rr), lambda n: (n, 0, 0)),
        ),
        compiler_params=pltpu.CompilerParams(
            dimension_semantics=("parallel",)),
    )(*args)

    # PixelShuffle (pure layout glue):
    #   out[n, h*W+w, i*r+j] -> y[n, 0, h*r+i, w*r+j]   (C_out = rr / r^2 = 1)
    y = out.reshape(N, H, W, r, r)
    y = jnp.transpose(y, (0, 1, 3, 2, 4))          # (N, H, r, W, r)
    return y.reshape(N, 1, H * r, W * r)


# ----------------------------------------------------------------------------
# Deterministic parameter init (mimics torch.nn.init.orthogonal_)
# ----------------------------------------------------------------------------
def orthogonal_init(rng, shape, gain=1.0):
    rows = shape[0]
    cols = int(np.prod(shape[1:]))
    flat = rng.standard_normal((rows, cols)).astype(np.float64)
    transpose = rows < cols
    if transpose:
        flat = flat.T
    q, rmat = np.linalg.qr(flat)
    q = q * np.sign(np.diag(rmat))
    if transpose:
        q = q.T
    return jnp.asarray(gain * q.reshape(shape), dtype=jnp.float32)


def make_params(upscale_factor, seed=0):
    rng = np.random.RandomState(seed)
    relu_gain = float(np.sqrt(2.0))  # init.calculate_gain('relu')
    return {
        "w1": orthogonal_init(rng, (64, 1, 5, 5), relu_gain),
        "b1": jnp.asarray(rng.uniform(-0.1, 0.1, (64,)), jnp.float32),
        "w2": orthogonal_init(rng, (64, 64, 3, 3), relu_gain),
        "b2": jnp.asarray(rng.uniform(-0.1, 0.1, (64,)), jnp.float32),
        "w3": orthogonal_init(rng, (32, 64, 3, 3), relu_gain),
        "b3": jnp.asarray(rng.uniform(-0.1, 0.1, (32,)), jnp.float32),
        "w4": orthogonal_init(rng, (upscale_factor ** 2, 32, 3, 3), 1.0),
        "b4": jnp.asarray(rng.uniform(-0.1, 0.1, (upscale_factor ** 2,)),
                          jnp.float32),
    }


# ----------------------------------------------------------------------------
# Pure-JAX reference (lax conv in NCHW) for correctness check
# ----------------------------------------------------------------------------
def reference_forward(x, p, r, *, bf16_operands=True):
    def conv(v, w, b, pad):
        if bf16_operands:
            v = v.astype(jnp.bfloat16)
            w = w.astype(jnp.bfloat16)
            prec = None
        else:
            prec = lax.Precision.HIGHEST
        y = lax.conv_general_dilated(
            v, w, window_strides=(1, 1), padding=[(pad, pad), (pad, pad)],
            dimension_numbers=("NCHW", "OIHW", "NCHW"),
            preferred_element_type=jnp.float32, precision=prec)
        return y + b.reshape(1, -1, 1, 1)

    y = jnp.maximum(conv(x, p["w1"], p["b1"], 2), 0.0)
    y = jnp.maximum(conv(y, p["w2"], p["b2"], 1), 0.0)
    y = jnp.maximum(conv(y, p["w3"], p["b3"], 1), 0.0)
    y = conv(y, p["w4"], p["b4"], 1)
    N, C, H, W = y.shape
    y = y.reshape(N, C // (r * r), r, r, H, W)
    y = jnp.transpose(y, (0, 1, 4, 2, 5, 3))
    return y.reshape(N, C // (r * r), H * r, W * r)


if __name__ == "__main__":
    upscale_factor = 3
    batch, cin, hw = 2, 1, 16

    key = jax.random.PRNGKey(0)
    x = jax.random.normal(key, (batch, cin, hw, hw), dtype=jnp.float32)
    params = make_params(upscale_factor, seed=0)

    out = jax.block_until_ready(super_resolution_forward(x, params, upscale_factor))
    assert out.shape == (batch, 1, hw * upscale_factor, hw * upscale_factor), out.shape

    # Primary check: lax reference with the same bf16-operand / f32-accumulate
    # precision as the kernel (remaining diffs = summation order + bf16 rounding
    # of intermediates, amplified over 4 layers).
    ref = jax.block_until_ready(
        reference_forward(x, params, upscale_factor, bf16_operands=True))
    if not np.allclose(np.asarray(out), np.asarray(ref), rtol=1e-2, atol=1e-2):
        raise AssertionError("Pallas result does not match bf16-operand reference")

    # Sanity check against the full-f32 reference: bf16 matmul operands add
    # ~1e-2-level drift, so this tolerance is intentionally loose.
    ref32 = jax.block_until_ready(
        reference_forward(x, params, upscale_factor, bf16_operands=False))
    if not np.allclose(np.asarray(out), np.asarray(ref32), rtol=2e-1, atol=2e-1):
        raise AssertionError("Pallas result drifted too far from the f32 reference")

    print("KERNEL_OK")
</pallas_src>

<mosaic_0001>
module attributes {stable_mosaic.version = 11 : i64} {
  func.func @_fused_sr_kernel(%arg0: i32, %arg1: memref<1x256x25xbf16, #tpu.memory_space<vmem>>, %arg2: memref<25x64xbf16, #tpu.memory_space<vmem>>, %arg3: memref<1x64xf32, #tpu.memory_space<vmem>>, %arg4: memref<576x64xbf16, #tpu.memory_space<vmem>>, %arg5: memref<1x64xf32, #tpu.memory_space<vmem>>, %arg6: memref<576x32xbf16, #tpu.memory_space<vmem>>, %arg7: memref<1x32xf32, #tpu.memory_space<vmem>>, %arg8: memref<288x9xbf16, #tpu.memory_space<vmem>>, %arg9: memref<1x9xf32, #tpu.memory_space<vmem>>, %arg10: memref<1x256x9xf32, #tpu.memory_space<vmem>>) attributes {dimension_semantics = [#tpu.dimension_semantics<parallel>], iteration_bounds = array<i64: 2>, scalar_prefetch = 0 : i64, scratch_operands = 0 : i64, tpu.core_type = #tpu.core_type<tc>, window_params = [{transform_indices = @transform_0, window_bounds = array<i64: 1, 256, 25>}, {pipeline_mode = #tpu.pipeline_mode<synchronous>, transform_indices = @transform_1, window_bounds = array<i64: 25, 64>}, {pipeline_mode = #tpu.pipeline_mode<synchronous>, transform_indices = @transform_2, window_bounds = array<i64: 1, 64>}, {pipeline_mode = #tpu.pipeline_mode<synchronous>, transform_indices = @transform_3, window_bounds = array<i64: 576, 64>}, {pipeline_mode = #tpu.pipeline_mode<synchronous>, transform_indices = @transform_4, window_bounds = array<i64: 1, 64>}, {pipeline_mode = #tpu.pipeline_mode<synchronous>, transform_indices = @transform_5, window_bounds = array<i64: 576, 32>}, {pipeline_mode = #tpu.pipeline_mode<synchronous>, transform_indices = @transform_6, window_bounds = array<i64: 1, 32>}, {pipeline_mode = #tpu.pipeline_mode<synchronous>, transform_indices = @transform_7, window_bounds = array<i64: 288, 9>}, {pipeline_mode = #tpu.pipeline_mode<synchronous>, transform_indices = @transform_8, window_bounds = array<i64: 1, 9>}, {transform_indices = @transform_9, window_bounds = array<i64: 1, 256, 9>}]} {
    %c0 = arith.constant 0 : index
    %c0_0 = arith.constant 0 : index
    %c0_1 = arith.constant 0 : index
    %0 = vector.load %arg1[%c0, %c0_0, %c0_1] : memref<1x256x25xbf16, #tpu.memory_space<vmem>>, vector<1x256x25xbf16>
    %1 = vector.shape_cast %0 : vector<1x256x25xbf16> to vector<256x25xbf16>
    %c0_2 = arith.constant 0 : index
    %c0_3 = arith.constant 0 : index
    %2 = vector.load %arg2[%c0_2, %c0_3] : memref<25x64xbf16, #tpu.memory_space<vmem>>, vector<25x64xbf16>
    %cst = arith.constant dense<0.000000e+00> : vector<256x64xf32>
    %3 = tpu.matmul %1, %2, %cst {dimension_numbers = #tpu.dot_dimension_numbers<[1], [0], [0], [1], [0, 0, 1, 1], [], []>} : vector<256x25xbf16>, vector<25x64xbf16>, vector<256x64xf32> -> vector<256x64xf32>
    %c0_4 = arith.constant 0 : index
    %c0_5 = arith.constant 0 : index
    %4 = vector.load %arg3[%c0_4, %c0_5] : memref<1x64xf32, #tpu.memory_space<vmem>>, vector<1x64xf32>
    %5 = vector.broadcast %4 : vector<1x64xf32> to vector<256x64xf32>
    %6 = arith.addf %3, %5 : vector<256x64xf32>
    %cst_6 = arith.constant 0.000000e+00 : f32
    %7 = vector.broadcast %cst_6 : f32 to vector<256x64xf32>
    %8 = arith.maximumf %6, %7 : vector<256x64xf32>
    %9 = vector.shape_cast %8 : vector<256x64xf32> to vector<16x16x64xf32>
    %10 = arith.truncf %9 : vector<16x16x64xf32> to vector<16x16x64xbf16>
    %cst_7 = arith.constant 0.000000e+00 : bf16
    %11 = vector.broadcast %cst_7 : bf16 to vector<16x1x64xbf16>
    %12 = tpu.concatenate %11, %10, %11 in 1 : vector<16x1x64xbf16>, vector<16x16x64xbf16>, vector<16x1x64xbf16> -> vector<16x18x64xbf16>
    %cst_8 = arith.constant 0.000000e+00 : bf16
    %13 = vector.broadcast %cst_8 : bf16 to vector<1x18x64xbf16>
    %14 = tpu.concatenate %13, %12, %13 in 0 : vector<1x18x64xbf16>, vector<16x18x64xbf16>, vector<1x18x64xbf16> -> vector<18x18x64xbf16>
    %15 = vector.extract_strided_slice %14 {offsets = [0, 0, 0], sizes = [16, 16, 64], strides = [1, 1, 1]} : vector<18x18x64xbf16> to vector<16x16x64xbf16>
    %16 = vector.shape_cast %15 : vector<16x16x64xbf16> to vector<256x64xbf16>
    %17 = vector.extract_strided_slice %14 {offsets = [0, 1, 0], sizes = [16, 16, 64], strides = [1, 1, 1]} : vector<18x18x64xbf16> to vector<16x16x64xbf16>
    %18 = vector.shape_cast %17 : vector<16x16x64xbf16> to vector<256x64xbf16>
    %19 = vector.extract_strided_slice %14 {offsets = [0, 2, 0], sizes = [16, 16, 64], strides = [1, 1, 1]} : vector<18x18x64xbf16> to vector<16x16x64xbf16>
    %20 = vector.shape_cast %19 : vector<16x16x64xbf16> to vector<256x64xbf16>
    %21 = vector.extract_strided_slice %14 {offsets = [1, 0, 0], sizes = [16, 16, 64], strides = [1, 1, 1]} : vector<18x18x64xbf16> to vector<16x16x64xbf16>
    %22 = vector.shape_cast %21 : vector<16x16x64xbf16> to vector<256x64xbf16>
    %23 = vector.extract_strided_slice %14 {offsets = [1, 1, 0], sizes = [16, 16, 64], strides = [1, 1, 1]} : vector<18x18x64xbf16> to vector<16x16x64xbf16>
    %24 = vector.shape_cast %23 : vector<16x16x64xbf16> to vector<256x64xbf16>
    %25 = vector.extract_strided_slice %14 {offsets = [1, 2, 0], sizes = [16, 16, 64], strides = [1, 1, 1]} : vector<18x18x64xbf16> to vector<16x16x64xbf16>
    %26 = vector.shape_cast %25 : vector<16x16x64xbf16> to vector<256x64xbf16>
    %27 = vector.extract_strided_slice %14 {offsets = [2, 0, 0], sizes = [16, 16, 64], strides = [1, 1, 1]} : vector<18x18x64xbf16> to vector<16x16x64xbf16>
    %28 = vector.shape_cast %27 : vector<16x16x64xbf16> to vector<256x64xbf16>
    %29 = vector.extract_strided_slice %14 {offsets = [2, 1, 0], sizes = [16, 16, 64], strides = [1, 1, 1]} : vector<18x18x64xbf16> to vector<16x16x64xbf16>
    %30 = vector.shape_cast %29 : vector<16x16x64xbf16> to vector<256x64xbf16>
    %31 = vector.extract_strided_slice %14 {offsets = [2, 2, 0], sizes = [16, 16, 64], strides = [1, 1, 1]} : vector<18x18x64xbf16> to vector<16x16x64xbf16>
    %32 = vector.shape_cast %31 : vector<16x16x64xbf16> to vector<256x64xbf16>
    %33 = tpu.concatenate %16, %18, %20, %22, %24, %26, %28, %30, %32 in 1 : vector<256x64xbf16>, vector<256x64xbf16>, vector<256x64xbf16>, vector<256x64xbf16>, vector<256x64xbf16>, vector<256x64xbf16>, vector<256x64xbf16>, vector<256x64xbf16>, vector<256x64xbf16> -> vector<256x576xbf16>
    %c0_9 = arith.constant 0 : index
    %c0_10 = arith.constant 0 : index
    %34 = vector.load %arg4[%c0_9, %c0_10] : memref<576x64xbf16, #tpu.memory_space<vmem>>, vector<576x64xbf16>
    %cst_11 = arith.constant dense<0.000000e+00> : vector<256x64xf32>
    %35 = tpu.matmul %33, %34, %cst_11 {dimension_numbers = #tpu.dot_dimension_numbers<[1], [0], [0], [1], [0, 0, 1, 1], [], []>} : vector<256x576xbf16>, vector<576x64xbf16>, vector<256x64xf32> -> vector<256x64xf32>
    %c0_12 = arith.constant 0 : index
    %c0_13 = arith.constant 0 : index
    %36 = vector.load %arg5[%c0_12, %c0_13] : memref<1x64xf32, #tpu.memory_space<vmem>>, vector<1x64xf32>
    %37 = vector.broadcast %36 : vector<1x64xf32> to vector<256x64xf32>
    %38 = arith.addf %35, %37 : vector<256x64xf32>
    %cst_14 = arith.constant 0.000000e+00 : f32
    %39 = vector.broadcast %cst_14 : f32 to vector<256x64xf32>
    %40 = arith.maximumf %38, %39 : vector<256x64xf32>
    %41 = vector.shape_cast %40 : vector<256x64xf32> to vector<16x16x64xf32>
    %42 = arith.truncf %41 : vector<16x16x64xf32> to vector<16x16x64xbf16>
    %cst_15 = arith.constant 0.000000e+00 : bf16
    %43 = vector.broadcast %cst_15 : bf16 to vector<16x1x64xbf16>
    %44 = tpu.concatenate %43, %42, %43 in 1 : vector<16x1x64xbf16>, vector<16x16x64xbf16>, vector<16x1x64xbf16> -> vector<16x18x64xbf16>
    %cst_16 = arith.constant 0.000000e+00 : bf16
    %45 = vector.broadcast %cst_16 : bf16 to vector<1x18x64xbf16>
    %46 = tpu.concatenate %45, %44, %45 in 0 : vector<1x18x64xbf16>, vector<16x18x64xbf16>, vector<1x18x64xbf16> -> vector<18x18x64xbf16>
    %47 = vector.extract_strided_slice %46 {offsets = [0, 0, 0], sizes = [16, 16, 64], strides = [1, 1, 1]} : vector<18x18x64xbf16> to vector<16x16x64xbf16>
    %48 = vector.shape_cast %47 : vector<16x16x64xbf16> to vector<256x64xbf16>
    %49 = vector.extract_strided_slice %46 {offsets = [0, 1, 0], sizes = [16, 16, 64], strides = [1, 1, 1]} : vector<18x18x64xbf16> to vector<16x16x64xbf16>
    %50 = vector.shape_cast %49 : vector<16x16x64xbf16> to vector<256x64xbf16>
    %51 = vector.extract_strided_slice %46 {offsets = [0, 2, 0], sizes = [16, 16, 64], strides = [1, 1, 1]} : vector<18x18x64xbf16> to vector<16x16x64xbf16>
    %52 = vector.shape_cast %51 : vector<16x16x64xbf16> to vector<256x64xbf16>
    %53 = vector.extract_strided_slice %46 {offsets = [1, 0, 0], sizes = [16, 16, 64], strides = [1, 1, 1]} : vector<18x18x64xbf16> to vector<16x16x64xbf16>
    %54 = vector.shape_cast %53 : vector<16x16x64xbf16> to vector<256x64xbf16>
    %55 = vector.extract_strided_slice %46 {offsets = [1, 1, 0], sizes = [16, 16, 64], strides = [1, 1, 1]} : vector<18x18x64xbf16> to vector<16x16x64xbf16>
    %56 = vector.shape_cast %55 : vector<16x16x64xbf16> to vector<256x64xbf16>
    %57 = vector.extract_strided_slice %46 {offsets = [1, 2, 0], sizes = [16, 16, 64], strides = [1, 1, 1]} : vector<18x18x64xbf16> to vector<16x16x64xbf16>
    %58 = vector.shape_cast %57 : vector<16x16x64xbf16> to vector<256x64xbf16>
    %59 = vector.extract_strided_slice %46 {offsets = [2, 0, 0], sizes = [16, 16, 64], strides = [1, 1, 1]} : vector<18x18x64xbf16> to vector<16x16x64xbf16>
    %60 = vector.shape_cast %59 : vector<16x16x64xbf16> to vector<256x64xbf16>
    %61 = vector.extract_strided_slice %46 {offsets = [2, 1, 0], sizes = [16, 16, 64], strides = [1, 1, 1]} : vector<18x18x64xbf16> to vector<16x16x64xbf16>
    %62 = vector.shape_cast %61 : vector<16x16x64xbf16> to vector<256x64xbf16>
    %63 = vector.extract_strided_slice %46 {offsets = [2, 2, 0], sizes = [16, 16, 64], strides = [1, 1, 1]} : vector<18x18x64xbf16> to vector<16x16x64xbf16>
    %64 = vector.shape_cast %63 : vector<16x16x64xbf16> to vector<256x64xbf16>
    %65 = tpu.concatenate %48, %50, %52, %54, %56, %58, %60, %62, %64 in 1 : vector<256x64xbf16>, vector<256x64xbf16>, vector<256x64xbf16>, vector<256x64xbf16>, vector<256x64xbf16>, vector<256x64xbf16>, vector<256x64xbf16>, vector<256x64xbf16>, vector<256x64xbf16> -> vector<256x576xbf16>
    %c0_17 = arith.constant 0 : index
    %c0_18 = arith.constant 0 : index
    %66 = vector.load %arg6[%c0_17, %c0_18] : memref<576x32xbf16, #tpu.memory_space<vmem>>, vector<576x32xbf16>
    %cst_19 = arith.constant dense<0.000000e+00> : vector<256x32xf32>
    %67 = tpu.matmul %65, %66, %cst_19 {dimension_numbers = #tpu.dot_dimension_numbers<[1], [0], [0], [1], [0, 0, 1, 1], [], []>} : vector<256x576xbf16>, vector<576x32xbf16>, vector<256x32xf32> -> vector<256x32xf32>
    %c0_20 = arith.constant 0 : index
    %c0_21 = arith.constant 0 : index
    %68 = vector.load %arg7[%c0_20, %c0_21] : memref<1x32xf32, #tpu.memory_space<vmem>>, vector<1x32xf32>
    %69 = vector.broadcast %68 : vector<1x32xf32> to vector<256x32xf32>
    %70 = arith.addf %67, %69 : vector<256x32xf32>
    %cst_22 = arith.constant 0.000000e+00 : f32
    %71 = vector.broadcast %cst_22 : f32 to vector<256x32xf32>
    %72 = arith.maximumf %70, %71 : vector<256x32xf32>
    %73 = vector.shape_cast %72 : vector<256x32xf32> to vector<16x16x32xf32>
    %74 = arith.truncf %73 : vector<16x16x32xf32> to vector<16x16x32xbf16>
    %cst_23 = arith.constant 0.000000e+00 : bf16
    %75 = vector.broadcast %cst_23 : bf16 to vector<16x1x32xbf16>
    %76 = tpu.concatenate %75, %74, %75 in 1 : vector<16x1x32xbf16>, vector<16x16x32xbf16>, vector<16x1x32xbf16> -> vector<16x18x32xbf16>
    %cst_24 = arith.constant 0.000000e+00 : bf16
    %77 = vector.broadcast %cst_24 : bf16 to vector<1x18x32xbf16>
    %78 = tpu.concatenate %77, %76, %77 in 0 : vector<1x18x32xbf16>, vector<16x18x32xbf16>, vector<1x18x32xbf16> -> vector<18x18x32xbf16>
    %79 = vector.extract_strided_slice %78 {offsets = [0, 0, 0], sizes = [16, 16, 32], strides = [1, 1, 1]} : vector<18x18x32xbf16> to vector<16x16x32xbf16>
    %80 = vector.shape_cast %79 : vector<16x16x32xbf16> to vector<256x32xbf16>
    %81 = vector.extract_strided_slice %78 {offsets = [0, 1, 0], sizes = [16, 16, 32], strides = [1, 1, 1]} : vector<18x18x32xbf16> to vector<16x16x32xbf16>
    %82 = vector.shape_cast %81 : vector<16x16x32xbf16> to vector<256x32xbf16>
    %83 = vector.extract_strided_slice %78 {offsets = [0, 2, 0], sizes = [16, 16, 32], strides = [1, 1, 1]} : vector<18x18x32xbf16> to vector<16x16x32xbf16>
    %84 = vector.shape_cast %83 : vector<16x16x32xbf16> to vector<256x32xbf16>
    %85 = vector.extract_strided_slice %78 {offsets = [1, 0, 0], sizes = [16, 16, 32], strides = [1, 1, 1]} : vector<18x18x32xbf16> to vector<16x16x32xbf16>
    %86 = vector.shape_cast %85 : vector<16x16x32xbf16> to vector<256x32xbf16>
    %87 = vector.extract_strided_slice %78 {offsets = [1, 1, 0], sizes = [16, 16, 32], strides = [1, 1, 1]} : vector<18x18x32xbf16> to vector<16x16x32xbf16>
    %88 = vector.shape_cast %87 : vector<16x16x32xbf16> to vector<256x32xbf16>
    %89 = vector.extract_strided_slice %78 {offsets = [1, 2, 0], sizes = [16, 16, 32], strides = [1, 1, 1]} : vector<18x18x32xbf16> to vector<16x16x32xbf16>
    %90 = vector.shape_cast %89 : vector<16x16x32xbf16> to vector<256x32xbf16>
    %91 = vector.extract_strided_slice %78 {offsets = [2, 0, 0], sizes = [16, 16, 32], strides = [1, 1, 1]} : vector<18x18x32xbf16> to vector<16x16x32xbf16>
    %92 = vector.shape_cast %91 : vector<16x16x32xbf16> to vector<256x32xbf16>
    %93 = vector.extract_strided_slice %78 {offsets = [2, 1, 0], sizes = [16, 16, 32], strides = [1, 1, 1]} : vector<18x18x32xbf16> to vector<16x16x32xbf16>
    %94 = vector.shape_cast %93 : vector<16x16x32xbf16> to vector<256x32xbf16>
    %95 = vector.extract_strided_slice %78 {offsets = [2, 2, 0], sizes = [16, 16, 32], strides = [1, 1, 1]} : vector<18x18x32xbf16> to vector<16x16x32xbf16>
    %96 = vector.shape_cast %95 : vector<16x16x32xbf16> to vector<256x32xbf16>
    %97 = tpu.concatenate %80, %82, %84, %86, %88, %90, %92, %94, %96 in 1 : vector<256x32xbf16>, vector<256x32xbf16>, vector<256x32xbf16>, vector<256x32xbf16>, vector<256x32xbf16>, vector<256x32xbf16>, vector<256x32xbf16>, vector<256x32xbf16>, vector<256x32xbf16> -> vector<256x288xbf16>
    %c0_25 = arith.constant 0 : index
    %c0_26 = arith.constant 0 : index
    %98 = vector.load %arg8[%c0_25, %c0_26] : memref<288x9xbf16, #tpu.memory_space<vmem>>, vector<288x9xbf16>
    %cst_27 = arith.constant dense<0.000000e+00> : vector<256x9xf32>
    %99 = tpu.matmul %97, %98, %cst_27 {dimension_numbers = #tpu.dot_dimension_numbers<[1], [0], [0], [1], [0, 0, 1, 1], [], []>} : vector<256x288xbf16>, vector<288x9xbf16>, vector<256x9xf32> -> vector<256x9xf32>
    %c0_28 = arith.constant 0 : index
    %c0_29 = arith.constant 0 : index
    %100 = vector.load %arg9[%c0_28, %c0_29] : memref<1x9xf32, #tpu.memory_space<vmem>>, vector<1x9xf32>
    %101 = vector.broadcast %100 : vector<1x9xf32> to vector<256x9xf32>
    %102 = arith.addf %99, %101 : vector<256x9xf32>
    %103 = vector.shape_cast %102 : vector<256x9xf32> to vector<1x256x9xf32>
    %c0_30 = arith.constant 0 : index
    %c0_31 = arith.constant 0 : index
    %c0_32 = arith.constant 0 : index
    %104 = vector.load %arg10[%c0_30, %c0_31, %c0_32] : memref<1x256x9xf32, #tpu.memory_space<vmem>>, vector<1x256x9xf32>
    tpu.vector_store %arg10[%c0_30, %c0_31, %c0_32], %103 {strides = array<i32>} : memref<1x256x9xf32, #tpu.memory_space<vmem>>, vector<1x256x9xf32>,
    return
  }
  func.func @transform_0(%arg0: i32) -> (i32, i32, i32) {
    %c0_i32 = arith.constant 0 : i32
    %c0_i32_0 = arith.constant 0 : i32
    %c0_i32_1 = arith.constant 0 : i32
    return %arg0, %c0_i32, %c0_i32_0 : i32, i32, i32
  }
  func.func @transform_1(%arg0: i32) -> (i32, i32) {
    %c0_i32 = arith.constant 0 : i32
    %c0_i32_0 = arith.constant 0 : i32
    %c0_i32_1 = arith.constant 0 : i32
    return %c0_i32, %c0_i32_0 : i32, i32
  }
  func.func @transform_2(%arg0: i32) -> (i32, i32) {
    %c0_i32 = arith.constant 0 : i32
    %c0_i32_0 = arith.constant 0 : i32
    %c0_i32_1 = arith.constant 0 : i32
    return %c0_i32, %c0_i32_0 : i32, i32
  }
  func.func @transform_3(%arg0: i32) -> (i32, i32) {
    %c0_i32 = arith.constant 0 : i32
    %c0_i32_0 = arith.constant 0 : i32
    %c0_i32_1 = arith.constant 0 : i32
    return %c0_i32, %c0_i32_0 : i32, i32
  }
  func.func @transform_4(%arg0: i32) -> (i32, i32) {
    %c0_i32 = arith.constant 0 : i32
    %c0_i32_0 = arith.constant 0 : i32
    %c0_i32_1 = arith.constant 0 : i32
    return %c0_i32, %c0_i32_0 : i32, i32
  }
  func.func @transform_5(%arg0: i32) -> (i32, i32) {
    %c0_i32 = arith.constant 0 : i32
    %c0_i32_0 = arith.constant 0 : i32
    %c0_i32_1 = arith.constant 0 : i32
    return %c0_i32, %c0_i32_0 : i32, i32
  }
  func.func @transform_6(%arg0: i32) -> (i32, i32) {
    %c0_i32 = arith.constant 0 : i32
    %c0_i32_0 = arith.constant 0 : i32
    %c0_i32_1 = arith.constant 0 : i32
    return %c0_i32, %c0_i32_0 : i32, i32
  }
  func.func @transform_7(%arg0: i32) -> (i32, i32) {
    %c0_i32 = arith.constant 0 : i32
    %c0_i32_0 = arith.constant 0 : i32
    %c0_i32_1 = arith.constant 0 : i32
    return %c0_i32, %c0_i32_0 : i32, i32
  }
  func.func @transform_8(%arg0: i32) -> (i32, i32) {
    %c0_i32 = arith.constant 0 : i32
    %c0_i32_0 = arith.constant 0 : i32
    %c0_i32_1 = arith.constant 0 : i32
    return %c0_i32, %c0_i32_0 : i32, i32
  }
  func.func @transform_9(%arg0: i32) -> (i32, i32, i32) {
    %c0_i32 = arith.constant 0 : i32
    %c0_i32_0 = arith.constant 0 : i32
    %c0_i32_1 = arith.constant 0 : i32
    return %arg0, %c0_i32, %c0_i32_0 : i32, i32, i32
  }
}

</mosaic_0001>

<bundles_post_ra>
// kernel: tpu_custom_call.1
= control target key start
LH: loop header
LB: loop body
LE: loop exit
PB: predicated region body
PF: predicated region fallthrough
CT: control target
= control target key end

     0   :  { %s6586_s30 = smov 0   ;;  %s9402_s0 = inlined_call_operand.vmem [shape: bf16[2,256,25], index: 0, kind: input, shape index: {}]   ;;  %s9403_s1 = inlined_call_operand.vmem [shape: bf16[25,64], index: 1, kind: input, shape index: {}]   ;;  %s9404_s2 = inlined_call_operand.vmem [shape: f32[1,64], index: 2, kind: input, shape index: {}]   ;;  %s9405_s3 = inlined_call_operand.vmem [shape: bf16[576,64], index: 3, kind: input, shape index: {}]   ;;  %s9406_s4 = inlined_call_operand.vmem [shape: f32[1,64], index: 4, kind: input, shape index: {}]   ;;  %s9407_s5 = inlined_call_operand.vmem [shape: bf16[576,32], index: 5, kind: input, shape index: {}]   ;;  %s9408_s6 = inlined_call_operand.vmem [shape: f32[1,32], index: 6, kind: input, shape index: {}]   ;;  %s9409_s7 = inlined_call_operand.vmem [shape: bf16[288,9], index: 7, kind: input, shape index: {}]   ;;  %s9410_s8 = inlined_call_operand.vmem [shape: f32[1,9], index: 8, kind: input, shape index: {}]   ;;  %s9411_s9 = inlined_call_operand.vmem [shape: f32[2,256,9], index: 9, kind: output, shape index: {}]  }
   0x1 LB: > { %s5400_s10 = sadd.s32 4294967295, %s6529_s30   ;;  %p5404_p0 = scmp.ge.s32.totalorder %s6529_s30, 1  ;;  %s6529_s30 = sphi %s6586_s30, %s19_s30  }
   0x2   : > { %p287_p1 = scmp.lt.s32.totalorder %s6529_s30, 3 }
   0x4   : > { %p288_p2 = pnand %p5404_p0, %p287_p1 }
   0x6   : > { %291 = sbr.rel (%p288_p2) target bundleno = 1727 (0x6bf), region = 56 }
   0xd   : > { %v6414_v0 = vld [vmem:[%s9403_s1] sm:$0xff]   ;;  %vm517_vm0 = vcmask 1043456   ;;  %v6415_v1 = vld [vmem:[%s9403_s1 + $0x8] sm:$0x1f]   ;;  %vm518_vm1 = vcmask 1044480   ;;  %p323_p3 = scmp.lt.s32.totalorder %s5400_s10, 1 }
   0xe   : > { %6233 = vmatprep.subr.bf16.mxu0 %v6414_v0  ;;  %v6531_v2 = vmov 65535   ;;  %vm468_vm2 = vcmask 203776   ;;  %v6432_v22 = vld [vmem:[%s9405_s3 + $0x40] sm:$0xff]   ;;  %v6434_v24 = vld [vmem:[%s9405_s3 + $0x48] sm:$0xff]   ;;  %v6436_v26 = vld [vmem:[%s9405_s3 + $0x50] sm:$0xff]   ;;  %vm877_vm3 = vcmask 1040384  }
   0xf   : > { %6234 = vmatpush3.bf16.msra.mxu0 %v6414_v0  ;;  %v519_v3 = vsel %vm517_vm0, 4294967295, %v6531_v2  ;;  %s9465_s10 = smov (!%p323_p3, %s5400_s10), 1  ;;  %v6433_v23 = vld [vmem:[%s9405_s3] sm:$0xff]   ;;  %5615 = vmatprep.subr.bf16.mxu1 %v6432_v22  ;;  %v6435_v25 = vld [vmem:[%s9405_s3 + $0x8] sm:$0xff]   ;;  %v6437_v27 = vld [vmem:[%s9405_s3 + $0x10] sm:$0xff]   ;;  %v9431_v57 = vmov 0 }
  0x10   : > { %v520_v4 = vsel %vm518_vm1, %v519_v3, 0  ;;  %s5595_s15 = sshll.u32 %s9465_s10, 7  ;;  %5616 = vmatpush3.bf16.msra.mxu1 %v6433_v23  ;;  %v6438_v28 = vld [vmem:[%s9405_s3 + $0x58] sm:$0xff]   ;;  %v6440_v30 = vld [vmem:[%s9405_s3 + $0x60] sm:$0xff]   ;;  %v6442_v33 = vld [vmem:[%s9405_s3 + $0x68] sm:$0xff]   ;;  %s6533_s17 = smov 64  }
  0x11   : > { %v522_v5 = vand.u32 %v6415_v1, %v520_v4  ;;  %s6606_s18 = scalar_lea.vmem %s9402_s0, %s5595_s15  ;;  %5617 = vmatprep.subr.bf16.mxu1 %v6434_v24  ;;  %v6439_v29 = vld [vmem:[%s9405_s3 + $0x18] sm:$0xff]   ;;  %v6441_v31 = vld [vmem:[%s9405_s3 + $0x20] sm:$0xff]   ;;  %v6443_v37 = vld [vmem:[%s9405_s3 + $0x28] sm:$0xff]   ;;  %vm878_vm4 = vsmask.f32 256  ;;  %vm1132_vm7 = vcmask 1046528  }
  0x12   : > { %v6416_v6 = vld [vmem:[%s6606_s18] sm:$0xff]   ;;  %v6417_v7 = vld [vmem:[%s6606_s18 + $0x8] sm:$0xff]   ;;  %v6418_v8 = vld [vmem:[%s6606_s18 + $0x10] sm:$0xff]   ;;  %vm912_vm6 = vsmask.f32 7424  ;;  %vm1295_vm8 = vcmask 523264  }
  0x13   : > { %6235 = vmatprep.subr.bf16.mxu0 %v522_v5  ;;  %6237 = vmatprep.mubr.msk.bf16.mxu0 %vm468_vm2, %v6416_v6  ;;  %v6419_v9 = vld [vmem:[%s6606_s18 + $0x18] sm:$0xff]   ;;  %v6420_v10 = vld [vmem:[%s6606_s18 + $0x20] sm:$0xff]   ;;  %v6421_v11 = vld [vmem:[%s6606_s18 + $0x28] sm:$0xff]   ;;  %s6534_s24 = smov 32   ;;  %s6535_s20 = smov 96   ;;  %vm4550_vm10 = vcmask 261120  }
  0x14   : > { %6236 = vmatpush3.bf16.msra.mxu0 %v522_v5  ;;  %v6422_v12 = vld [vmem:[%s6606_s18 + $0x30] sm:$0xff]   ;;  %v6423_v13 = vld [vmem:[%s6606_s18 + $0x38] sm:$0xff]   ;;  %v6424_v14 = vld [vmem:[%s6606_s18 + $0x40] sm:$0xff]   ;;  %5618 = vmatpush3.bf16.msra.mxu1 %v6435_v25  ;;  %vm4615_vm11 = vcmask 785408   ;;  %s5596_s11 = sshll.u32 %s9465_s10, 8  ;;  %vm5312_vm12 = vcmask 72704  }
  0x15   : > { %v6425_v15 = vld [vmem:[%s6606_s18 + $0x48] sm:$0xff]   ;;  %v6426_v16 = vld [vmem:[%s6606_s18 + $0x50] sm:$0xff]   ;;  %v6427_v17 = vld [vmem:[%s6606_s18 + $0x58] sm:$0xff]   ;;  %5619 = vmatprep.subr.bf16.mxu1 %v6436_v26  ;;  %s9230_s14 = scalar_lea.vmem %s9411_s9, %s5596_s11 }
  0x16   : > { %v6428_v18 = vld [vmem:[%s6606_s18 + $0x60] sm:$0xff]   ;;  %v6429_v19 = vld [vmem:[%s6606_s18 + $0x68] sm:$0xff]   ;;  %v6430_v20 = vld [vmem:[%s6606_s18 + $0x70] sm:$0xff]  }
  0x17   : > { %6238 = vmatmul.mubr.msk.bf16.vlgmr.msra.gmra.mrb[0].mxu0 %vm468_vm2, %v6417_v7  ;;  %v6431_v21 = vld [vmem:[%s6606_s18 + $0x78] sm:$0xff]   ;;  %v6673_v32 = vld [vmem:[%s9404_s2] ss:$0 sm:$0xff]  ;;  %v6444_v40 = vld [vmem:[%s9405_s3 + $0x70] sm:$0xff]  }
  0x18   : > { %6241 = vmatprep.mubr.msk.bf16.mxu0 %vm468_vm2, %v6418_v8  ;;  %5620 = vmatpush3.bf16.msra.mxu1 %v6437_v27  ;;  %v6445_v46 = vld [vmem:[%s9405_s3 + $0x30] sm:$0xff]   ;;  %v6446_v49 = vld [vmem:[%s9405_s3 + $0x78] sm:$0xff]   ;;  %vm6698_vm5 = vmand %vm877_vm3, %vm878_vm4 }
  0x19   : > { %5621 = vmatprep.subr.bf16.mxu1 %v6438_v28  ;;  %v6447_v56 = vld [vmem:[%s9405_s3 + $0x38] sm:$0xff]   ;;  %v9432_v57 = vsel %vm6698_vm5, 4294967295, %v9431_v57  ;;  %v6706_v61 = vld [vmem:[%s9405_s3 + $0x100] sm:$0xff]   ;;  %vm7191_vm9 = vmneg %vm1295_vm8 }
  0x1a   : > { %9433 = vst [vmem:[#allocation2_spill] sm:$0xff] %v9432_v57 }
  0x1c   : > { %5622 = vmatpush3.bf16.msra.mxu1 %v6439_v29 }
  0x1d   : > { %5623 = vmatprep.subr.bf16.mxu1 %v6440_v30 }
  0x1f   : > { %6242 = vmatmul.mubr.msk.bf16.gmra.mrb[4].mxu0 %vm468_vm2, %v6419_v9 }
  0x20   : > { %6245 = vmatprep.mubr.msk.bf16.mxu0 %vm468_vm2, %v6420_v10  ;;  %5624 = vmatpush3.bf16.msra.mxu1 %v6441_v31 }
  0x21   : > { %5625 = vmatprep.subr.bf16.mxu1 %v6442_v33 }
  0x24   : > { %5626 = vmatpush3.bf16.msra.mxu1 %v6443_v37 }
  0x25   : > { %5627 = vmatprep.subr.bf16.mxu1 %v6444_v40 }
  0x27   : > { %6246 = vmatmul.mubr.msk.bf16.gmra.mrb[8].mxu0 %vm468_vm2, %v6421_v11 }
  0x28   : > { %6249 = vmatprep.mubr.msk.bf16.mxu0 %vm468_vm2, %v6422_v12  ;;  %5628 = vmatpush3.bf16.msra.mxu1 %v6445_v46 }
  0x29   : > { %5629 = vmatprep.subr.bf16.mxu1 %v6446_v49 }
  0x2c   : > { %5630 = vmatpush3.bf16.msra.mxu1 %v6447_v56 }
  0x2d   : > { %6269 = vmatprep.subr.bf16.mxu1 %v6706_v61 }
  0x2f   : > { %6250 = vmatmul.mubr.msk.bf16.gmra.mrb[12].mxu0 %vm468_vm2, %v6423_v13  ;;  %v9412_v13 = vmov 0  }
  0x30   : > { %6253 = vmatprep.mubr.msk.bf16.mxu0 %vm468_vm2, %v6424_v14  ;;  %v6719_v14 = vrot.slane %v9412_v13, 1 }
  0x32   : > { %9434 = vst [vmem:[#allocation3_spill] sm:$0xff] %v6719_v14 }
  0x37   : > { %6254 = vmatmul.mubr.msk.bf16.gmra.mrb[16].mxu0 %vm468_vm2, %v6425_v15 }
  0x38   : > { %6257 = vmatprep.mubr.msk.bf16.mxu0 %vm468_vm2, %v6426_v16 }
  0x3f   : > { %6258 = vmatmul.mubr.msk.bf16.gmra.mrb[20].mxu0 %vm468_vm2, %v6427_v17 }
  0x40   : > { %6261 = vmatprep.mubr.msk.bf16.mxu0 %vm468_vm2, %v6428_v18 }
  0x47   : > { %6262 = vmatmul.mubr.msk.bf16.gmra.mrb[24].mxu0 %vm468_vm2, %v6429_v19 }
  0x48   : > { %6265 = vmatprep.mubr.msk.bf16.mxu0 %vm468_vm2, %v6430_v20 }
  0x4f   : > { %6266 = vmatmul.mubr.msk.bf16.gmra.mrb[28].mxu0 %vm468_vm2, %v6431_v21 }
  0xea   : > { %v6239_v34 = vpop.f32.mrb[0].mxu0 }
  0xeb   : > { %v567_v35 = vadd.f32 %v6239_v34, %v6673_v32  ;;  %v558_v36 = vpop.f32.mrb[1].mxu0 }
  0xec   : > { %v559_v38 = vadd.f32 %v6673_v32, %v558_v36  ;;  %v6240_v39 = vpop.f32.mrb[2].mxu0 }
  0xed   : > { %v570_v41 = vadd.f32 %v6240_v39, %v6673_v32  ;;  %v561_v42 = vpop.f32.mrb[3].mxu0  ;;  %v687_v44 = vmax.f32 %v567_v35, 0.0 }
  0xee   : > { %v562_v43 = vadd.f32 %v6673_v32, %v561_v42  ;;  %v685_v47 = vmax.f32 %v559_v38, 0.0 }
  0xef   : > { %v688_v45 = vmax.f32 %v570_v41, 0.0 }
  0xf0   : > { %v686_v48 = vmax.f32 %v562_v43, 0.0 }
  0xf1   : > { %v718_v50 = vpack.c.bf16 %v688_v45, %v687_v44 }
  0xf2   : > { %v717_v51 = vpack.c.bf16 %v686_v48, %v685_v47  ;;  %v6243_v52 = vpop.f32.mrb[4].mxu0 }
  0xf3   : > { %v741_v53 = vshrl.u32 %v718_v50, 16  ;;  %v583_v54 = vadd.f32 %v6243_v52, %v6673_v32  ;;  %v574_v55 = vpop.f32.mrb[5].mxu0  ;;  %v744_v63 = vshll.u32 %v718_v50, 16 }
  0xf4   : > { %v734_v58 = vshrl.u32 %v717_v51, 16  ;;  %v575_v59 = vadd.f32 %v6673_v32, %v574_v55  ;;  %v6244_v60 = vpop.f32.mrb[6].mxu0  ;;  %v737_v4 = vshll.u32 %v717_v51, 16 }
  0xf5   : > { %v743_v62 = vrot.slane %v741_v53, 7  ;;  %v691_v0 = vmax.f32 %v583_v54, 0.0  ;;  %v586_v1 = vadd.f32 %v6244_v60, %v6673_v32  ;;  %v577_v2 = vpop.f32.mrb[7].mxu0 }
  0xf6   : > { %v736_v3 = vrot.slane %v734_v58, 7  ;;  %v689_v5 = vmax.f32 %v575_v59, 0.0  ;;  %v578_v6 = vadd.f32 %v6673_v32, %v577_v2 }
  0xf7   : > { %v746_v7 = vor.u32 %v744_v63, %v743_v62  ;;  %v6712_v8 = vsel %vm6698_vm5, %v743_v62, 0  ;;  %v692_v9 = vmax.f32 %v586_v1, 0.0 }
  0xf8   : > { %v739_v10 = vor.u32 %v737_v4, %v736_v3  ;;  %v6716_v11 = vsel %vm6698_vm5, %v736_v3, 0  ;;  %v690_v12 = vmax.f32 %v578_v6, 0.0  ;;  %v941_v17 = vshll.u32 %v6712_v8, 16 }
  0xf9   : > { %v720_v15 = vpack.c.bf16 %v692_v9, %v691_v0  ;;  %v6724_v16 = vsel %vm6698_vm5, 0, %v746_v7  ;;  %v929_v21 = vshll.u32 %v6716_v11, 16 }
  0xfa   : > { %v719_v18 = vpack.c.bf16 %v690_v12, %v689_v5  ;;  %1231 = vrot.lane.b32.xlu1 %v6724_v16, %s6533_s17  ;;  %v6247_v19 = vpop.f32.mrb[8].mxu0  ;;  %v6731_v20 = vsel %vm6698_vm5, 0, %v739_v10  ;;  %v934_v22 = vshrl.u32 %v6724_v16, 16  ;;  %v936_v27 = vshll.u32 %v6724_v16, 16 }
  0xfb   : > { %v755_v23 = vshrl.u32 %v720_v15, 16  ;;  %v758_v24 = vshll.u32 %v720_v15, 16  ;;  %v599_v25 = vadd.f32 %v6247_v19, %v6673_v32  ;;  %v590_v26 = vpop.f32.mrb[9].mxu0  ;;  %1229 = vrot.lane.b32.xlu0 %v6731_v20, %s6533_s17  ;;  %v924_v33 = vshll.u32 %v6731_v20, 16 }
  0xfc   : > { %v748_v28 = vshrl.u32 %v719_v18, 16  ;;  %v751_v29 = vshll.u32 %v719_v18, 16  ;;  %v591_v30 = vadd.f32 %v6673_v32, %v590_v26  ;;  %v6248_v31 = vpop.f32.mrb[10].mxu0  ;;  %v922_v38 = vshrl.u32 %v6731_v20, 16 }
  0xfd   : > { %v757_v34 = vrot.slane %v755_v23, 7  ;;  %v695_v35 = vmax.f32 %v599_v25, 0.0  ;;  %v602_v36 = vadd.f32 %v6248_v31, %v6673_v32  ;;  %v593_v37 = vpop.f32.mrb[11].mxu0  ;;  %v926_v42 = vrot.slane %v924_v33, 1 }
  0xfe   : > { %v750_v39 = vrot.slane %v748_v28, 7  ;;  %v693_v40 = vmax.f32 %v591_v30, 0.0  ;;  %v594_v41 = vadd.f32 %v6673_v32, %v593_v37  ;;  %v931_v45 = vrot.slane %v929_v21, 1 }
  0xff   : > { %v760_v43 = vor.u32 %v758_v24, %v757_v34  ;;  %v696_v44 = vmax.f32 %v602_v36, 0.0  ;;  %1197 = vrot.lane.b32.xlu0 %v6719_v14, %s6533_s17  ;;  %v938_v46 = vrot.slane %v936_v27, 1  ;;  %v927_v50 = vor.u32 %v926_v42, %v922_v38 }
 0x100   : > { %v753_v47 = vor.u32 %v751_v29, %v750_v39  ;;  %v6748_v48 = vsel %vm6698_vm5, %v750_v39, 0  ;;  %v694_v49 = vmax.f32 %v594_v41, 0.0  ;;  %v6752_v51 = vsel %vm6698_vm5, %v757_v34, 0 }
 0x101   : > { %v722_v52 = vpack.c.bf16 %v696_v44, %v695_v35  ;;  %v939_v53 = vor.u32 %v938_v46, %v934_v22  ;;  %v943_v54 = vrot.slane %v941_v17, 1  ;;  %v6755_v58 = vsel %vm912_vm6, %v927_v50, %v931_v45 }
 0x102   : > { %v721_v55 = vpack.c.bf16 %v694_v49, %v693_v40  ;;  %v6251_v56 = vpop.f32.mrb[12].mxu0  ;;  %v6759_v59 = vsel %vm6698_vm5, 0, %v753_v47  ;;  %v6763_v60 = vsel %vm6698_vm5, 0, %v760_v43  ;;  %1199 = vrot.lane.b32.xlu1 %v6755_v58, %s6533_s17  ;;  %v953_v2 = vshll.u32 %v6748_v48, 16 }
 0x103   : > { %v769_v62 = vshrl.u32 %v722_v52, 16  ;;  %v772_v63 = vshll.u32 %v722_v52, 16  ;;  %v615_v0 = vadd.f32 %v6251_v56, %v6673_v32  ;;  %v606_v1 = vpop.f32.mrb[13].mxu0  ;;  %1233 = vrot.lane.b32.xlu0 %v6759_v59, %s6533_s17  ;;  %v946_v7 = vshrl.u32 %v6759_v59, 16 }
 0x104   : > { %v762_v3 = vshrl.u32 %v721_v55, 16  ;;  %v765_v4 = vshll.u32 %v721_v55, 16  ;;  %v607_v5 = vadd.f32 %v6673_v32, %v606_v1  ;;  %v6252_v6 = vpop.f32.mrb[14].mxu0  ;;  %v948_v17 = vshll.u32 %v6759_v59, 16 }
 0x105   : > { %v771_v9 = vrot.slane %v769_v62, 7  ;;  %v699_v10 = vmax.f32 %v615_v0, 0.0  ;;  %v618_v12 = vadd.f32 %v6252_v6, %v6673_v32  ;;  %v609_v15 = vpop.f32.mrb[15].mxu0  ;;  %v6777_v22 = vsel %vm912_vm6, %v939_v53, %v943_v54 }
 0x106   : > { %v764_v18 = vrot.slane %v762_v3, 7  ;;  %v697_v19 = vmax.f32 %v607_v5, 0.0  ;;  %v610_v21 = vadd.f32 %v6673_v32, %v609_v15  ;;  %1201 = vrot.lane.b32.xlu1 %v6777_v22, %s6533_s17  ;;  %v950_v25 = vrot.slane %v948_v17, 1 }
 0x107   : > { %v774_v23 = vor.u32 %v772_v63, %v771_v9  ;;  %v700_v24 = vmax.f32 %v618_v12, 0.0  ;;  %1235 = vrot.lane.b32.xlu0 %v6763_v60, %s6533_s17  ;;  %v955_v26 = vrot.slane %v953_v2, 1  ;;  %v958_v30 = vshrl.u32 %v6763_v60, 16 }
 0x108   : > { %v767_v27 = vor.u32 %v765_v4, %v764_v18  ;;  %v6785_v28 = vsel %vm6698_vm5, %v764_v18, 0  ;;  %v698_v29 = vmax.f32 %v610_v21, 0.0  ;;  %v951_v33 = vor.u32 %v950_v25, %v946_v7 }
 0x109   : > { %v724_v31 = vpack.c.bf16 %v700_v24, %v699_v10  ;;  %v960_v34 = vshll.u32 %v6763_v60, 16  ;;  %v965_v35 = vshll.u32 %v6752_v51, 16  ;;  %v6796_v39 = vsel %vm6698_vm5, 0, %v774_v23 }
 0x10a   : > { %v723_v36 = vpack.c.bf16 %v698_v29, %v697_v19  ;;  %v6255_v37 = vpop.f32.mrb[16].mxu0  ;;  %v6792_v38 = vsel %vm6698_vm5, 0, %v767_v27  ;;  %v977_v40 = vshll.u32 %v6785_v28, 16  ;;  %v6801_v44 = vsel %vm912_vm6, %v951_v33, %v955_v26  ;;  %v6449_v26 = vld [vmem:[%s9405_s3 + $0xc0] sm:$0xff]  }
 0x10b   : > { %v783_v41 = vshrl.u32 %v724_v31, 16  ;;  %v786_v42 = vshll.u32 %v724_v31, 16  ;;  %v631_v43 = vadd.f32 %v6255_v37, %v6673_v32  ;;  %v622_v45 = vpop.f32.mrb[17].mxu0  ;;  %1237 = vrot.lane.b32.xlu0 %v6792_v38, %s6533_s17  ;;  %1203 = vrot.lane.b32.xlu1 %v6801_v44, %s6533_s17  ;;  %v962_v52 = vrot.slane %v960_v34, 1  ;;  %v6450_v27 = vld [vmem:[%s9405_s3 + $0x80] sm:$0xff]  }
 0x10c   : > { %v776_v46 = vshrl.u32 %v723_v36, 16  ;;  %v779_v47 = vshll.u32 %v723_v36, 16  ;;  %v623_v49 = vadd.f32 %v6673_v32, %v622_v45  ;;  %v6256_v50 = vpop.f32.mrb[18].mxu0  ;;  %v967_v62 = vrot.slane %v965_v35, 1  ;;  %5727 = vmatprep.subr.bf16.mxu0 %v6449_v26 }
 0x10d   : > { %v785_v53 = vrot.slane %v783_v41, 7  ;;  %v703_v54 = vmax.f32 %v631_v43, 0.0  ;;  %v634_v55 = vadd.f32 %v6256_v50, %v6673_v32  ;;  %v625_v56 = vpop.f32.mrb[19].mxu0  ;;  %v963_v2 = vor.u32 %v962_v52, %v958_v30  ;;  %5728 = vmatpush3.bf16.msra.mxu0 %v6450_v27 }
 0x10e   : > { %v778_v63 = vrot.slane %v776_v46, 7  ;;  %v701_v0 = vmax.f32 %v623_v49, 0.0  ;;  %v626_v1 = vadd.f32 %v6673_v32, %v625_v56  ;;  %v6812_v3 = vsel %vm6698_vm5, %v771_v9, 0 }
 0x10f   : > { %v788_v4 = vor.u32 %v786_v42, %v785_v53  ;;  %v704_v5 = vmax.f32 %v634_v55, 0.0  ;;  %1239 = vrot.lane.b32.xlu0 %v6796_v39, %s6533_s17  ;;  %v6817_v10 = vsel %vm912_vm6, %v963_v2, %v967_v62  ;;  %v970_v12 = vshrl.u32 %v6792_v38, 16 }
 0x110   : > { %v781_v6 = vor.u32 %v779_v47, %v778_v63  ;;  %v702_v7 = vmax.f32 %v626_v1, 0.0  ;;  %1205 = vrot.lane.b32.xlu1 %v6817_v10, %s6533_s17  ;;  %v972_v17 = vshll.u32 %v6792_v38, 16  ;;  %v979_v9 = vrot.slane %v977_v40, 1 }
 0x111   : > { %v726_v15 = vpack.c.bf16 %v704_v5, %v703_v54  ;;  %v982_v18 = vshrl.u32 %v6796_v39, 16  ;;  %v984_v24 = vshll.u32 %v6796_v39, 16  ;;  %v989_v25 = vshll.u32 %v6812_v3, 16 }
 0x112   : > { %v725_v19 = vpack.c.bf16 %v702_v7, %v701_v0  ;;  %v6259_v21 = vpop.f32.mrb[20].mxu0  ;;  %v6826_v23 = vsel %vm6698_vm5, 0, %v781_v6  ;;  %v974_v33 = vrot.slane %v972_v17, 1  ;;  %v6844_v55 = vsel %vm6698_vm5, %v785_v53, 0  ;;  %v6453_v17 = vld [vmem:[%s9405_s3 + $0x88] sm:$0xff]  }
 0x113   : > { %v797_v29 = vshrl.u32 %v726_v15, 16  ;;  %v800_v30 = vshll.u32 %v726_v15, 16  ;;  %v647_v31 = vadd.f32 %v6259_v21, %v6673_v32  ;;  %v638_v34 = vpop.f32.mrb[21].mxu0  ;;  %1241 = vrot.lane.b32.xlu0 %v6826_v23, %s6533_s17  ;;  %v986_v41 = vrot.slane %v984_v24, 1  ;;  %v6452_v15 = vld [vmem:[%s9405_s3 + $0xc8] sm:$0xff]  }
 0x114   : > { %v790_v35 = vshrl.u32 %v725_v19, 16  ;;  %v793_v36 = vshll.u32 %v725_v19, 16  ;;  %v639_v37 = vadd.f32 %v6673_v32, %v638_v34  ;;  %v6260_v40 = vpop.f32.mrb[22].mxu0  ;;  %v975_v45 = vor.u32 %v974_v33, %v970_v12  ;;  %5729 = vmatprep.subr.bf16.mxu0 %v6452_v15 }
 0x115   : > { %v799_v42 = vrot.slane %v797_v29, 7  ;;  %v707_v43 = vmax.f32 %v647_v31, 0.0  ;;  %v650_v46 = vadd.f32 %v6260_v40, %v6673_v32  ;;  %v641_v47 = vpop.f32.mrb[23].mxu0  ;;  %v987_v54 = vor.u32 %v986_v41, %v982_v18  ;;  %5730 = vmatpush3.bf16.msra.mxu0 %v6453_v17 }
 0x116   : > { %v792_v49 = vrot.slane %v790_v35, 7  ;;  %v705_v50 = vmax.f32 %v639_v37, 0.0  ;;  %v642_v52 = vadd.f32 %v6673_v32, %v641_v47  ;;  %v6848_v56 = vsel %vm6698_vm5, %v778_v63, 0 }
 0x117   : > { %v6851_v62 = vsel %vm912_vm6, %v975_v45, %v979_v9  ;;  %v708_v0 = vmax.f32 %v650_v46, 0.0  ;;  %v802_v1 = vor.u32 %v800_v30, %v799_v42  ;;  %v991_v6 = vrot.slane %v989_v25, 1  ;;  %v6454_v45 = vld [vmem:[%s9405_s3 + $0xd0] sm:$0xff]  }
 0x118   : > { %v795_v2 = vor.u32 %v793_v36, %v792_v49  ;;  %1207 = vrot.lane.b32.xlu1 %v6851_v62, %s6533_s17  ;;  %v706_v5 = vmax.f32 %v642_v52, 0.0  ;;  %v6857_v53 = vsel %vm6698_vm5, 0, %v788_v4  ;;  %v994_v12 = vshrl.u32 %v6826_v23, 16  ;;  %v6455_v46 = vld [vmem:[%s9405_s3 + $0x90] sm:$0xff]   ;;  %5731 = vmatprep.subr.bf16.mxu0 %v6454_v45 }
 0x119   : > { %v728_v7 = vpack.c.bf16 %v708_v0, %v707_v43  ;;  %v996_v63 = vshll.u32 %v6826_v23, 16  ;;  %v6868_v18 = vsel %vm912_vm6, %v987_v54, %v991_v6  ;;  %1243 = vrot.lane.b32.xlu0 %v6857_v53, %s6533_s17  ;;  %v1001_v19 = vshll.u32 %v6848_v56, 16  ;;  %5732 = vmatpush3.bf16.msra.mxu0 %v6455_v46 }
 0x11a   : > { %v727_v9 = vpack.c.bf16 %v706_v5, %v705_v50  ;;  %v6263_v4 = vpop.f32.mrb[24].mxu0  ;;  %v6875_v21 = vsel %vm6698_vm5, 0, %v795_v2  ;;  %v6890_v47 = vsel %vm6698_vm5, %v799_v42, 0  ;;  %v6897_v0 = vsel %vm6698_vm5, %v792_v49, 0 }
 0x11b   : > { %v811_v24 = vshrl.u32 %v728_v7, 16  ;;  %v814_v25 = vshll.u32 %v728_v7, 16  ;;  %v663_v26 = vadd.f32 %v6263_v4, %v6673_v32  ;;  %v998_v27 = vrot.slane %v996_v63, 1  ;;  %v654_v29 = vpop.f32.mrb[25].mxu0 }
 0x11c   : > { %v804_v30 = vshrl.u32 %v727_v9, 16  ;;  %v807_v31 = vshll.u32 %v727_v9, 16  ;;  %1209 = vrot.lane.b32.xlu1 %v6868_v18, %s6533_s17  ;;  %v1003_v33 = vrot.slane %v1001_v19, 1  ;;  %v655_v34 = vadd.f32 %v6673_v32, %v654_v29  ;;  %v6264_v35 = vpop.f32.mrb[26].mxu0 }
 0x11d   : > { %v813_v36 = vrot.slane %v811_v24, 7  ;;  %v711_v37 = vmax.f32 %v663_v26, 0.0  ;;  %v999_v40 = vor.u32 %v998_v27, %v994_v12  ;;  %v666_v41 = vadd.f32 %v6264_v35, %v6673_v32  ;;  %v657_v43 = vpop.f32.mrb[27].mxu0  ;;  %1245 = vrot.lane.b32.xlu0 %v6875_v21, %s6533_s17  ;;  %v6456_v27 = vld [vmem:[%s9405_s3 + $0xd8] sm:$0xff]  }
 0x11e   : > { %v806_v50 = vrot.slane %v804_v30, 7  ;;  %v709_v52 = vmax.f32 %v655_v34, 0.0  ;;  %v658_v54 = vadd.f32 %v6673_v32, %v657_v43  ;;  %v1006_v6 = vshrl.u32 %v6857_v53, 16  ;;  %5733 = vmatprep.subr.bf16.mxu0 %v6456_v27 }
 0x11f   : > { %v6900_v2 = vsel %vm912_vm6, %v999_v40, %v1003_v33  ;;  %v712_v5 = vmax.f32 %v666_v41, 0.0  ;;  %v816_v42 = vor.u32 %v814_v25, %v813_v36  ;;  %v1008_v63 = vshll.u32 %v6857_v53, 16 }
 0x120   : > { %v809_v7 = vor.u32 %v807_v31, %v806_v50  ;;  %1211 = vrot.lane.b32.xlu1 %v6900_v2, %s6533_s17  ;;  %v710_v12 = vmax.f32 %v658_v54, 0.0  ;;  %v1013_v49 = vshll.u32 %v6844_v55, 16  ;;  %v6909_v17 = vsel %vm6698_vm5, 0, %v802_v1  ;;  %v6457_v1 = vld [vmem:[%s9405_s3 + $0x98] sm:$0xff]  }
 0x121   : > { %v730_v15 = vpack.c.bf16 %v712_v5, %v711_v37  ;;  %v1018_v9 = vshrl.u32 %v6875_v21, 16  ;;  %v1010_v19 = vrot.slane %v1008_v63, 1  ;;  %1247 = vrot.lane.b32.xlu0 %v6909_v17, %s6533_s17  ;;  %v1020_v25 = vshll.u32 %v6875_v21, 16  ;;  %5734 = vmatpush3.bf16.msra.mxu0 %v6457_v1 }
 0x122   : > { %v729_v4 = vpack.c.bf16 %v710_v12, %v709_v52  ;;  %v6267_v24 = vpop.f32.mrb[28].mxu0  ;;  %v1025_v26 = vshll.u32 %v6897_v0, 16  ;;  %v1015_v31 = vrot.slane %v1013_v49, 1  ;;  %v6925_v45 = vsel %vm6698_vm5, %v813_v36, 0  ;;  %v6458_v36 = vld [vmem:[%s9405_s3 + $0xe0] sm:$0xff]  }
 0x123   : > { %v825_v29 = vshrl.u32 %v730_v15, 16  ;;  %v828_v30 = vshll.u32 %v730_v15, 16  ;;  %v679_v33 = vadd.f32 %v6267_v24, %v6673_v32  ;;  %v670_v34 = vpop.f32.mrb[29].mxu0  ;;  %v1011_v40 = vor.u32 %v1010_v19, %v1006_v6  ;;  %v6459_v49 = vld [vmem:[%s9405_s3 + $0xa0] sm:$0xff]   ;;  %5735 = vmatprep.subr.bf16.mxu0 %v6458_v36 }
 0x124   : > { %v818_v35 = vshrl.u32 %v729_v4, 16  ;;  %v821_v37 = vshll.u32 %v729_v4, 16  ;;  %v1022_v41 = vrot.slane %v1020_v25, 1  ;;  %v6268_v43 = vpop.f32.mrb[30].mxu0  ;;  %v1027_v52 = vrot.slane %v1025_v26, 1 }
 0x125   : > { %v827_v46 = vrot.slane %v825_v29, 7  ;;  %v671_v54 = vadd.f32 %v6673_v32, %v670_v34  ;;  %v673_v5 = vpop.f32.mrb[31].mxu0  ;;  %v6929_v63 = vsel %vm912_vm6, %v1011_v40, %v1015_v31  ;;  %v6933_v6 = vsel %vm6698_vm5, 0, %v809_v7  ;;  %5736 = vmatpush3.bf16.msra.mxu0 %v6459_v49 }
 0x126   : > { %v820_v12 = vrot.slane %v818_v35, 7  ;;  %v1023_v15 = vor.u32 %v1022_v41, %v1018_v9  ;;  %v6943_v4 = vsel %vm6698_vm5, %v806_v50, 0  ;;  %1213 = vrot.lane.b32.xlu1 %v6929_v63, %s6533_s17  ;;  %v715_v9 = vmax.f32 %v679_v33, 0.0  ;;  %1249 = vrot.lane.b32.xlu0 %v6933_v6, %s6533_s17 }
 0x127   : > { %v830_v19 = vor.u32 %v828_v30, %v827_v46  ;;  %v682_v7 = vadd.f32 %v6268_v43, %v6673_v32  ;;  %v713_v26 = vmax.f32 %v671_v54, 0.0  ;;  %v674_v27 = vadd.f32 %v6673_v32, %v673_v5  ;;  %v6460_v32 = vld [vmem:[%s9405_s3 + $0xe8] sm:$0xff]  }
 0x128   : > { %v823_v24 = vor.u32 %v821_v37, %v820_v12  ;;  %v6951_v25 = vsel %vm912_vm6, %v1023_v15, %v1027_v52  ;;  %v1030_v1 = vshrl.u32 %v6909_v17, 16  ;;  %v1032_v29 = vshll.u32 %v6909_v17, 16  ;;  %v6461_v37 = vld [vmem:[%s9405_s3 + $0xa8] sm:$0xff]   ;;  %5737 = vmatprep.subr.bf16.mxu0 %v6460_v32 }
 0x129   : > { %v716_v50 = vmax.f32 %v682_v7, 0.0  ;;  %v1037_v30 = vshll.u32 %v6890_v47, 16  ;;  %v714_v31 = vmax.f32 %v674_v27, 0.0  ;;  %v6959_v33 = vsel %vm6698_vm5, 0, %v816_v42  ;;  %5738 = vmatpush3.bf16.msra.mxu0 %v6461_v37 }
 0x12a   : > { %v1042_v34 = vshrl.u32 %v6933_v6, 16  ;;  %v1044_v35 = vshll.u32 %v6933_v6, 16  ;;  %1215 = vrot.lane.b32.xlu1 %v6951_v25, %s6533_s17  ;;  %v1034_v41 = vrot.slane %v1032_v29, 1  ;;  %1251 = vrot.lane.b32.xlu0 %v6959_v33, %s6533_s17  ;;  %v1049_v42 = vshll.u32 %v6943_v4, 16 }
 0x12b   : > { %v732_v40 = vpack.c.bf16 %v716_v50, %v715_v9  ;;  %v1039_v43 = vrot.slane %v1037_v30, 1  ;;  %v6976_v52 = vsel %vm6698_vm5, %v827_v46, 0  ;;  %v731_v54 = vpack.c.bf16 %v714_v31, %v713_v26  ;;  %v6462_v46 = vld [vmem:[%s9405_s3 + $0xf0] sm:$0xff]  }
 0x12c   : > { %v1046_v5 = vrot.slane %v1044_v35, 1  ;;  %v6980_v15 = vsel %vm6698_vm5, 0, %v823_v24  ;;  %v1035_v49 = vor.u32 %v1034_v41, %v1030_v1  ;;  %v1051_v9 = vrot.slane %v1049_v42, 1  ;;  %v6463_v24 = vld [vmem:[%s9405_s3 + $0xb0] sm:$0xff]   ;;  %5739 = vmatprep.subr.bf16.mxu0 %v6462_v46 }
 0x12d   : > { %v839_v36 = vshrl.u32 %v732_v40, 16  ;;  %v1054_v7 = vshrl.u32 %v6959_v33, 16  ;;  %v832_v27 = vshrl.u32 %v731_v54, 16  ;;  %v835_v50 = vshll.u32 %v731_v54, 16  ;;  %5740 = vmatpush3.bf16.msra.mxu0 %v6463_v24 }
 0x12e   : > { %v1047_v29 = vor.u32 %v1046_v5, %v1042_v34  ;;  %v1056_v30 = vshll.u32 %v6959_v33, 16  ;;  %v6992_v26 = vsel %vm6698_vm5, %v820_v12, 0  ;;  %v842_v1 = vshll.u32 %v732_v40, 16  ;;  %1253 = vrot.lane.b32.xlu0 %v6980_v15, %s6533_s17 }
 0x12f   : > { %v6995_v31 = vsel %vm912_vm6, %v1035_v49, %v1039_v43  ;;  %v1061_v34 = vshll.u32 %v6925_v45, 16  ;;  %v7000_v35 = vrot.slane %v839_v36, 7  ;;  %v834_v32 = vrot.slane %v832_v27, 7  ;;  %v6464_v49 = vld [vmem:[%s9405_s3 + $0xf8] sm:$0xff]  }
 0x130   : > { %1217 = vrot.lane.b32.xlu1 %v6995_v31, %s6533_s17  ;;  %v1058_v37 = vrot.slane %v1056_v30, 1  ;;  %v7006_v12 = vsel %vm6698_vm5, 0, %v830_v19  ;;  %v7009_v40 = vsel %vm912_vm6, %v1047_v29, %v1051_v9  ;;  %v1066_v43 = vshrl.u32 %v6980_v15, 16  ;;  %v6465_v19 = vld [vmem:[%s9405_s3 + $0xb8] sm:$0xff]   ;;  %5741 = vmatprep.subr.bf16.mxu0 %v6464_v49 }
 0x131   : > { %v1063_v41 = vrot.slane %v1061_v34, 1  ;;  %v1068_v42 = vshll.u32 %v6980_v15, 16  ;;  %v837_v54 = vor.u32 %v835_v50, %v834_v32  ;;  %v1073_v36 = vshll.u32 %v6992_v26, 16  ;;  %5742 = vmatpush3.bf16.msra.mxu0 %v6465_v19 }
 0x132   : > { %v1059_v5 = vor.u32 %v1058_v37, %v1054_v7  ;;  %1255 = vrot.lane.b32.xlu0 %v7006_v12, %s6533_s17  ;;  %v1080_v27 = vshll.u32 %v7006_v12, 16  ;;  %v844_v29 = vor.u32 %v842_v1, %v7000_v35  ;;  %v1078_v50 = vshrl.u32 %v7006_v12, 16 }
 0x133   : > { %v1070_v9 = vrot.slane %v1068_v42, 1  ;;  %v7028_v7 = vsel %vm6698_vm5, 0, %v837_v54  ;;  %v1085_v30 = vshll.u32 %v6976_v52, 16  ;;  %v1075_v34 = vrot.slane %v1073_v36, 1 }
 0x134   : > { %1219 = vrot.lane.b32.xlu1 %v7009_v40, %s6533_s17  ;;  %v7033_v46 = vsel %vm912_vm6, %v1059_v5, %v1063_v41  ;;  %v1082_v37 = vrot.slane %v1080_v27, 1  ;;  %v7037_v1 = vsel %vm6698_vm5, %v834_v32, 0  ;;  %v1092_v42 = vshll.u32 %v7028_v7, 16 }
 0x135   : > { %v1071_v24 = vor.u32 %v1070_v9, %v1066_v43  ;;  %v1087_v54 = vrot.slane %v1085_v30, 1  ;;  %v7046_v41 = vsel %vm6698_vm5, 0, %v844_v29  ;;  %v1090_v43 = vshrl.u32 %v7028_v7, 16 }
 0x136   : > { %1257 = vrot.lane.b32.xlu0 %v7028_v7, %s6533_s17  ;;  %v1083_v32 = vor.u32 %v1082_v37, %v1078_v50  ;;  %v1094_v36 = vrot.slane %v1092_v42, 1  ;;  %v1097_v49 = vshll.u32 %v7037_v1, 16  ;;  %v1135_v19 = vrot.slane %v6731_v20, 1 }
 0x137   : > { %v7050_v5 = vsel %vm912_vm6, %v1071_v24, %v1075_v34  ;;  %v1136_v9 = vrot.slane %v6716_v11, 1  ;;  %v1141_v24 = vrot.slane %v6759_v59, 1  ;;  %v1142_v34 = vrot.slane %v6748_v48, 1 }
 0x138   : > { %1221 = vrot.lane.b32.xlu1 %v7033_v46, %s6533_s17  ;;  %v7060_v27 = vsel %vm912_vm6, %v1083_v32, %v1087_v54  ;;  %v1095_v29 = vor.u32 %v1094_v36, %v1090_v43  ;;  %v1099_v30 = vrot.slane %v1097_v49, 1  ;;  %v1147_v42 = vrot.slane %v6792_v38, 1 }
 0x139   : > { %v7063_v50 = vsel %vm1132_vm7, %v1135_v19, %v1136_v9  ;;  %v7075_v37 = vsel %vm1132_vm7, %v1141_v24, %v1142_v34  ;;  %v1148_v54 = vrot.slane %v6785_v28, 1  ;;  %v1138_v43 = vrot.slane %v6724_v16, 1 }
 0x13a   : > { %1259 = vrot.lane.b32.xlu0 %v7046_v41, %s6533_s17  ;;  %v7072_v11 = vsel %vm912_vm6, %v1095_v29, %v1099_v30  ;;  %v1139_v48 = vrot.slane %v6712_v8, 1  ;;  %v1153_v36 = vrot.slane %v6826_v23, 1  ;;  %v1154_v49 = vrot.slane %v6848_v56, 1 }
 0x13b   : > { %v7086_v32 = vsel %vm1132_vm7, %v1147_v42, %v1148_v54  ;;  %v1144_v28 = vrot.slane %v6763_v60, 1  ;;  %v1145_v9 = vrot.slane %v6752_v51, 1  ;;  %v1159_v29 = vrot.slane %v6875_v21, 1 }
 0x13c   : > { %1223 = vrot.lane.b32.xlu1 %v7050_v5, %s6533_s17  ;;  %v7091_v19 = vsel %vm1132_vm7, %v1138_v43, %v1139_v48  ;;  %v7100_v8 = vsel %vm1132_vm7, %v1153_v36, %v1154_v49  ;;  %v1160_v56 = vrot.slane %v6897_v0, 1  ;;  %v1150_v24 = vrot.slane %v6796_v39, 1 }
 0x13d   : > { %v7105_v30 = vsel %vm1132_vm7, %v1144_v28, %v1145_v9  ;;  %v1151_v51 = vrot.slane %v6812_v3, 1  ;;  %v1183_v34 = vshll.u32 %v7046_v41, 16  ;;  %v911_v42 = vsel %vm6698_vm5, %v7000_v35, 0 }
 0x13e   : > { %1261 = vrot.lane.b32.xlu0 %v7063_v50, %s6533_s17  ;;  %v7118_v0 = vsel %vm1132_vm7, %v1159_v29, %v1160_v56  ;;  %v1165_v54 = vrot.slane %v6933_v6, 1  ;;  %v1166_v43 = vrot.slane %v6943_v4, 1  ;;  %v1156_v48 = vrot.slane %v6857_v53, 1 }
 0x13f   : > { %v7123_v3 = vsel %vm1132_vm7, %v1150_v24, %v1151_v51  ;;  %v1157_v36 = vrot.slane %v6844_v55, 1  ;;  %v1171_v49 = vrot.slane %v6980_v15, 1  ;;  %v1172_v35 = vrot.slane %v6992_v26, 1 }
 0x140   : > { %1225 = vrot.lane.b32.xlu1 %v7060_v27, %s6533_s17  ;;  %v1181_v28 = vshrl.u32 %v7046_v41, 16  ;;  %v1185_v4 = vrot.slane %v1183_v34, 1  ;;  %v1188_v9 = vshll.u32 %v911_v42, 16  ;;  %v7135_v29 = vsel %vm1132_vm7, %v1165_v54, %v1166_v43 }
 0x141   : > { %v7138_v56 = vsel %vm1132_vm7, %v1156_v48, %v1157_v36  ;;  %v1162_v55 = vrot.slane %v6909_v17, 1  ;;  %v1163_v24 = vrot.slane %v6890_v47, 1  ;;  %v7147_v26 = vsel %vm1132_vm7, %v1171_v49, %v1172_v35 }
 0x142   : > { %1265 = vrot.lane.b32.xlu0 %v7075_v37, %s6533_s17  ;;  %v1186_v51 = vor.u32 %v1185_v4, %v1181_v28  ;;  %v1190_v34 = vrot.slane %v1188_v9, 1  ;;  %v1168_v43 = vrot.slane %v6959_v33, 1  ;;  %v1169_v48 = vrot.slane %v6925_v45, 1 }
 0x143   : > { %v7150_v54 = vsel %vm1132_vm7, %v1162_v55, %v1163_v24  ;;  %v1194_v36 = vrot.slane %v7046_v41, 1  ;;  %v1195_v49 = vrot.slane %v911_v42, 1  ;;  %v1174_v35 = vrot.slane %v7006_v12, 1 }
 0x144   : > { %1227 = vrot.lane.b32.xlu1 %v7072_v11, %s6533_s17  ;;  %v7159_v47 = vsel %vm912_vm6, %v1186_v51, %v1190_v34  ;;  %v1175_v28 = vrot.slane %v6976_v52, 1  ;;  %v7165_v4 = vsel %vm1132_vm7, %v1168_v43, %v1169_v48  ;;  %v1177_v42 = vrot.slane %v7028_v7, 1  ;;  %v6451_v43 = vld [vmem:[%s9405_s3 + $0x108] sm:$0xff]  }
 0x145   : > { %9435 = vst [vmem:[#allocation4_spill] sm:$0xff] %v7159_v47  ;;  %v7172_v45 = vsel %vm1132_vm7, %v1194_v36, %v1195_v49  ;;  %v1178_v55 = vrot.slane %v7037_v1, 1  ;;  %v9437_v1 = vmov 0  ;;  %v6466_v49 = vld [vmem:[%s9405_s3 + $0x110] sm:$0xff]  }
 0x146   : > { %1269 = vrot.lane.b32.xlu0 %v7086_v32, %s6533_s17  ;;  %9436 = vst [vmem:[#allocation5_spill] sm:$0xff] %v7172_v45  ;;  %v7175_v9 = vsel %vm1132_vm7, %v1174_v35, %v1175_v28  ;;  %v9438_v1 = vsel %vm7191_vm9, 4294967295, %v9437_v1 }
 0x147   : > { %v7184_v52 = vsel %vm1132_vm7, %v1177_v42, %v1178_v55  ;;  %9439 = vst [vmem:[#allocation6_spill] sm:$0xff] %v9438_v1 }
 0x148   : > { %1263 = vrot.lane.b32.xlu1 %v7091_v19, %s6533_s17 }
 0x14a   : > { %1273 = vrot.lane.b32.xlu0 %v7100_v8, %s6533_s17 }
 0x14c   : > { %1267 = vrot.lane.b32.xlu1 %v7105_v30, %s6533_s17 }
 0x14e   : > { %1277 = vrot.lane.b32.xlu0 %v7118_v0, %s6533_s17 }
 0x150   : > { %1271 = vrot.lane.b32.xlu1 %v7123_v3, %s6533_s17 }
 0x152   : > { %1281 = vrot.lane.b32.xlu0 %v7135_v29, %s6533_s17 }
 0x154   : > { %1275 = vrot.lane.b32.xlu1 %v7138_v56, %s6533_s17 }
 0x156   : > { %1285 = vrot.lane.b32.xlu0 %v7147_v26, %s6533_s17 }
 0x158   : > { %1279 = vrot.lane.b32.xlu1 %v7150_v54, %s6533_s17 }
 0x15a   : > { %1293 = vrot.lane.b32.xlu0 %v7159_v47, %s6533_s17 }
 0x15c   : > { %1283 = vrot.lane.b32.xlu1 %v7165_v4, %s6533_s17 }
 0x15e   : > { %1291 = vrot.lane.b32.xlu0 %v7172_v45, %s6533_s17 }
 0x160   : > { %1287 = vrot.lane.b32.xlu1 %v7175_v9, %s6533_s17 }
 0x164   : > { %1289 = vrot.lane.b32.xlu1 %v7184_v52, %s6533_s17 }
 0x16c   : > { %v1232_v34 = vpop.permute.xlu1 %1231 }
 0x16d   : > { %v1230_v24 = vpop.permute.xlu0 %1229  ;;  %v1350_v36 = vsel %vm1295_vm8, %v7063_v50, %v1232_v34  ;;  %v6467_v50 = vld [vmem:[%s9405_s3 + $0x118] sm:$0xff]  }
 0x16e   : > { %v1346_v51 = vsel %vm1295_vm8, %v6719_v14, %v1230_v24 }
 0x16f   : > { %1835 = vmatprep.mubr.bf16.mxu1 %v1346_v51 }
 0x171   : > { %v7198_v48 = vpop.permute.xlu0 %1197 }
 0x172   : > { %9440 = vst [vmem:[#allocation7_spill] sm:$0xff] %v7198_v48  ;;  %5482 = vmatmul.mubr.msk.bf16.vlgmr.msra.gmra.mrb[0].mxu1 %vm7191_vm9, %v7198_v48 }
 0x173   : > { %6270 = vmatpush3.bf16.msra.mxu1 %v6706_v61  ;;  %1843 = vmatprep.mubr.bf16.mxu1 %v1350_v36 }
 0x174   : > { %6271 = vmatprep.subr.bf16.mxu1 %v6451_v43  ;;  %v1200_v35 = vpop.permute.xlu1 %1199 }
 0x175   : > { %v1234_v28 = vpop.permute.xlu0 %1233  ;;  %v1300_v24 = vsel %vm1295_vm8, %v6731_v20, %v1200_v35 }
 0x176   : > { %v1354_v51 = vsel %vm1295_vm8, %v7091_v19, %v1234_v28 }
 0x177   : > { %6272 = vmatpush3.bf16.msra.mxu1 %v6451_v43 }
 0x178   : > { %6273 = vmatprep.subr.bf16.mxu1 %v6466_v49  ;;  %v1202_v42 = vpop.permute.xlu1 %1201 }
 0x179   : > { %v1236_v55 = vpop.permute.xlu0 %1235  ;;  %v1303_v61 = vsel %vm1295_vm8, %v6724_v16, %v1202_v42 }
 0x17a   : > { %1844 = vmatmul.mubr.bf16.gmra.mrb[4].mxu1 %v1300_v24  ;;  %1996 = vmatprep.mubr.bf16.mxu0 %v1303_v61  ;;  %v1358_v20 = vsel %vm1295_vm8, %v7075_v37, %v1236_v55 }
 0x17b   : > { %1851 = vmatprep.mubr.bf16.mxu1 %v1354_v51  ;;  %6274 = vmatpush3.bf16.msra.mxu1 %v6466_v49 }
 0x17c   : > { %6275 = vmatprep.subr.bf16.mxu1 %v6467_v50 }
 0x17d   : > { %v1238_v34 = vpop.permute.xlu0 %1237  ;;  %v1204_v43 = vpop.permute.xlu1 %1203 }
 0x17e   : > { %v1306_v16 = vsel %vm1295_vm8, %v6759_v59, %v1204_v43  ;;  %v1362_v49 = vsel %vm1295_vm8, %v7105_v30, %v1238_v34 }
 0x17f   : > { %6276 = vmatpush3.bf16.msra.mxu1 %v6467_v50 }
 0x181   : > { %v1240_v36 = vpop.permute.xlu0 %1239 }
 0x182   : > { %1852 = vmatmul.mubr.bf16.gmra.mrb[8].mxu1 %v1303_v61  ;;  %v1206_v35 = vpop.permute.xlu1 %1205  ;;  %v1366_v55 = vsel %vm1295_vm8, %v7086_v32, %v1240_v36 }
 0x183   : > { %1859 = vmatprep.mubr.bf16.mxu1 %v1358_v20  ;;  %v1309_v61 = vsel %vm1295_vm8, %v6763_v60, %v1206_v35 }
 0x185   : > { %v1242_v24 = vpop.permute.xlu0 %1241 }
 0x186   : > { %v1370_v34 = vsel %vm1295_vm8, %v7123_v3, %v1242_v24 }
 0x18a   : > { %v1208_v42 = vpop.permute.xlu1 %1207  ;;  %1860 = vmatmul.mubr.bf16.gmra.mrb[12].mxu1 %v1306_v16 }
 0x18b   : > { %1867 = vmatprep.mubr.bf16.mxu1 %v1362_v49  ;;  %v1244_v28 = vpop.permute.xlu0 %1243  ;;  %v1312_v57 = vsel %vm1295_vm8, %v6792_v38, %v1208_v42 }
 0x18e   : > { %v1210_v51 = vpop.permute.xlu1 %1209 }
 0x18f   : > { %v1246_v50 = vpop.permute.xlu0 %1245  ;;  %v1315_v35 = vsel %vm1295_vm8, %v6796_v39, %v1210_v51 }
 0x192   : > { %1868 = vmatmul.mubr.bf16.gmra.mrb[16].mxu1 %v1309_v61  ;;  %v1212_v20 = vpop.permute.xlu1 %1211 }
 0x193   : > { %1875 = vmatprep.mubr.bf16.mxu1 %v1366_v55  ;;  %v1248_v13 = vpop.permute.xlu0 %1247  ;;  %v1374_v55 = vsel %vm1295_vm8, %v7100_v8, %v1244_v28  ;;  %v1318_v42 = vsel %vm1295_vm8, %v6826_v23, %v1212_v20 }
 0x194   : > { %v1382_v23 = vsel %vm1295_vm8, %v7118_v0, %v1248_v13 }
 0x198   : > { %v1214_v59 = vpop.permute.xlu1 %1213  ;;  %v1250_v43 = vpop.permute.xlu0 %1249 }
 0x199   : > { %v1321_v45 = vsel %vm1295_vm8, %v6857_v53, %v1214_v59  ;;  %v1386_v53 = vsel %vm1295_vm8, %v7150_v54, %v1250_v43 }
 0x19a   : > { %1876 = vmatmul.mubr.bf16.gmra.mrb[20].mxu1 %v1312_v57 }
 0x19b   : > { %1883 = vmatprep.mubr.bf16.mxu1 %v1370_v34  ;;  %v1378_v34 = vsel %vm1295_vm8, %v7138_v56, %v1246_v50 }
 0x19c   : > { %v1216_v49 = vpop.permute.xlu1 %1215  ;;  %v1252_v47 = vpop.permute.xlu0 %1251 }
 0x19d   : > { %v1324_v50 = vsel %vm1295_vm8, %v6875_v21, %v1216_v49 }
 0x1a0   : > { %v1254_v60 = vpop.permute.xlu0 %1253 }
 0x1a2   : > { %v1218_v36 = vpop.permute.xlu1 %1217  ;;  %1884 = vmatmul.mubr.bf16.gmra.mrb[24].mxu1 %v1315_v35 }
 0x1a3   : > { %1891 = vmatprep.mubr.bf16.mxu1 %v1374_v55  ;;  %v1327_v13 = vsel %vm1295_vm8, %v6909_v17, %v1218_v36 }
 0x1a4   : > { %v1256_v14 = vpop.permute.xlu0 %1255 }
 0x1a6   : > { %v1220_v1 = vpop.permute.xlu1 %1219 }
 0x1a8   : > { %v1258_v38 = vpop.permute.xlu0 %1257 }
 0x1a9   : > { %v1402_v49 = vsel %vm1295_vm8, %v7175_v9, %v1258_v38 }
 0x1aa   : > { %v1222_v24 = vpop.permute.xlu1 %1221  ;;  %1892 = vmatmul.mubr.bf16.gmra.mrb[28].mxu1 %v1318_v42 }
 0x1ab   : > { %1899 = vmatprep.mubr.bf16.mxu1 %v1378_v34 }
 0x1ac   : > { %v1260_v48 = vpop.permute.xlu0 %1259 }
 0x1ae   : > { %v1224_v39 = vpop.permute.xlu1 %1223 }
 0x1b0   : > { %v1262_v51 = vpop.permute.xlu0 %1261 }
 0x1b1   : > { %v1410_v55 = vsel %vm1295_vm8, %v6755_v58, %v1262_v51 }
 0x1b2   : > { %v1226_v28 = vpop.permute.xlu1 %1225  ;;  %1900 = vmatmul.mubr.bf16.gmra.mrb[32].mxu1 %v1321_v45  ;;  %1997 = vmatmul.mubr.bf16.vlgmr.msra.gmra.mrb[32].mxu0 %v1410_v55 }
 0x1b3   : > { %1907 = vmatprep.mubr.bf16.mxu1 %v1382_v23  ;;  %2004 = vmatprep.mubr.bf16.mxu0 %v1306_v16  ;;  %v1390_v16 = vsel %vm1295_vm8, %v7135_v29, %v1252_v47  ;;  %v6468_v23 = vld [vmem:[%s9407_s5 + $0x40] sm:$0xff]  }
 0x1b4   : > { %v1266_v58 = vpop.permute.xlu0 %1265  ;;  %5859 = vmatprep.subr.bf16.mxu0 %v6468_v23 }
 0x1b5   : > { %v1418_v21 = vsel %vm1295_vm8, %v6801_v44, %v1266_v58  ;;  %v1333_v44 = vsel %vm1295_vm8, %v6959_v33, %v1222_v24 }
 0x1b6   : > { %v1228_v20 = vpop.permute.xlu1 %1227 }
 0x1b8   : > { %v1270_v47 = vpop.permute.xlu0 %1269 }
 0x1ba   : > { %v1264_v34 = vpop.permute.xlu1 %1263  ;;  %1908 = vmatmul.mubr.bf16.gmra.mrb[36].mxu1 %v1324_v50 }
 0x1bb   : > { %v1414_v59 = vsel %vm1295_vm8, %v6777_v22, %v1264_v34  ;;  %1915 = vmatprep.mubr.bf16.mxu1 %v1386_v53  ;;  %v1330_v22 = vsel %vm1295_vm8, %v6933_v6, %v1220_v1  ;;  %v1426_v6 = vsel %vm1295_vm8, %v6851_v62, %v1270_v47  ;;  %v1339_v62 = vsel %vm1295_vm8, %v7006_v12, %v1226_v28  ;;  %v6470_v47 = vld [vmem:[%s9407_s5 + $0x48] sm:$0xff]  }
 0x1bc   : > { %2005 = vmatmul.mubr.bf16.gmra.mrb[36].mxu0 %v1414_v59 }
 0x1bd   : > { %2012 = vmatprep.mubr.bf16.mxu0 %v1309_v61  ;;  %v1394_v61 = vsel %vm1295_vm8, %v7165_v4, %v1254_v60  ;;  %v1406_v60 = vsel %vm1295_vm8, %v7184_v52, %v1260_v48 }
 0x1be   : > { %v1268_v43 = vpop.permute.xlu1 %1267 }
 0x1bf   : > { %v1422_v17 = vsel %vm1295_vm8, %v6817_v10, %v1268_v43  ;;  %v1336_v10 = vsel %vm1295_vm8, %v6980_v15, %v1224_v39 }
 0x1c2   : > { %1916 = vmatmul.mubr.bf16.gmra.mrb[40].mxu1 %v1327_v13  ;;  %v1272_v1 = vpop.permute.xlu1 %1271 }
 0x1c3   : > { %1923 = vmatprep.mubr.bf16.mxu1 %v1390_v16  ;;  %v1430_v33 = vsel %vm1295_vm8, %v6868_v18, %v1272_v1  ;;  %v1342_v18 = vsel %vm1295_vm8, %v7028_v7, %v1228_v20  ;;  %v6469_v20 = vld [vmem:[%s9407_s5] sm:$0xff]  }
 0x1c4   : > { %2013 = vmatmul.mubr.bf16.gmra.mrb[40].mxu0 %v1418_v21 }
 0x1c5   : > { %2020 = vmatprep.mubr.bf16.mxu0 %v1312_v57  ;;  %v1398_v57 = vsel %vm1295_vm8, %v7147_v26, %v1256_v14  ;;  %v1274_v14 = vpop.permute.xlu0 %1273  ;;  %5860 = vmatpush3.bf16.msra.mxu0 %v6469_v20 }
 0x1c6   : > { %v1434_v15 = vsel %vm1295_vm8, %v6900_v2, %v1274_v14  ;;  %5861 = vmatprep.subr.bf16.mxu0 %v6470_v47 }
 0x1c9   : > { %v1278_v12 = vpop.permute.xlu0 %1277 }
 0x1ca   : > { %1924 = vmatmul.mubr.bf16.gmra.mrb[44].mxu1 %v1330_v22  ;;  %v1442_v2 = vsel %vm1295_vm8, %v6951_v25, %v1278_v12  ;;  %v6473_v12 = vld [vmem:[%s9407_s5 + $0x10] sm:$0xff]  }
 0x1cb   : > { %1931 = vmatprep.mubr.bf16.mxu1 %v1394_v61 }
 0x1cc   : > { %2021 = vmatmul.mubr.bf16.gmra.mrb[44].mxu0 %v1422_v17 }
 0x1cd   : > { %2028 = vmatprep.mubr.bf16.mxu0 %v1315_v35  ;;  %v1276_v35 = vpop.permute.xlu1 %1275 }
 0x1d1   : > { %v1280_v7 = vpop.permute.xlu1 %1279 }
 0x1d2   : > { %1932 = vmatmul.mubr.bf16.gmra.mrb[48].mxu1 %v1333_v44 }
 0x1d3   : > { %1939 = vmatprep.mubr.bf16.mxu1 %v1398_v57 }
 0x1d4   : > { %2029 = vmatmul.mubr.bf16.gmra.mrb[48].mxu0 %v1426_v6 }
 0x1d5   : > { %2036 = vmatprep.mubr.bf16.mxu0 %v1318_v42 }
 0x1da   : > { %1940 = vmatmul.mubr.bf16.gmra.mrb[52].mxu1 %v1336_v10 }
 0x1db   : > { %1947 = vmatprep.mubr.bf16.mxu1 %v1402_v49 }
 0x1dc   : > { %2037 = vmatmul.mubr.bf16.gmra.mrb[52].mxu0 %v1430_v33 }
 0x1dd   : > { %2044 = vmatprep.mubr.bf16.mxu0 %v1321_v45  ;;  %v1438_v45 = vsel %vm1295_vm8, %v6929_v63, %v1276_v35  ;;  %v1446_v63 = vsel %vm1295_vm8, %v6995_v31, %v1280_v7 }
 0x1e2   : > { %1948 = vmatmul.mubr.bf16.gmra.mrb[56].mxu1 %v1339_v62 }
 0x1e3   : > { %1955 = vmatprep.mubr.bf16.mxu1 %v1406_v60 }
 0x1e4   : > { %2045 = vmatmul.mubr.bf16.gmra.mrb[56].mxu0 %v1434_v15 }
 0x1e5   : > { %2052 = vmatprep.mubr.bf16.mxu0 %v1324_v50 }
 0x1ea   : > { %1956 = vmatmul.mubr.bf16.gmra.mrb[60].mxu1 %v1342_v18 }
 0x1eb   : > { %6277 = vmatprep.mubr.msk.bf16.mxu1 %vm1295_vm8, %v7091_v19 }
 0x1ec   : > { %2053 = vmatmul.mubr.bf16.gmra.mrb[60].mxu0 %v1438_v45  ;;  %v6472_v45 = vld [vmem:[%s9407_s5 + $0x50] sm:$0xff]  }
 0x1ed   : > { %2060 = vmatprep.mubr.bf16.mxu0 %v1327_v13 }
 0x1f2   : > { %6278 = vmatmul.mubr.msk.bf16.vlgmr.msra.gmra.mrb[64].mxu1 %vm1295_vm8, %v7075_v37  ;;  %v1282_v37 = vpop.permute.xlu0 %1281 }
 0x1f3   : > { %6281 = vmatprep.mubr.msk.bf16.mxu1 %vm1295_vm8, %v7105_v30  ;;  %v1450_v25 = vsel %vm1295_vm8, %v7009_v40, %v1282_v37 }
 0x1f4   : > { %2061 = vmatmul.mubr.bf16.gmra.mrb[64].mxu0 %v1442_v2 }
 0x1f5   : > { %2068 = vmatprep.mubr.bf16.mxu0 %v1330_v22 }
 0x1f6   : > { %v1286_v19 = vpop.permute.xlu0 %1285 }
 0x1f7   : > { %v1458_v40 = vsel %vm1295_vm8, %v7050_v5, %v1286_v19 }
 0x1fa   : > { %6282 = vmatmul.mubr.msk.bf16.gmra.mrb[68].mxu1 %vm1295_vm8, %v7086_v32  ;;  %v1284_v32 = vpop.permute.xlu1 %1283  ;;  %v1294_v30 = vpop.permute.xlu0 %1293 }
 0x1fb   : > { %6285 = vmatprep.mubr.msk.bf16.mxu1 %vm1295_vm8, %v7123_v3  ;;  %v1454_v31 = vsel %vm1295_vm8, %v7033_v46, %v1284_v32  ;;  %v1473_v5 = vsel %vm1295_vm8, %v7046_v41, %v1294_v30  ;;  %v9445_v41 = vld [vmem:[#allocation4_spill] sm:$0xff] }
 0x1fc   : > { %2069 = vmatmul.mubr.bf16.gmra.mrb[68].mxu0 %v1446_v63 }
 0x1fd   : > { %2076 = vmatprep.mubr.bf16.mxu0 %v1333_v44  ;;  %v6471_v44 = vld [vmem:[%s9407_s5 + $0x8] sm:$0xff]  }
 0x1fe   : > { %5862 = vmatpush3.bf16.msra.mxu0 %v6471_v44 }
 0x1ff   : > { %5863 = vmatprep.subr.bf16.mxu0 %v6472_v45 }
 0x202   : > { %6286 = vmatmul.mubr.msk.bf16.gmra.mrb[72].mxu1 %vm1295_vm8, %v7100_v8  ;;  %v1288_v8 = vpop.permute.xlu1 %1287  ;;  %5864 = vmatpush3.bf16.msra.mxu0 %v6473_v12 }
 0x203   : > { %6289 = vmatprep.mubr.msk.bf16.mxu1 %vm1295_vm8, %v7138_v56  ;;  %v1462_v46 = vsel %vm1295_vm8, %v7060_v27, %v1288_v8  ;;  %v9442_v27 = vld [vmem:[#allocation7_spill] sm:$0xff] }
 0x204   : > { %2077 = vmatmul.mubr.bf16.gmra.mrb[72].mxu0 %v1450_v25 }
 0x205   : > { %2084 = vmatprep.mubr.bf16.mxu0 %v1336_v10 }
 0x20a   : > { %6290 = vmatmul.mubr.msk.bf16.gmra.mrb[76].mxu1 %vm1295_vm8, %v7118_v0  ;;  %v1290_v0 = vpop.permute.xlu1 %1289 }
 0x20b   : > { %6293 = vmatprep.mubr.msk.bf16.mxu1 %vm1295_vm8, %v7150_v54  ;;  %v1466_v3 = vsel %vm1295_vm8, %v7072_v11, %v1290_v0  ;;  %v9444_v54 = vld [vmem:[#allocation3_spill] sm:$0xff] }
 0x20c   : > { %2085 = vmatmul.mubr.bf16.gmra.mrb[76].mxu0 %v1454_v31 }
 0x20d   : > { %2092 = vmatprep.mubr.bf16.mxu0 %v1339_v62 }
 0x212   : > { %6294 = vmatmul.mubr.msk.bf16.gmra.mrb[80].mxu1 %vm1295_vm8, %v7135_v29  ;;  %v9441_v29 = vld [vmem:[#allocation5_spill] sm:$0xff] }
 0x213   : > { %6297 = vmatprep.mubr.msk.bf16.mxu1 %vm1295_vm8, %v7165_v4 }
 0x214   : > { %2093 = vmatmul.mubr.bf16.gmra.mrb[80].mxu0 %v1458_v40 }
 0x215   : > { %2100 = vmatprep.mubr.bf16.mxu0 %v1342_v18 }
 0x21a   : > { %6298 = vmatmul.mubr.msk.bf16.gmra.mrb[84].mxu1 %vm1295_vm8, %v7147_v26  ;;  %v1292_v26 = vpop.permute.xlu0 %1291 }
 0x21b   : > { %6301 = vmatprep.mubr.msk.bf16.mxu1 %vm1295_vm8, %v7175_v9  ;;  %v1470_v4 = vsel %vm1295_vm8, %v9445_v41, %v1292_v26 }
 0x21c   : > { %2101 = vmatmul.mubr.bf16.gmra.mrb[84].mxu0 %v1462_v46 }
 0x21d   : > { %2108 = vmatprep.mubr.bf16.mxu0 %v1473_v5  ;;  %v7392_v5 = vld [vmem:[%s9406_s4] ss:$0 sm:$0xff] }
 0x222   : > { %6302 = vmatmul.mubr.msk.bf16.gmra.mrb[88].mxu1 %vm1295_vm8, %v7184_v52 }
 0x223   : > { %6305 = vmatprep.mubr.msk.bf16.mxu1 %vm1295_vm8, %v9441_v29 }
 0x224   : > { %2109 = vmatmul.mubr.bf16.gmra.mrb[88].mxu0 %v1466_v3 }
 0x225   : > { %5484 = vmatprep.mubr.msk.bf16.mxu0 %vm7191_vm9, %v9442_v27 }
 0x22a   : > { %6306 = vmatmul.mubr.msk.bf16.gmra.mrb[92].mxu1 %vm1295_vm8, %v9444_v54 }
 0x22c   : > { %2117 = vmatmul.mubr.bf16.gmra.mrb[92].mxu0 %v1470_v4 }
 0x245   : > { %v5631_v9 = vpop.f32.mrb[0].mxu1 }
 0x246   : > { %v5632_v52 = vpop.f32.mrb[1].mxu1 }
 0x247   : > { %v7339_v48 = vadd.f32 %v5632_v52, %v5631_v9  ;;  %v5634_v11 = vpop.f32.mrb[2].mxu1 }
 0x248   : > { %v5635_v36 = vpop.f32.mrb[3].mxu1 }
 0x249   : > { %v7341_v38 = vadd.f32 %v5635_v36, %v5634_v11  ;;  %v1838_v9 = vadd.f32 %v7339_v48, %v7392_v5 }
 0x24b   : > { %v1841_v23 = vadd.f32 %v7341_v38, %v7392_v5 }
 0x24d   : > { %v5637_v42 = vpop.f32.mrb[4].mxu1 }
 0x24e   : > { %v5638_v24 = vpop.f32.mrb[5].mxu1 }
 0x24f   : > { %v7343_v39 = vadd.f32 %v5638_v24, %v5637_v42  ;;  %v5640_v51 = vpop.f32.mrb[6].mxu1 }
 0x250   : > { %v5641_v28 = vpop.f32.mrb[7].mxu1 }
 0x251   : > { %v7345_v55 = vadd.f32 %v5641_v28, %v5640_v51  ;;  %v6474_v51 = vld [vmem:[%s9407_s5 + $0x58] sm:$0xff]   ;;  %v1846_v47 = vadd.f32 %v7343_v39, %v7392_v5 }
 0x252   : > { %v6475_v28 = vld [vmem:[%s9407_s5 + $0x18] sm:$0xff]   ;;  %5865 = vmatprep.subr.bf16.mxu0 %v6474_v51 }
 0x253   : > { %5866 = vmatpush3.bf16.msra.mxu0 %v6475_v28 }
 0x255   : > { %v5643_v50 = vpop.f32.mrb[8].mxu1 }
 0x256   : > { %v5644_v34 = vpop.f32.mrb[9].mxu1 }
 0x257   : > { %v7353_v53 = vadd.f32 %v5644_v34, %v5643_v50  ;;  %v5646_v59 = vpop.f32.mrb[10].mxu1 }
 0x258   : > { %v5647_v58 = vpop.f32.mrb[11].mxu1 }
 0x259   : > { %v7355_v13 = vadd.f32 %v5647_v58, %v5646_v59 }
 0x25d   : > { %v5649_v16 = vpop.f32.mrb[12].mxu1 }
 0x25e   : > { %v5650_v21 = vpop.f32.mrb[13].mxu1 }
 0x25f   : > { %v7357_v43 = vadd.f32 %v5650_v21, %v5649_v16  ;;  %v5652_v22 = vpop.f32.mrb[14].mxu1 }
 0x260   : > { %v5653_v61 = vpop.f32.mrb[15].mxu1 }
 0x261   : > { %v7359_v17 = vadd.f32 %v5653_v61, %v5652_v22  ;;  %v1862_v51 = vadd.f32 %v7357_v43, %v7392_v5 }
 0x265   : > { %v5655_v57 = vpop.f32.mrb[16].mxu1 }
 0x266   : > { %v5656_v6 = vpop.f32.mrb[17].mxu1 }
 0x267   : > { %v7367_v1 = vadd.f32 %v5656_v6, %v5655_v57  ;;  %v5658_v10 = vpop.f32.mrb[18].mxu1 }
 0x268   : > { %v5659_v49 = vpop.f32.mrb[19].mxu1 }
 0x269   : > { %v7369_v33 = vadd.f32 %v5659_v49, %v5658_v10  ;;  %v1849_v10 = vadd.f32 %v7345_v55, %v7392_v5 }
 0x26d   : > { %v5661_v14 = vpop.f32.mrb[20].mxu1 }
 0x26e   : > { %v5662_v62 = vpop.f32.mrb[21].mxu1 }
 0x26f   : > { %v7371_v60 = vadd.f32 %v5662_v62, %v5661_v14  ;;  %v5664_v15 = vpop.f32.mrb[22].mxu1 }
 0x270   : > { %v5665_v35 = vpop.f32.mrb[23].mxu1 }
 0x271   : > { %v7373_v18 = vadd.f32 %v5665_v35, %v5664_v15 }
 0x275   : > { %v5667_v2 = vpop.f32.mrb[24].mxu1 }
 0x276   : > { %v5668_v7 = vpop.f32.mrb[25].mxu1 }
 0x277   : > { %v7381_v63 = vadd.f32 %v5668_v7, %v5667_v2  ;;  %v5670_v37 = vpop.f32.mrb[26].mxu1 }
 0x278   : > { %v5671_v25 = vpop.f32.mrb[27].mxu1 }
 0x279   : > { %v7383_v32 = vadd.f32 %v5671_v25, %v5670_v37  ;;  %v1854_v37 = vadd.f32 %v7353_v53, %v7392_v5 }
 0x27d   : > { %v5673_v31 = vpop.f32.mrb[28].mxu1 }
 0x27e   : > { %v5674_v19 = vpop.f32.mrb[29].mxu1 }
 0x27f   : > { %v7385_v40 = vadd.f32 %v5674_v19, %v5673_v31  ;;  %v5676_v8 = vpop.f32.mrb[30].mxu1 }
 0x280   : > { %v5677_v30 = vpop.f32.mrb[31].mxu1 }
 0x281   : > { %v7387_v46 = vadd.f32 %v5677_v30, %v5676_v8  ;;  %v6476_v8 = vld [vmem:[%s9407_s5 + $0x60] sm:$0xff]  }
 0x282   : > { %v6477_v30 = vld [vmem:[%s9407_s5 + $0x20] sm:$0xff]   ;;  %5867 = vmatprep.subr.bf16.mxu0 %v6476_v8 }
 0x283   : > { %5868 = vmatpush3.bf16.msra.mxu0 %v6477_v30 }
 0x285   : > { %v5679_v0 = vpop.f32.mrb[32].mxu1  ;;  %v5743_v3 = vpop.f32.mrb[32].mxu0 }
 0x286   : > { %v5680_v29 = vpop.f32.mrb[33].mxu1  ;;  %v5744_v26 = vpop.f32.mrb[33].mxu0 }
 0x287   : > { %v7394_v41 = vadd.f32 %v5680_v29, %v5679_v0  ;;  %v5682_v4 = vpop.f32.mrb[34].mxu1  ;;  %v5745_v52 = vadd.f32 %v5744_v26, %v5743_v3  ;;  %v5746_v11 = vpop.f32.mrb[34].mxu0  ;;  %v1857_v0 = vadd.f32 %v7355_v13, %v7392_v5 }
 0x288   : > { %v5683_v36 = vpop.f32.mrb[35].mxu1  ;;  %v5747_v42 = vpop.f32.mrb[35].mxu0 }
 0x289   : > { %v7398_v24 = vadd.f32 %v5683_v36, %v5682_v4  ;;  %v5748_v20 = vadd.f32 %v5747_v42, %v5746_v11  ;;  %v7408_v50 = vadd.f32 %v5745_v52, %v1838_v9 }
 0x28b   : > { %v7410_v48 = vadd.f32 %v5748_v20, %v1841_v23 }
 0x28d   : > { %v5685_v34 = vpop.f32.mrb[36].mxu1 }
 0x28e   : > { %v5686_v59 = vpop.f32.mrb[37].mxu1 }
 0x28f   : > { %v5749_v58 = vpop.f32.mrb[36].mxu0  ;;  %v7412_v16 = vadd.f32 %v5686_v59, %v5685_v34  ;;  %v5688_v21 = vpop.f32.mrb[38].mxu1  ;;  %v1865_v34 = vadd.f32 %v7359_v17, %v7392_v5 }
 0x290   : > { %v5750_v22 = vpop.f32.mrb[37].mxu0  ;;  %v5689_v61 = vpop.f32.mrb[39].mxu1 }
 0x291   : > { %v5751_v44 = vadd.f32 %v5750_v22, %v5749_v58  ;;  %v5752_v38 = vpop.f32.mrb[38].mxu0  ;;  %v7416_v57 = vadd.f32 %v5689_v61, %v5688_v21 }
 0x292   : > { %v5753_v6 = vpop.f32.mrb[39].mxu0 }
 0x293   : > { %v5754_v49 = vadd.f32 %v5753_v6, %v5752_v38  ;;  %v7420_v14 = vadd.f32 %v5751_v44, %v1846_v47 }
 0x295   : > { %v5691_v62 = vpop.f32.mrb[40].mxu1  ;;  %v7422_v15 = vadd.f32 %v5754_v49, %v1849_v10  ;;  %v1870_v10 = vadd.f32 %v7367_v1, %v7392_v5 }
 0x296   : > { %v5692_v35 = vpop.f32.mrb[41].mxu1 }
 0x297   : > { %v5755_v45 = vpop.f32.mrb[40].mxu0  ;;  %v7424_v12 = vadd.f32 %v5692_v35, %v5691_v62  ;;  %v5694_v2 = vpop.f32.mrb[42].mxu1 }
 0x298   : > { %v5756_v39 = vpop.f32.mrb[41].mxu0  ;;  %v5695_v7 = vpop.f32.mrb[43].mxu1 }
 0x299   : > { %v5757_v25 = vadd.f32 %v5756_v39, %v5755_v45  ;;  %v5758_v31 = vpop.f32.mrb[42].mxu0  ;;  %v7428_v19 = vadd.f32 %v5695_v7, %v5694_v2  ;;  %v6478_v45 = vld [vmem:[%s9407_s5 + $0x68] sm:$0xff]   ;;  %v1873_v39 = vadd.f32 %v7369_v33, %v7392_v5 }
 0x29a   : > { %v5759_v55 = vpop.f32.mrb[43].mxu0  ;;  %v6479_v2 = vld [vmem:[%s9407_s5 + $0x28] sm:$0xff]   ;;  %5869 = vmatprep.subr.bf16.mxu0 %v6478_v45 }
 0x29b   : > { %v5760_v3 = vadd.f32 %v5759_v55, %v5758_v31  ;;  %v7438_v29 = vadd.f32 %v5757_v25, %v1854_v37  ;;  %5870 = vmatpush3.bf16.msra.mxu0 %v6479_v2 }
 0x29d   : > { %v5697_v53 = vpop.f32.mrb[44].mxu1  ;;  %v7440_v26 = vadd.f32 %v5760_v3, %v1857_v0 }
 0x29e   : > { %v5698_v4 = vpop.f32.mrb[45].mxu1 }
 0x29f   : > { %v5761_v9 = vpop.f32.mrb[44].mxu0  ;;  %v7442_v52 = vadd.f32 %v5698_v4, %v5697_v53  ;;  %v5700_v11 = vpop.f32.mrb[46].mxu1  ;;  %v1878_v53 = vadd.f32 %v7371_v60, %v7392_v5 }
 0x2a0   : > { %v5762_v36 = vpop.f32.mrb[45].mxu0  ;;  %v5701_v42 = vpop.f32.mrb[47].mxu1 }
 0x2a1   : > { %v5763_v28 = vadd.f32 %v5762_v36, %v5761_v9  ;;  %v5764_v13 = vpop.f32.mrb[46].mxu0  ;;  %v7446_v23 = vadd.f32 %v5701_v42, %v5700_v11  ;;  %v1881_v36 = vadd.f32 %v7373_v18, %v7392_v5 }
 0x2a2   : > { %v5765_v20 = vpop.f32.mrb[47].mxu0 }
 0x2a3   : > { %v5766_v59 = vadd.f32 %v5765_v20, %v5764_v13  ;;  %v7450_v58 = vadd.f32 %v5763_v28, %v1862_v51 }
 0x2a5   : > { %v5703_v21 = vpop.f32.mrb[48].mxu1  ;;  %v7452_v22 = vadd.f32 %v5766_v59, %v1865_v34 }
 0x2a6   : > { %v5704_v61 = vpop.f32.mrb[49].mxu1 }
 0x2a7   : > { %v5767_v47 = vpop.f32.mrb[48].mxu0  ;;  %v7454_v44 = vadd.f32 %v5704_v61, %v5703_v21  ;;  %v5706_v38 = vpop.f32.mrb[50].mxu1 }
 0x2a8   : > { %v5768_v43 = vpop.f32.mrb[49].mxu0  ;;  %v5707_v6 = vpop.f32.mrb[51].mxu1 }
 0x2a9   : > { %v5769_v49 = vadd.f32 %v5768_v43, %v5767_v47  ;;  %v5770_v62 = vpop.f32.mrb[50].mxu0  ;;  %v7458_v35 = vadd.f32 %v5707_v6, %v5706_v38  ;;  %v1886_v47 = vadd.f32 %v7381_v63, %v7392_v5 }
 0x2aa   : > { %v5771_v17 = vpop.f32.mrb[51].mxu0 }
 0x2ab   : > { %v5772_v7 = vadd.f32 %v5771_v17, %v5770_v62  ;;  %v7468_v37 = vadd.f32 %v5769_v49, %v1870_v10  ;;  %v6480_v10 = vld [vmem:[%s9407_s5 + $0x70] sm:$0xff]   ;;  %v1889_v62 = vadd.f32 %v7383_v32, %v7392_v5 }
 0x2ac   : > { %v6481_v49 = vld [vmem:[%s9407_s5 + $0x30] sm:$0xff]   ;;  %5871 = vmatprep.subr.bf16.mxu0 %v6480_v10 }
 0x2ad   : > { %v5709_v1 = vpop.f32.mrb[52].mxu1  ;;  %v7470_v25 = vadd.f32 %v5772_v7, %v1873_v39  ;;  %5872 = vmatpush3.bf16.msra.mxu0 %v6481_v49 }
 0x2ae   : > { %v5710_v31 = vpop.f32.mrb[53].mxu1 }
 0x2af   : > { %v5773_v55 = vpop.f32.mrb[52].mxu0  ;;  %v7472_v8 = vadd.f32 %v5710_v31, %v5709_v1  ;;  %v5712_v30 = vpop.f32.mrb[54].mxu1 }
 0x2b0   : > { %v5774_v0 = vpop.f32.mrb[53].mxu0  ;;  %v5713_v3 = vpop.f32.mrb[55].mxu1 }
 0x2b1   : > { %v5775_v4 = vadd.f32 %v5774_v0, %v5773_v55  ;;  %v5776_v33 = vpop.f32.mrb[54].mxu0  ;;  %v7476_v9 = vadd.f32 %v5713_v3, %v5712_v30  ;;  %v1894_v0 = vadd.f32 %v7385_v40, %v7392_v5  ;;  %v6482_v40 = vld [vmem:[%s9407_s5 + $0x78] sm:$0xff]  }
 0x2b2   : > { %v5777_v11 = vpop.f32.mrb[55].mxu0  ;;  %5873 = vmatprep.subr.bf16.mxu0 %v6482_v40 }
 0x2b3   : > { %v5778_v42 = vadd.f32 %v5777_v11, %v5776_v33  ;;  %v7480_v51 = vadd.f32 %v5775_v4, %v1878_v53  ;;  %v1897_v33 = vadd.f32 %v7387_v46, %v7392_v5 }
 0x2b5   : > { %v5715_v28 = vpop.f32.mrb[56].mxu1  ;;  %v7482_v13 = vadd.f32 %v5778_v42, %v1881_v36 }
 0x2b6   : > { %v5716_v20 = vpop.f32.mrb[57].mxu1 }
 0x2b7   : > { %v5779_v34 = vpop.f32.mrb[56].mxu0  ;;  %v7484_v59 = vadd.f32 %v5716_v20, %v5715_v28  ;;  %v5718_v21 = vpop.f32.mrb[58].mxu1 }
 0x2b8   : > { %v5780_v60 = vpop.f32.mrb[57].mxu0  ;;  %v5719_v61 = vpop.f32.mrb[59].mxu1 }
 0x2b9   : > { %v5781_v38 = vadd.f32 %v5780_v60, %v5779_v34  ;;  %v5782_v43 = vpop.f32.mrb[58].mxu0  ;;  %v7488_v6 = vadd.f32 %v5719_v61, %v5718_v21  ;;  %v6483_v21 = vld [vmem:[%s9407_s5 + $0x38] sm:$0xff]  }
 0x2ba   : > { %v5783_v18 = vpop.f32.mrb[59].mxu0  ;;  %5874 = vmatpush3.bf16.msra.mxu0 %v6483_v21 }
 0x2bb   : > { %v5784_v17 = vadd.f32 %v5783_v18, %v5782_v43  ;;  %v7498_v45 = vadd.f32 %v5781_v38, %v1886_v47 }
 0x2bd   : > { %v5721_v63 = vpop.f32.mrb[60].mxu1  ;;  %v7500_v2 = vadd.f32 %v5784_v17, %v1889_v62  ;;  %v1905_v62 = vadd.f32 %v7398_v24, %v7392_v5  ;;  %v7543_v24 = vadd.f32 %v7424_v12, %v7392_v5  ;;  %v7561_v12 = vadd.f32 %v7454_v44, %v7392_v5 }
 0x2be   : > { %v5722_v39 = vpop.f32.mrb[61].mxu1 }
 0x2bf   : > { %v5785_v7 = vpop.f32.mrb[60].mxu0  ;;  %v7502_v1 = vadd.f32 %v5722_v39, %v5721_v63  ;;  %v5724_v31 = vpop.f32.mrb[62].mxu1 }
 0x2c0   : > { %v5786_v55 = vpop.f32.mrb[61].mxu0  ;;  %v5725_v30 = vpop.f32.mrb[63].mxu1 }
 0x2c1   : > { %v5787_v3 = vadd.f32 %v5786_v55, %v5785_v7  ;;  %v5788_v32 = vpop.f32.mrb[62].mxu0  ;;  %v7506_v53 = vadd.f32 %v5725_v30, %v5724_v31 }
 0x2c2   : > { %v5789_v4 = vpop.f32.mrb[63].mxu0 }
 0x2c3   : > { %v5790_v11 = vadd.f32 %v5789_v4, %v5788_v32  ;;  %v7510_v36 = vadd.f32 %v5787_v3, %v1894_v0  ;;  %v7547_v0 = vadd.f32 %v7428_v19, %v7392_v5  ;;  %v7551_v3 = vadd.f32 %v7442_v52, %v7392_v5 }
 0x2c4   : > { %v7566_v52 = vadd.f32 %v7458_v35, %v7392_v5 }
 0x2c5   : > { %v6279_v42 = vpop.f32.mrb[64].mxu1  ;;  %v7512_v28 = vadd.f32 %v5790_v11, %v1897_v33 }
 0x2c6   : > { %v2168_v20 = vadd.f32 %v6279_v42, %v7420_v14  ;;  %v2159_v34 = vpop.f32.mrb[65].mxu1  ;;  %v1902_v14 = vadd.f32 %v7394_v41, %v7392_v5  ;;  %v7535_v41 = vadd.f32 %v7412_v16, %v7392_v5  ;;  %v7570_v42 = vadd.f32 %v7472_v8, %v7392_v5 }
 0x2c7   : > { %v5791_v60 = vpop.f32.mrb[64].mxu0  ;;  %v2160_v46 = vadd.f32 %v2159_v34, %v7408_v50  ;;  %v6280_v61 = vpop.f32.mrb[66].mxu1 }
 0x2c8   : > { %v5792_v47 = vpop.f32.mrb[65].mxu0  ;;  %v2171_v38 = vadd.f32 %v6280_v61, %v7422_v15  ;;  %v2162_v43 = vpop.f32.mrb[67].mxu1  ;;  %v2288_v63 = vmax.f32 %v2168_v20, 0.0  ;;  %v6484_v15 = vld [vmem:[%s9407_s5 + $0x100] sm:$0xff]  }
 0x2c9   : > { %v5793_v18 = vadd.f32 %v5792_v47, %v5791_v60  ;;  %v5794_v10 = vpop.f32.mrb[66].mxu0  ;;  %v2163_v49 = vadd.f32 %v2162_v43, %v7410_v48  ;;  %v2286_v7 = vmax.f32 %v2160_v46, 0.0  ;;  %v7539_v48 = vadd.f32 %v7416_v57, %v7392_v5  ;;  %6309 = vmatprep.subr.bf16.mxu0 %v6484_v15 }
 0x2ca   : > { %v5795_v17 = vpop.f32.mrb[67].mxu0  ;;  %v2289_v50 = vmax.f32 %v2171_v38, 0.0  ;;  %v7557_v57 = vadd.f32 %v7446_v23, %v7392_v5  ;;  %v7589_v15 = vadd.f32 %v7476_v9, %v7392_v5 }
 0x2cb   : > { %v5796_v39 = vadd.f32 %v5795_v17, %v5794_v10  ;;  %v2287_v31 = vmax.f32 %v2163_v49, 0.0  ;;  %v7531_v55 = vadd.f32 %v5793_v18, %v1902_v14 }
 0x2cc   : > { %v2319_v30 = vpack.c.bf16 %v2289_v50, %v2288_v63 }
 0x2cd   : > { %v2318_v16 = vpack.c.bf16 %v2287_v31, %v2286_v7  ;;  %v6283_v32 = vpop.f32.mrb[68].mxu1  ;;  %v7553_v4 = vadd.f32 %v5796_v39, %v1905_v62  ;;  %v7601_v31 = vadd.f32 %v7488_v6, %v7392_v5 }
 0x2ce   : > { %v2342_v33 = vshrl.u32 %v2319_v30, 16  ;;  %v2184_v19 = vadd.f32 %v6283_v32, %v7450_v58  ;;  %v2175_v11 = vpop.f32.mrb[69].mxu1  ;;  %v2345_v44 = vshll.u32 %v2319_v30, 16  ;;  %v7605_v30 = vadd.f32 %v7502_v1, %v7392_v5 }
 0x2cf   : > { %v2335_v20 = vshrl.u32 %v2318_v16, 16  ;;  %v5797_v34 = vpop.f32.mrb[68].mxu0  ;;  %v2176_v23 = vadd.f32 %v2175_v11, %v7438_v29  ;;  %v6284_v40 = vpop.f32.mrb[70].mxu1  ;;  %v2338_v60 = vshll.u32 %v2318_v16, 16 }
 0x2d0   : > { %v2344_v21 = vrot.slane %v2342_v33, 7  ;;  %v5798_v46 = vpop.f32.mrb[69].mxu0  ;;  %v2187_v58 = vadd.f32 %v6284_v40, %v7452_v22  ;;  %v2178_v61 = vpop.f32.mrb[71].mxu1  ;;  %v2292_v43 = vmax.f32 %v2184_v19, 0.0 }
 0x2d1   : > { %v2337_v47 = vrot.slane %v2335_v20, 7  ;;  %v7574_v38 = vadd.f32 %v5798_v46, %v5797_v34  ;;  %v5800_v35 = vpop.f32.mrb[70].mxu0  ;;  %v2179_v8 = vadd.f32 %v2178_v61, %v7440_v26  ;;  %v2290_v49 = vmax.f32 %v2176_v23, 0.0 }
 0x2d2   : > { %v2347_v14 = vor.u32 %v2345_v44, %v2344_v21  ;;  %v7579_v10 = vsel %vm6698_vm5, %v2344_v21, 0  ;;  %v5801_v29 = vpop.f32.mrb[71].mxu0  ;;  %v2293_v62 = vmax.f32 %v2187_v58, 0.0  ;;  %v7593_v26 = vadd.f32 %v7484_v59, %v7392_v5 }
 0x2d3   : > { %v2340_v17 = vor.u32 %v2338_v60, %v2337_v47  ;;  %v7583_v22 = vsel %vm6698_vm5, %v2337_v47, 0  ;;  %v7585_v63 = vadd.f32 %v5801_v29, %v5800_v35  ;;  %v2291_v50 = vmax.f32 %v2179_v8, 0.0 }
 0x2d4   : > { %v2321_v39 = vpack.c.bf16 %v2293_v62, %v2292_v43  ;;  %v7597_v7 = vsel %vm6698_vm5, 0, %v2347_v14  ;;  %v2518_v6 = vshll.u32 %v7583_v22, 16  ;;  %v2530_v1 = vshll.u32 %v7579_v10, 16 }
 0x2d5   : > { %v2320_v16 = vpack.c.bf16 %v2291_v50, %v2290_v49  ;;  %v6287_v9 = vpop.f32.mrb[72].mxu1  ;;  %2814 = vrot.lane.b32.xlu0 %v7597_v7, %s6533_s17  ;;  %v7611_v59 = vsel %vm6698_vm5, 0, %v2340_v17  ;;  %v2525_v21 = vshll.u32 %v7597_v7, 16 }
 0x2d6   : > { %v2356_v32 = vshrl.u32 %v2321_v39, 16  ;;  %v2200_v33 = vadd.f32 %v6287_v9, %v7480_v51  ;;  %v2191_v19 = vpop.f32.mrb[73].mxu1  ;;  %2812 = vrot.lane.b32.xlu1 %v7611_v59, %s6533_s17  ;;  %v2513_v40 = vshll.u32 %v7611_v59, 16  ;;  %v2359_v60 = vshll.u32 %v2321_v39, 16 }
 0x2d7   : > { %v2349_v11 = vshrl.u32 %v2320_v16, 16  ;;  %v5803_v20 = vpop.f32.mrb[72].mxu0  ;;  %v2192_v34 = vadd.f32 %v2191_v19, %v7468_v37  ;;  %v6288_v23 = vpop.f32.mrb[74].mxu1  ;;  %v2511_v61 = vshrl.u32 %v7611_v59, 16  ;;  %v2352_v35 = vshll.u32 %v2320_v16, 16 }
 0x2d8   : > { %v2358_v44 = vrot.slane %v2356_v32, 7  ;;  %v5804_v51 = vpop.f32.mrb[73].mxu0  ;;  %v2203_v46 = vadd.f32 %v6288_v23, %v7482_v13  ;;  %v2194_v58 = vpop.f32.mrb[75].mxu1  ;;  %v2296_v29 = vmax.f32 %v2200_v33, 0.0  ;;  %v2515_v62 = vrot.slane %v2513_v40, 1 }
 0x2d9   : > { %v2351_v47 = vrot.slane %v2349_v11, 7  ;;  %v7623_v43 = vadd.f32 %v5804_v51, %v5803_v20  ;;  %v5806_v8 = vpop.f32.mrb[74].mxu0  ;;  %v2195_v37 = vadd.f32 %v2194_v58, %v7470_v25  ;;  %v2520_v17 = vrot.slane %v2518_v6, 1 }
 0x2da   : > { %v5807_v14 = vpop.f32.mrb[75].mxu0  ;;  %v2297_v49 = vmax.f32 %v2203_v46, 0.0  ;;  %v2294_v9 = vmax.f32 %v2192_v34, 0.0  ;;  %v2361_v32 = vor.u32 %v2359_v60, %v2358_v44  ;;  %v2516_v23 = vor.u32 %v2515_v62, %v2511_v61 }
 0x2db   : > { %v2354_v50 = vor.u32 %v2352_v35, %v2351_v47  ;;  %v7626_v39 = vadd.f32 %v5807_v14, %v5806_v8  ;;  %v2295_v13 = vmax.f32 %v2195_v37, 0.0  ;;  %v2527_v11 = vrot.slane %v2525_v21, 1 }
 0x2dc   : > { %v2323_v19 = vpack.c.bf16 %v2297_v49, %v2296_v29  ;;  %v2523_v25 = vshrl.u32 %v7597_v7, 16  ;;  %v2071_v33 = vadd.f32 %v7574_v38, %v7535_v41  ;;  %v7637_v6 = vsel %vm6698_vm5, %v2358_v44, 0 }
 0x2dd   : > { %v2322_v16 = vpack.c.bf16 %v2295_v13, %v2294_v9  ;;  %v6291_v20 = vpop.f32.mrb[76].mxu1  ;;  %v7630_v51 = vsel %vm6698_vm5, 0, %v2354_v50  ;;  %v7641_v21 = vsel %vm912_vm6, %v2516_v23, %v2520_v17  ;;  %v7647_v46 = vsel %vm6698_vm5, %v2351_v47, 0 }
 0x2de   : > { %v2370_v34 = vshrl.u32 %v2323_v19, 16  ;;  %v2216_v40 = vadd.f32 %v6291_v20, %v7510_v36  ;;  %v2207_v60 = vpop.f32.mrb[77].mxu1  ;;  %2816 = vrot.lane.b32.xlu0 %v7630_v51, %s6533_s17  ;;  %2782 = vrot.lane.b32.xlu1 %v7641_v21, %s6533_s17  ;;  %v2528_v36 = vor.u32 %v2527_v11, %v2523_v25  ;;  %v2532_v14 = vrot.slane %v2530_v1, 1 }
 0x2df   : > { %v2363_v58 = vshrl.u32 %v2322_v16, 16  ;;  %v5809_v41 = vpop.f32.mrb[76].mxu0  ;;  %v2208_v38 = vadd.f32 %v2207_v60, %v7498_v45  ;;  %v6292_v44 = vpop.f32.mrb[78].mxu1  ;;  %v2366_v61 = vshll.u32 %v2322_v16, 16  ;;  %v7655_v29 = vsel %vm6698_vm5, 0, %v2361_v32 }
 0x2e0   : > { %v5810_v35 = vpop.f32.mrb[77].mxu0  ;;  %v2219_v8 = vadd.f32 %v6292_v44, %v7512_v28  ;;  %v2210_v37 = vpop.f32.mrb[79].mxu1  ;;  %v2372_v47 = vrot.slane %v2370_v34, 7  ;;  %v2373_v45 = vshll.u32 %v2323_v19, 16  ;;  %v2300_v13 = vmax.f32 %v2216_v40, 0.0 }
 0x2e1   : > { %v2365_v49 = vrot.slane %v2363_v58, 7  ;;  %v7657_v62 = vadd.f32 %v5810_v35, %v5809_v41  ;;  %v5812_v17 = vpop.f32.mrb[78].mxu0  ;;  %v2211_v50 = vadd.f32 %v2210_v37, %v7500_v2  ;;  %v7661_v11 = vsel %vm912_vm6, %v2528_v36, %v2532_v14 }
 0x2e2   : > { %v5813_v9 = vpop.f32.mrb[79].mxu0  ;;  %v2301_v23 = vmax.f32 %v2219_v8, 0.0  ;;  %9447 = vst [vmem:[#allocation5_spill] sm:$0xff] %v7661_v11  ;;  %2818 = vrot.lane.b32.xlu0 %v7655_v29, %s6533_s17  ;;  %v2298_v32 = vmax.f32 %v2208_v38, 0.0  ;;  %2784 = vrot.lane.b32.xlu1 %v7661_v11, %s6533_s17  ;;  %v2537_v2 = vshll.u32 %v7630_v51, 16  ;;  %v2542_v19 = vshll.u32 %v7647_v46, 16 }
 0x2e3   : > { %v2368_v28 = vor.u32 %v2366_v61, %v2365_v49  ;;  %v7665_v1 = vadd.f32 %v5813_v9, %v5812_v17  ;;  %v2299_v16 = vmax.f32 %v2211_v50, 0.0  ;;  %v2074_v25 = vadd.f32 %v7585_v63, %v7539_v48 }
 0x2e4   : > { %v7669_v20 = vpack.c.bf16 %v2301_v23, %v2300_v13  ;;  %v2375_v34 = vor.u32 %v2373_v45, %v2372_v47  ;;  %v2535_v58 = vshrl.u32 %v7630_v51, 16  ;;  %v7682_v38 = vsel %vm6698_vm5, %v2372_v47, 0 }
 0x2e5   : > { %v2324_v40 = vpack.c.bf16 %v2299_v16, %v2298_v32  ;;  %v6295_v60 = vpop.f32.mrb[80].mxu1  ;;  %v7678_v41 = vsel %vm6698_vm5, 0, %v2368_v28  ;;  %v7686_v44 = vsel %vm6698_vm5, %v2365_v49, 0  ;;  %v2539_v61 = vrot.slane %v2537_v2, 1 }
 0x2e6   : > { %v2232_v36 = vadd.f32 %v6295_v60, %v2071_v33  ;;  %v2223_v48 = vpop.f32.mrb[81].mxu1  ;;  %2820 = vrot.lane.b32.xlu0 %v7678_v41, %s6533_s17  ;;  %v2384_v63 = vshrl.u32 %v7669_v20, 16  ;;  %v2547_v47 = vshrl.u32 %v7655_v29, 16  ;;  %v2544_v45 = vrot.slane %v2542_v19, 1 }
 0x2e7   : > { %v2377_v35 = vshrl.u32 %v2324_v40, 16  ;;  %v5815_v8 = vpop.f32.mrb[80].mxu0  ;;  %v2224_v37 = vadd.f32 %v2223_v48, %v7531_v55  ;;  %v6296_v14 = vpop.f32.mrb[82].mxu1  ;;  %v2540_v50 = vor.u32 %v2539_v61, %v2535_v58  ;;  %v2549_v33 = vshll.u32 %v7655_v29, 16 }
 0x2e8   : > { %v5816_v17 = vpop.f32.mrb[81].mxu0  ;;  %v2235_v49 = vadd.f32 %v6296_v14, %v2074_v25  ;;  %v2226_v9 = vpop.f32.mrb[83].mxu1  ;;  %v2387_v13 = vshll.u32 %v7669_v20, 16  ;;  %v2380_v2 = vshll.u32 %v2324_v40, 16  ;;  %v2304_v60 = vmax.f32 %v2232_v36, 0.0 }
 0x2e9   : > { %v2379_v23 = vrot.slane %v2377_v35, 7  ;;  %v7695_v28 = vadd.f32 %v5816_v17, %v5815_v8  ;;  %v5818_v32 = vpop.f32.mrb[82].mxu0  ;;  %v2227_v16 = vadd.f32 %v2226_v9, %v7553_v4  ;;  %v7699_v48 = vsel %vm912_vm6, %v2540_v50, %v2544_v45 }
 0x2ea   : > { %v5819_v55 = vpop.f32.mrb[83].mxu0  ;;  %9448 = vst [vmem:[#allocation7_spill] sm:$0xff] %v7699_v48  ;;  %v2305_v58 = vmax.f32 %v2235_v49, 0.0  ;;  %v7701_v19 = vrot.slane %v2384_v63, 7  ;;  %2786 = vrot.lane.b32.xlu1 %v7699_v48, %s6533_s17  ;;  %v2302_v20 = vmax.f32 %v2224_v37, 0.0  ;;  %v2551_v8 = vrot.slane %v2549_v33, 1 }
 0x2eb   : > { %v7703_v25 = vadd.f32 %v5819_v55, %v5818_v32  ;;  %v2303_v61 = vmax.f32 %v2227_v16, 0.0  ;;  %v2554_v4 = vshll.u32 %v7637_v6, 16  ;;  %v7710_v40 = vsel %vm6698_vm5, 0, %v2375_v34  ;;  %v6485_v34 = vld [vmem:[%s9407_s5 + $0xc0] sm:$0xff]  }
 0x2ec   : > { %v2327_v35 = vpack.c.bf16 %v2305_v58, %v2304_v60  ;;  %v2382_v36 = vor.u32 %v2380_v2, %v2379_v23  ;;  %2822 = vrot.lane.b32.xlu0 %v7710_v40, %s6533_s17  ;;  %v2087_v63 = vadd.f32 %v7657_v62, %v7551_v3  ;;  %v2561_v37 = vshll.u32 %v7678_v41, 16  ;;  %v6486_v32 = vld [vmem:[%s9407_s5 + $0x80] sm:$0xff]   ;;  %5971 = vmatprep.subr.bf16.mxu1 %v6485_v34  ;;  %v6489_v34 = vld [vmem:[%s9407_s5 + $0x88] sm:$0xff]  }
 0x2ed   : > { %v2326_v14 = vpack.c.bf16 %v2303_v61, %v2302_v20  ;;  %v6299_v17 = vpop.f32.mrb[84].mxu1  ;;  %v2552_v45 = vor.u32 %v2551_v8, %v2547_v47  ;;  %v2556_v49 = vrot.slane %v2554_v4, 1  ;;  %v2559_v9 = vshrl.u32 %v7678_v41, 16  ;;  %5972 = vmatpush3.bf16.msra.mxu1 %v6486_v32 }
 0x2ee   : > { %v2398_v50 = vshrl.u32 %v2327_v35, 16  ;;  %v2239_v33 = vpop.f32.mrb[85].mxu1  ;;  %v2401_v16 = vshll.u32 %v2327_v35, 16  ;;  %v7724_v62 = vadd.f32 %v6299_v17, %v2087_v63  ;;  %v2563_v55 = vrot.slane %v2561_v37, 1 }
 0x2ef   : > { %v2391_v2 = vshrl.u32 %v2326_v14, 16  ;;  %v5821_v3 = vpop.f32.mrb[84].mxu0  ;;  %v6300_v60 = vpop.f32.mrb[86].mxu1  ;;  %v7729_v58 = vsel %vm912_vm6, %v2552_v45, %v2556_v49  ;;  %v2566_v61 = vshll.u32 %v7686_v44, 16  ;;  %v2079_v8 = vadd.f32 %v7623_v43, %v7543_v24 }
 0x2f0   : > { %v7726_v47 = vrot.slane %v2398_v50, 7  ;;  %9449 = vst [vmem:[#allocation6_spill] sm:$0xff] %v7729_v58  ;;  %v5822_v20 = vpop.f32.mrb[85].mxu0  ;;  %v2242_v4 = vpop.f32.mrb[87].mxu1  ;;  %v2394_v48 = vshll.u32 %v2326_v14, 16  ;;  %2788 = vrot.lane.b32.xlu1 %v7729_v58, %s6533_s17  ;;  %v2564_v37 = vor.u32 %v2563_v55, %v2559_v9  ;;  %v2389_v50 = vor.u32 %v2387_v13, %v7701_v19  ;;  %v6487_v14 = vld [vmem:[%s9407_s5 + $0xc8] sm:$0xff]  }
 0x2f1   : > { %v7734_v35 = vrot.slane %v2391_v2, 7  ;;  %v5823_v63 = vadd.f32 %v5822_v20, %v5821_v3  ;;  %v5824_v17 = vpop.f32.mrb[86].mxu0  ;;  %v7741_v45 = vsel %vm6698_vm5, %v2379_v23, 0  ;;  %v2568_v24 = vrot.slane %v2566_v61, 1  ;;  %5973 = vmatprep.subr.bf16.mxu1 %v6487_v14 }
 0x2f2   : > { %v5825_v49 = vpop.f32.mrb[87].mxu0  ;;  %v2240_v43 = vadd.f32 %v2239_v33, %v2079_v8  ;;  %v7750_v9 = vor.u32 %v2401_v16, %v7726_v47  ;;  %v7755_v23 = vsel %vm6698_vm5, 0, %v2382_v36  ;;  %v2308_v33 = vmax.f32 %v7724_v62, 0.0  ;;  %5974 = vmatpush3.bf16.msra.mxu1 %v6489_v34 }
 0x2f3   : > { %v2396_v13 = vor.u32 %v2394_v48, %v7734_v35  ;;  %v5826_v32 = vadd.f32 %v5825_v49, %v5824_v17  ;;  %v7759_v2 = vsel %vm912_vm6, %v2564_v37, %v2568_v24  ;;  %2824 = vrot.lane.b32.xlu0 %v7755_v23, %s6533_s17  ;;  %v2090_v3 = vadd.f32 %v7665_v1, %v7557_v57 }
 0x2f4   : > { %9450 = vst [vmem:[#allocation3_spill] sm:$0xff] %v7759_v2  ;;  %v2082_v16 = vadd.f32 %v7626_v39, %v7547_v0  ;;  %2790 = vrot.lane.b32.xlu1 %v7759_v2, %s6533_s17  ;;  %v2306_v48 = vmax.f32 %v2240_v43, 0.0  ;;  %v2571_v36 = vshrl.u32 %v7710_v40, 16  ;;  %v2573_v62 = vshll.u32 %v7710_v40, 16 }
 0x2f5   : > { %v2578_v55 = vshll.u32 %v7682_v38, 16  ;;  %v6303_v20 = vpop.f32.mrb[88].mxu1  ;;  %v2251_v61 = vadd.f32 %v6300_v60, %v2090_v3  ;;  %v7774_v57 = vsel %vm6698_vm5, 0, %v2389_v50  ;;  %v2103_v0 = vadd.f32 %v5823_v63, %v7570_v42 }
 0x2f6   : > { %v2243_v8 = vadd.f32 %v2242_v4, %v2082_v16  ;;  %v2255_v39 = vpop.f32.mrb[89].mxu1  ;;  %v2575_v1 = vrot.slane %v2573_v62, 1  ;;  %v2583_v37 = vshrl.u32 %v7755_v23, 16  ;;  %v2585_v49 = vshll.u32 %v7755_v23, 16 }
 0x2f7   : > { %v5827_v17 = vpop.f32.mrb[88].mxu0  ;;  %v2590_v24 = vshll.u32 %v7741_v45, 16  ;;  %v6304_v43 = vpop.f32.mrb[90].mxu1  ;;  %v2309_v14 = vmax.f32 %v2251_v61, 0.0  ;;  %2826 = vrot.lane.b32.xlu0 %v7774_v57, %s6533_s17  ;;  %v7782_v4 = vadd.f32 %v6303_v20, %v2103_v0  ;;  %v2095_v42 = vadd.f32 %v7695_v28, %v7561_v12  ;;  %v6490_v61 = vld [vmem:[%s9407_s5 + $0xd0] sm:$0xff]  }
 0x2f8   : > { %v2307_v34 = vmax.f32 %v2243_v8, 0.0  ;;  %v5828_v60 = vpop.f32.mrb[89].mxu0  ;;  %v2258_v63 = vpop.f32.mrb[91].mxu1  ;;  %v2576_v50 = vor.u32 %v2575_v1, %v2571_v36  ;;  %v2580_v3 = vrot.slane %v2578_v55, 1  ;;  %v2587_v2 = vrot.slane %v2585_v49, 1  ;;  %v6491_v8 = vld [vmem:[%s9407_s5 + $0x90] sm:$0xff]   ;;  %5975 = vmatprep.subr.bf16.mxu1 %v6490_v61 }
 0x2f9   : > { %v7786_v16 = vadd.f32 %v5828_v60, %v5827_v17  ;;  %v5830_v62 = vpop.f32.mrb[90].mxu0  ;;  %v7794_v20 = vpack.c.bf16 %v2309_v14, %v2308_v33  ;;  %v2592_v12 = vrot.slane %v2590_v24, 1  ;;  %v2256_v28 = vadd.f32 %v2255_v39, %v2095_v42  ;;  %5976 = vmatpush3.bf16.msra.mxu1 %v6491_v8 }
 0x2fa   : > { %v2328_v0 = vpack.c.bf16 %v2307_v34, %v2306_v48  ;;  %v5831_v58 = vpop.f32.mrb[91].mxu0  ;;  %v7797_v36 = vsel %vm912_vm6, %v2576_v50, %v2580_v3  ;;  %v2588_v1 = vor.u32 %v2587_v2, %v2583_v37  ;;  %v7803_v17 = vsel %vm6698_vm5, 0, %v2396_v13  ;;  %v6492_v2 = vld [vmem:[%s9407_s5 + $0xd8] sm:$0xff]  }
 0x2fb   : > { %9451 = vst [vmem:[#allocation4_spill] sm:$0xff] %v7797_v36  ;;  %v7799_v55 = vadd.f32 %v5831_v58, %v5830_v62  ;;  %v7807_v49 = vadd.f32 %v7506_v53, %v7392_v5  ;;  %v7812_v33 = vsel %vm6698_vm5, %v7701_v19, 0  ;;  %v2412_v48 = vshrl.u32 %v7794_v20, 16  ;;  %2792 = vrot.lane.b32.xlu1 %v7797_v36, %s6533_s17  ;;  %2828 = vrot.lane.b32.xlu0 %v7803_v17, %s6533_s17  ;;  %v6493_v37 = vld [vmem:[%s9407_s5 + $0x98] sm:$0xff]  }
 0x2fc   : > { %v2405_v39 = vshrl.u32 %v2328_v0, 16  ;;  %v7822_v58 = vsel %vm6698_vm5, %v7734_v35, 0  ;;  %v7825_v5 = vsel %vm912_vm6, %v2588_v1, %v2592_v12  ;;  %v2106_v53 = vadd.f32 %v5826_v32, %v7589_v15  ;;  %5977 = vmatprep.subr.bf16.mxu1 %v6492_v2 }
 0x2fd   : > { %9452 = vst [vmem:[#allocation2_spill] sm:$0xff] %v7825_v5  ;;  %v2098_v19 = vadd.f32 %v7703_v25, %v7566_v52  ;;  %v6307_v13 = vpop.f32.mrb[92].mxu1  ;;  %v2408_v24 = vshll.u32 %v2328_v0, 16  ;;  %v2312_v14 = vmax.f32 %v7782_v4, 0.0  ;;  %v2597_v34 = vshll.u32 %v7774_v57, 16  ;;  %5978 = vmatpush3.bf16.msra.mxu1 %v6493_v37  ;;  %v6494_v37 = vld [vmem:[%s9407_s5 + $0xe0] sm:$0xff]  }
 0x2fe   : > { %v2407_v35 = vrot.slane %v2405_v39, 7  ;;  %v2271_v15 = vpop.f32.mrb[93].mxu1  ;;  %v2267_v32 = vadd.f32 %v6304_v43, %v2106_v53  ;;  %v2602_v52 = vshll.u32 %v7812_v33, 16  ;;  %v7842_v42 = vsel %vm6698_vm5, 0, %v7750_v9  ;;  %5979 = vmatprep.subr.bf16.mxu1 %v6494_v37 }
 0x2ff   : > { %v2259_v60 = vadd.f32 %v2258_v63, %v2098_v19  ;;  %v5833_v25 = vpop.f32.mrb[92].mxu0  ;;  %v6308_v50 = vpop.f32.mrb[94].mxu1  ;;  %v7844_v3 = vrot.slane %v2412_v48, 7  ;;  %v2415_v62 = vshll.u32 %v7794_v20, 16  ;;  %2794 = vrot.lane.b32.xlu1 %v7825_v5, %s6533_s17  ;;  %v2310_v4 = vmax.f32 %v2256_v28, 0.0  ;;  %2830 = vrot.lane.b32.xlu0 %v7842_v42, %s6533_s17 }
 0x300   : > { %v2595_v43 = vshrl.u32 %v7774_v57, 16  ;;  %v5834_v63 = vpop.f32.mrb[93].mxu0  ;;  %v2274_v61 = vpop.f32.mrb[95].mxu1  ;;  %v2410_v8 = vor.u32 %v2408_v24, %v2407_v35  ;;  %v2313_v9 = vmax.f32 %v2267_v32, 0.0  ;;  %v2599_v12 = vrot.slane %v2597_v34, 1 }
 0x301   : > { %v2311_v0 = vmax.f32 %v2259_v60, 0.0  ;;  %v5836_v1 = vpop.f32.mrb[94].mxu0  ;;  %v2604_v48 = vrot.slane %v2602_v52, 1  ;;  %v5835_v39 = vadd.f32 %v5834_v63, %v5833_v25  ;;  %v2609_v53 = vshll.u32 %v7803_v17, 16  ;;  %v6495_v60 = vld [vmem:[%s9407_s5 + $0xa0] sm:$0xff]  }
 0x302   : > { %v5837_v20 = vpop.f32.mrb[95].mxu0  ;;  %v2614_v28 = vshll.u32 %v7822_v58, 16  ;;  %v2331_v19 = vpack.c.bf16 %v2313_v9, %v2312_v14  ;;  %v2600_v5 = vor.u32 %v2599_v12, %v2595_v43  ;;  %v2607_v24 = vshrl.u32 %v7803_v17, 16  ;;  %5980 = vmatpush3.bf16.msra.mxu1 %v6495_v60 }
 0x303   : > { %v2330_v2 = vpack.c.bf16 %v2311_v0, %v2310_v4  ;;  %v5838_v36 = vadd.f32 %v5837_v20, %v5836_v1  ;;  %v2119_v11 = vadd.f32 %v5835_v39, %v7605_v30  ;;  %v2611_v32 = vrot.slane %v2609_v53, 1 }
 0x304   : > { %v2111_v34 = vadd.f32 %v7786_v16, %v7593_v26  ;;  %v2417_v14 = vor.u32 %v2415_v62, %v7844_v3  ;;  %v2426_v52 = vshrl.u32 %v2331_v19, 16  ;;  %v2616_v4 = vrot.slane %v2614_v28, 1 }
 0x305   : > { %v2419_v25 = vshrl.u32 %v2330_v2, 16  ;;  %v7866_v30 = vsel %vm912_vm6, %v2600_v5, %v2604_v48  ;;  %v2280_v43 = vadd.f32 %v6307_v13, %v2119_v11  ;;  %v2612_v63 = vor.u32 %v2611_v32, %v2607_v24  ;;  %v6499_v24 = vld [vmem:[%s9407_s5 + $0xb0] sm:$0xff]  }
 0x306   : > { %v2272_v9 = vadd.f32 %v2271_v15, %v2111_v34  ;;  %v2422_v16 = vshll.u32 %v2330_v2, 16  ;;  %2796 = vrot.lane.b32.xlu1 %v7866_v30, %s6533_s17  ;;  %v7872_v0 = vsel %vm6698_vm5, 0, %v2410_v8  ;;  %v2122_v62 = vadd.f32 %v5838_v36, %v7807_v49  ;;  %v6496_v15 = vld [vmem:[%s9407_s5 + $0xe8] sm:$0xff]   ;;  %v6498_v2 = vld [vmem:[%s9407_s5 + $0xf0] sm:$0xff]  }
 0x307   : > { %v2421_v26 = vrot.slane %v2419_v25, 7  ;;  %v7878_v5 = vsel %vm6698_vm5, %v7726_v47, 0  ;;  %v7881_v11 = vsel %vm912_vm6, %v2612_v63, %v2616_v4  ;;  %2832 = vrot.lane.b32.xlu0 %v7872_v0, %s6533_s17  ;;  %v2114_v13 = vadd.f32 %v7799_v55, %v7601_v31  ;;  %v6497_v36 = vld [vmem:[%s9407_s5 + $0xa8] sm:$0xff]   ;;  %5981 = vmatprep.subr.bf16.mxu1 %v6496_v15  ;;  %v6500_v15 = vld [vmem:[%s9407_s5 + $0xf8] sm:$0xff]  }
 0x308   : > { %v7895_v47 = vsel %vm6698_vm5, %v2407_v35, 0  ;;  %v7897_v49 = vrot.slane %v2426_v52, 7  ;;  %v2429_v8 = vshll.u32 %v2331_v19, 16  ;;  %v2316_v1 = vmax.f32 %v2280_v43, 0.0  ;;  %5982 = vmatpush3.bf16.msra.mxu1 %v6497_v36  ;;  %v6501_v36 = vld [vmem:[%s9407_s5 + $0xb8] sm:$0xff]  }
 0x309   : > { %v2424_v12 = vor.u32 %v2422_v16, %v2421_v26  ;;  %v2283_v48 = vadd.f32 %v6308_v50, %v2122_v62  ;;  %v2275_v39 = vadd.f32 %v2274_v61, %v2114_v13  ;;  %v2621_v31 = vshll.u32 %v7842_v42, 16  ;;  %5983 = vmatprep.subr.bf16.mxu1 %v6498_v2 }
 0x30a   : > { %2798 = vrot.lane.b32.xlu1 %v7881_v11, %s6533_s17  ;;  %v2314_v55 = vmax.f32 %v2272_v9, 0.0  ;;  %v2626_v20 = vshll.u32 %v7878_v5, 16  ;;  %v7905_v35 = vsel %vm6698_vm5, 0, %v2417_v14  ;;  %v2633_v53 = vshll.u32 %v7872_v0, 16 }
 0x30b   : > { %v2317_v28 = vmax.f32 %v2283_v48, 0.0  ;;  %v2315_v19 = vmax.f32 %v2275_v39, 0.0  ;;  %v2619_v50 = vshrl.u32 %v7842_v42, 16  ;;  %v2623_v61 = vrot.slane %v2621_v31, 1  ;;  %2834 = vrot.lane.b32.xlu0 %v7905_v35, %s6533_s17 }
 0x30c   : > { %v2631_v32 = vshrl.u32 %v7872_v0, 16  ;;  %v2635_v34 = vrot.slane %v2633_v53, 1  ;;  %v2638_v37 = vshll.u32 %v7895_v47, 16  ;;  %v7921_v60 = vsel %vm6698_vm5, 0, %v2424_v12  ;;  %5984 = vmatpush3.bf16.msra.mxu1 %v6499_v24 }
 0x30d   : > { %v2431_v14 = vor.u32 %v2429_v8, %v7897_v49  ;;  %v7924_v52 = vpack.c.bf16 %v2317_v28, %v2316_v1  ;;  %v2332_v25 = vpack.c.bf16 %v2315_v19, %v2314_v55  ;;  %v2624_v4 = vor.u32 %v2623_v61, %v2619_v50  ;;  %5985 = vmatprep.subr.bf16.mxu1 %v6500_v15 }
 0x30e   : > { %v2628_v43 = vrot.slane %v2626_v20, 1  ;;  %v2636_v63 = vor.u32 %v2635_v34, %v2631_v32  ;;  %v2645_v9 = vshll.u32 %v7905_v35, 16  ;;  %v7930_v16 = vsel %vm6698_vm5, %v7844_v3, 0 }
 0x30f   : > { %v7934_v62 = vsel %vm6698_vm5, %v2421_v26, 0  ;;  %v2433_v13 = vshrl.u32 %v2332_v25, 16  ;;  %2836 = vrot.lane.b32.xlu0 %v7921_v60, %s6533_s17  ;;  %v2640_v3 = vrot.slane %v2638_v37, 1  ;;  %v2643_v12 = vshrl.u32 %v7905_v35, 16 }
 0x310   : > { %v7945_v8 = vsel %vm912_vm6, %v2624_v4, %v2628_v43  ;;  %v2647_v26 = vrot.slane %v2645_v9, 1  ;;  %v2436_v48 = vshll.u32 %v2332_v25, 16  ;;  %v7952_v39 = vsel %vm6698_vm5, 0, %v2431_v14  ;;  %5986 = vmatpush3.bf16.msra.mxu1 %v6501_v36 }
 0x311   : > { %v2435_v1 = vrot.slane %v2433_v13, 7  ;;  %2800 = vrot.lane.b32.xlu1 %v7945_v8, %s6533_s17  ;;  %v2657_v31 = vshll.u32 %v7921_v60, 16  ;;  %v7956_v55 = vsel %vm912_vm6, %v2636_v63, %v2640_v3  ;;  %v2650_v20 = vshll.u32 %v7930_v16, 16 }
 0x312   : > { %v2648_v28 = vor.u32 %v2647_v26, %v2643_v12  ;;  %v2655_v19 = vshrl.u32 %v7921_v60, 16  ;;  %v2662_v2 = vshll.u32 %v7934_v62, 16  ;;  %v2669_v24 = vshll.u32 %v7952_v39, 16 }
 0x313   : > { %v2438_v53 = vor.u32 %v2436_v48, %v2435_v1  ;;  %2838 = vrot.lane.b32.xlu0 %v7952_v39, %s6533_s17  ;;  %v7964_v50 = vsel %vm6698_vm5, %v2435_v1, 0  ;;  %v2659_v61 = vrot.slane %v2657_v31, 1  ;;  %v2652_v34 = vrot.slane %v2650_v20, 1 }
 0x314   : > { %v2720_v14 = vrot.slane %v7611_v59, 1  ;;  %v7978_v25 = vsel %vm6698_vm5, %v7897_v49, 0  ;;  %v2440_v4 = vshrl.u32 %v7924_v52, 16  ;;  %v2686_v63 = vshll.u32 %v7964_v50, 16 }
 0x315   : > { %2802 = vrot.lane.b32.xlu1 %v7956_v55, %s6533_s17  ;;  %v7972_v32 = vsel %vm6698_vm5, 0, %v2438_v53  ;;  %v2660_v37 = vor.u32 %v2659_v61, %v2655_v19  ;;  %v7986_v9 = vsel %vm912_vm6, %v2648_v28, %v2652_v34  ;;  %v2664_v13 = vrot.slane %v2662_v2, 1 }
 0x316   : > { %v2681_v43 = vshll.u32 %v7972_v32, 16  ;;  %v2671_v15 = vrot.slane %v2669_v24, 1  ;;  %v2721_v36 = vrot.slane %v7583_v22, 1  ;;  %v2679_v49 = vshrl.u32 %v7972_v32, 16 }
 0x317   : > { %2840 = vrot.lane.b32.xlu0 %v7972_v32, %s6533_s17  ;;  %v7993_v12 = vsel %vm912_vm6, %v2660_v37, %v2664_v13  ;;  %v2667_v26 = vshrl.u32 %v7952_v39, 16  ;;  %v2674_v1 = vshll.u32 %v7978_v25, 16  ;;  %v2688_v31 = vrot.slane %v2686_v63, 1 }
 0x318   : > { %v2683_v3 = vrot.slane %v2681_v43, 1  ;;  %v7998_v48 = vsel %vm1132_vm7, %v2720_v14, %v2721_v36  ;;  %v2442_v20 = vrot.slane %v2440_v4, 7  ;;  %v2443_v19 = vshll.u32 %v7924_v52, 16 }
 0x319   : > { %2804 = vrot.lane.b32.xlu1 %v7986_v9, %s6533_s17  ;;  %v2672_v53 = vor.u32 %v2671_v15, %v2667_v26  ;;  %v2676_v61 = vrot.slane %v2674_v1, 1  ;;  %v2726_v2 = vrot.slane %v7630_v51, 1  ;;  %v2727_v37 = vrot.slane %v7647_v46, 1 }
 0x31a   : > { %v2684_v22 = vor.u32 %v2683_v3, %v2679_v49  ;;  %v2445_v24 = vor.u32 %v2443_v19, %v2442_v20  ;;  %v2732_v52 = vrot.slane %v7678_v41, 1  ;;  %v2723_v43 = vrot.slane %v7597_v7, 1 }
 0x31b   : > { %2844 = vrot.lane.b32.xlu0 %v7998_v48, %s6533_s17  ;;  %v8012_v34 = vsel %vm912_vm6, %v2672_v53, %v2676_v61  ;;  %v8018_v14 = vsel %vm1132_vm7, %v2726_v2, %v2727_v37  ;;  %v2733_v63 = vrot.slane %v7686_v44, 1  ;;  %v2724_v46 = vrot.slane %v7579_v10, 1 }
 0x31c   : > { %v8005_v28 = vsel %vm912_vm6, %v2684_v22, %v2688_v31  ;;  %v8025_v4 = vsel %vm6698_vm5, 0, %v2445_v24  ;;  %v2738_v15 = vrot.slane %v7755_v23, 1  ;;  %v2729_v49 = vrot.slane %v7655_v29, 1 }
 0x31d   : > { %2806 = vrot.lane.b32.xlu1 %v7993_v12, %s6533_s17  ;;  %v8033_v13 = vsel %vm1132_vm7, %v2732_v52, %v2733_v63  ;;  %v8039_v36 = vsel %vm1132_vm7, %v2723_v43, %v2724_v46  ;;  %v2739_v44 = vrot.slane %v7741_v45, 1  ;;  %v2730_v10 = vrot.slane %v7637_v6, 1 }
 0x31e   : > { %v2744_v26 = vrot.slane %v7803_v17, 1  ;;  %v2735_v22 = vrot.slane %v7710_v40, 1  ;;  %v2745_v45 = vrot.slane %v7822_v58, 1  ;;  %v2736_v6 = vrot.slane %v7682_v38, 1 }
 0x31f   : > { %2810 = vrot.lane.b32.xlu0 %v8005_v28, %s6533_s17  ;;  %v8047_v3 = vsel %vm1132_vm7, %v2738_v15, %v2739_v44  ;;  %v8053_v1 = vsel %vm1132_vm7, %v2729_v49, %v2730_v10  ;;  %v2750_v53 = vrot.slane %v7872_v0, 1  ;;  %v2768_v19 = vshll.u32 %v8025_v4, 16 }
 0x320   : > { %v8061_v31 = vsel %vm1132_vm7, %v2744_v26, %v2745_v45  ;;  %v2741_v61 = vrot.slane %v7774_v57, 1  ;;  %v8069_v2 = vsel %vm1132_vm7, %v2735_v22, %v2736_v6  ;;  %v2751_v58 = vrot.slane %v7895_v47, 1 }
 0x321   : > { %2808 = vrot.lane.b32.xlu1 %v8012_v34, %s6533_s17  ;;  %v2509_v38 = vsel %vm6698_vm5, %v2442_v20, 0  ;;  %v2742_v24 = vrot.slane %v7812_v33, 1  ;;  %v2756_v52 = vrot.slane %v7921_v60, 1  ;;  %v2770_v43 = vrot.slane %v2768_v19, 1 }
 0x322   : > { %v8078_v37 = vsel %vm1132_vm7, %v2750_v53, %v2751_v58  ;;  %v2747_v47 = vrot.slane %v7842_v42, 1  ;;  %v2757_v20 = vrot.slane %v7934_v62, 1  ;;  %v2766_v46 = vshrl.u32 %v8025_v4, 16 }
 0x323   : > { %2848 = vrot.lane.b32.xlu0 %v8018_v14, %s6533_s17  ;;  %v8082_v63 = vsel %vm1132_vm7, %v2741_v61, %v2742_v24  ;;  %v2773_v15 = vshll.u32 %v2509_v38, 16  ;;  %v2748_v33 = vrot.slane %v7878_v5, 1  ;;  %v2753_v62 = vrot.slane %v7905_v35, 1 }
 0x324   : > { %v8093_v49 = vsel %vm1132_vm7, %v2756_v52, %v2757_v20  ;;  %v2771_v44 = vor.u32 %v2770_v43, %v2766_v46  ;;  %v2754_v22 = vrot.slane %v7930_v16, 1  ;;  %v2779_v45 = vrot.slane %v8025_v4, 1  ;;  %v6488_v20 = vld [vmem:[%s9407_s5 + $0x108] sm:$0xff]   ;;  %v6522_v46 = vld [vmem:[%s9407_s5 + $0x100] sm:$0xff]  }
 0x325   : > { %2842 = vrot.lane.b32.xlu1 %v8025_v4, %s6533_s17  ;;  %v8098_v10 = vsel %vm1132_vm7, %v2747_v47, %v2748_v33  ;;  %v2775_v26 = vrot.slane %v2773_v15, 1  ;;  %v2759_v53 = vrot.slane %v7952_v39, 1  ;;  %v2780_v19 = vrot.slane %v2509_v38, 1  ;;  %v6502_v15 = vld [vmem:[%s9407_s5 + $0x110] sm:$0xff]  }
 0x326   : > { %v8111_v6 = vsel %vm1132_vm7, %v2753_v62, %v2754_v22  ;;  %v2760_v61 = vrot.slane %v7978_v25, 1  ;;  %v2762_v24 = vrot.slane %v7972_v32, 1  ;;  %v2763_v38 = vrot.slane %v7964_v50, 1  ;;  %v6503_v62 = vld [vmem:[%s9407_s5 + $0x118] sm:$0xff]  }
 0x327   : > { %2852 = vrot.lane.b32.xlu0 %v8033_v13, %s6533_s17  ;;  %v8105_v5 = vsel %vm912_vm6, %v2771_v44, %v2775_v26  ;;  %v8118_v16 = vsel %vm1132_vm7, %v2779_v45, %v2780_v19 }
 0x328   : > { %v8123_v58 = vsel %vm1132_vm7, %v2759_v53, %v2760_v61  ;;  %v8130_v52 = vsel %vm1132_vm7, %v2762_v24, %v2763_v38 }
 0x329   : > { %2846 = vrot.lane.b32.xlu1 %v8039_v36, %s6533_s17 }
 0x32b   : > { %2856 = vrot.lane.b32.xlu0 %v8047_v3, %s6533_s17 }
 0x32d   : > { %2850 = vrot.lane.b32.xlu1 %v8053_v1, %s6533_s17 }
 0x32f   : > { %2860 = vrot.lane.b32.xlu0 %v8061_v31, %s6533_s17 }
 0x331   : > { %2854 = vrot.lane.b32.xlu1 %v8069_v2, %s6533_s17 }
 0x333   : > { %2864 = vrot.lane.b32.xlu0 %v8078_v37, %s6533_s17 }
 0x335   : > { %2858 = vrot.lane.b32.xlu1 %v8082_v63, %s6533_s17 }
 0x337   : > { %2868 = vrot.lane.b32.xlu0 %v8093_v49, %s6533_s17 }
 0x339   : > { %2862 = vrot.lane.b32.xlu1 %v8098_v10, %s6533_s17 }
 0x33b   : > { %2876 = vrot.lane.b32.xlu0 %v8105_v5, %s6533_s17 }
 0x33d   : > { %2866 = vrot.lane.b32.xlu1 %v8111_v6, %s6533_s17 }
 0x33f   : > { %2874 = vrot.lane.b32.xlu0 %v8118_v16, %s6533_s17 }
 0x341   : > { %2870 = vrot.lane.b32.xlu1 %v8123_v58, %s6533_s17 }
 0x343   : > { %4358 = vrot.lane.b32.xlu0 %v9444_v54, %s6534_s24 }
 0x345   : > { %2872 = vrot.lane.b32.xlu1 %v8130_v52, %s6533_s17 }
 0x347   : > { %v2815_v25 = vpop.permute.xlu0 %2814  ;;  %4390 = vrot.lane.b32.xlu0 %v9444_v54, %s6533_s17 }
 0x348   : > { %v2813_v43 = vpop.permute.xlu1 %2812  ;;  %v2928_v50 = vsel %vm1295_vm8, %v7998_v48, %v2815_v25 }
 0x349   : > { %v2924_v47 = vsel %vm1295_vm8, %v9444_v54, %v2813_v43 }
 0x34a   : > { %3411 = vmatprep.mubr.bf16.mxu0 %v2924_v47 }
 0x34b   : > { %5539 = vmatmul.mubr.msk.bf16.vlgmr.msra.gmra.mrb[96].mxu0 %vm7191_vm9, %v9442_v27 }
 0x34c   : > { %6310 = vmatpush3.bf16.msra.mxu0 %v6522_v46  ;;  %3419 = vmatprep.mubr.bf16.mxu0 %v2928_v50 }
 0x34d   : > { %6311 = vmatprep.subr.bf16.mxu0 %v6488_v20 }
 0x350   : > { %v2817_v33 = vpop.permute.xlu0 %2816  ;;  %6312 = vmatpush3.bf16.msra.mxu0 %v6488_v20  ;;  %v2783_v44 = vpop.permute.xlu1 %2782 }
 0x351   : > { %6313 = vmatprep.subr.bf16.mxu0 %v6502_v15  ;;  %v2879_v48 = vsel %vm1295_vm8, %v7611_v59, %v2783_v44  ;;  %v2932_v26 = vsel %vm1295_vm8, %v8039_v36, %v2817_v33 }
 0x353   : > { %3420 = vmatmul.mubr.bf16.gmra.mrb[100].mxu0 %v2879_v48 }
 0x354   : > { %v2819_v22 = vpop.permute.xlu0 %2818  ;;  %3427 = vmatprep.mubr.bf16.mxu0 %v2932_v26  ;;  %6314 = vmatpush3.bf16.msra.mxu0 %v6502_v15  ;;  %v2785_v45 = vpop.permute.xlu1 %2784 }
 0x355   : > { %6315 = vmatprep.subr.bf16.mxu0 %v6503_v62  ;;  %v2882_v53 = vsel %vm1295_vm8, %v7597_v7, %v2785_v45  ;;  %v2936_v61 = vsel %vm1295_vm8, %v8018_v14, %v2819_v22 }
 0x356   : > { %3572 = vmatprep.mubr.bf16.mxu1 %v2882_v53 }
 0x358   : > { %6316 = vmatpush3.bf16.msra.mxu0 %v6503_v62  ;;  %v2821_v19 = vpop.permute.xlu0 %2820 }
 0x359   : > { %v2940_v43 = vsel %vm1295_vm8, %v8053_v1, %v2821_v19 }
 0x35b   : > { %3428 = vmatmul.mubr.bf16.gmra.mrb[104].mxu0 %v2882_v53 }
 0x35c   : > { %3435 = vmatprep.mubr.bf16.mxu0 %v2936_v61  ;;  %v2787_v59 = vpop.permute.xlu1 %2786 }
 0x35d   : > { %v2885_v38 = vsel %vm1295_vm8, %v7630_v51, %v2787_v59 }
 0x35e   : > { %v2823_v24 = vpop.permute.xlu0 %2822 }
 0x35f   : > { %v2944_v46 = vsel %vm1295_vm8, %v8033_v13, %v2823_v24 }
 0x362   : > { %v2789_v25 = vpop.permute.xlu1 %2788 }
 0x363   : > { %3436 = vmatmul.mubr.bf16.gmra.mrb[108].mxu0 %v2885_v38  ;;  %v2888_v50 = vsel %vm1295_vm8, %v7655_v29, %v2789_v25 }
 0x364   : > { %3443 = vmatprep.mubr.bf16.mxu0 %v2940_v43 }
 0x365   : > { %v2825_v7 = vpop.permute.xlu0 %2824 }
 0x366   : > { %v2791_v47 = vpop.permute.xlu1 %2790  ;;  %v2948_v62 = vsel %vm1295_vm8, %v8069_v2, %v2825_v7 }
 0x367   : > { %v2891_v51 = vsel %vm1295_vm8, %v7678_v41, %v2791_v47 }
 0x369   : > { %v2827_v20 = vpop.permute.xlu0 %2826 }
 0x36a   : > { %v2952_v45 = vsel %vm1295_vm8, %v8047_v3, %v2827_v20 }
 0x36b   : > { %3444 = vmatmul.mubr.bf16.gmra.mrb[112].mxu0 %v2888_v50 }
 0x36c   : > { %3451 = vmatprep.mubr.bf16.mxu0 %v2944_v46 }
 0x36d   : > { %v2793_v15 = vpop.permute.xlu1 %2792  ;;  %v2829_v33 = vpop.permute.xlu0 %2828 }
 0x36e   : > { %v2894_v29 = vsel %vm1295_vm8, %v7710_v40, %v2793_v15  ;;  %v2956_v59 = vsel %vm1295_vm8, %v8082_v63, %v2829_v33 }
 0x371   : > { %v2795_v44 = vpop.permute.xlu1 %2794  ;;  %v2831_v48 = vpop.permute.xlu0 %2830 }
 0x372   : > { %v2897_v61 = vsel %vm1295_vm8, %v7755_v23, %v2795_v44  ;;  %v2960_v47 = vsel %vm1295_vm8, %v8061_v31, %v2831_v48 }
 0x373   : > { %3452 = vmatmul.mubr.bf16.gmra.mrb[116].mxu0 %v2891_v51 }
 0x374   : > { %3459 = vmatprep.mubr.bf16.mxu0 %v2948_v62 }
 0x378   : > { %v2797_v26 = vpop.permute.xlu1 %2796 }
 0x379   : > { %v2833_v22 = vpop.permute.xlu0 %2832  ;;  %v2900_v7 = vsel %vm1295_vm8, %v7774_v57, %v2797_v26 }
 0x37a   : > { %v2964_v57 = vsel %vm1295_vm8, %v8098_v10, %v2833_v22 }
 0x37b   : > { %3460 = vmatmul.mubr.bf16.gmra.mrb[120].mxu0 %v2894_v29 }
 0x37c   : > { %3467 = vmatprep.mubr.bf16.mxu0 %v2952_v45  ;;  %v2799_v53 = vpop.permute.xlu1 %2798 }
 0x37d   : > { %v2835_v19 = vpop.permute.xlu0 %2834  ;;  %v2903_v33 = vsel %vm1295_vm8, %v7803_v17, %v2799_v53 }
 0x381   : > { %v2837_v41 = vpop.permute.xlu0 %2836 }
 0x383   : > { %3468 = vmatmul.mubr.bf16.gmra.mrb[124].mxu0 %v2897_v61  ;;  %v2801_v24 = vpop.permute.xlu1 %2800 }
 0x384   : > { %3475 = vmatprep.mubr.bf16.mxu0 %v2956_v59  ;;  %v2906_v48 = vsel %vm1295_vm8, %v7842_v42, %v2801_v24  ;;  %v2972_v42 = vsel %vm1295_vm8, %v8111_v6, %v2837_v41  ;;  %v9454_v59 = vld [vmem:[#allocation7_spill] sm:$0xff] }
 0x385   : > { %v2839_v25 = vpop.permute.xlu0 %2838 }
 0x387   : > { %v2803_v43 = vpop.permute.xlu1 %2802 }
 0x388   : > { %v2909_v22 = vsel %vm1295_vm8, %v7872_v0, %v2803_v43  ;;  %v9455_v0 = vld [vmem:[#allocation6_spill] sm:$0xff] }
 0x389   : > { %v2841_v40 = vpop.permute.xlu0 %2840 }
 0x38b   : > { %3476 = vmatmul.mubr.bf16.gmra.mrb[128].mxu0 %v2900_v7  ;;  %v2805_v20 = vpop.permute.xlu1 %2804 }
 0x38c   : > { %3483 = vmatprep.mubr.bf16.mxu0 %v2960_v47  ;;  %v2912_v47 = vsel %vm1295_vm8, %v7905_v35, %v2805_v20  ;;  %v9456_v35 = vld [vmem:[#allocation3_spill] sm:$0xff] }
 0x38d   : > { %v2845_v46 = vpop.permute.xlu0 %2844 }
 0x38e   : > { %v2988_v23 = vsel %vm1295_vm8, %v7641_v21, %v2845_v46  ;;  %v2968_v21 = vsel %vm1295_vm8, %v8078_v37, %v2835_v19 }
 0x38f   : > { %v2807_v15 = vpop.permute.xlu1 %2806  ;;  %3573 = vmatmul.mubr.bf16.vlgmr.msra.gmra.mrb[96].mxu1 %v2988_v23 }
 0x390   : > { %3580 = vmatprep.mubr.bf16.mxu1 %v2885_v38  ;;  %v9453_v38 = vld [vmem:[#allocation5_spill] sm:$0xff]  ;;  %v2915_v46 = vsel %vm1295_vm8, %v7921_v60, %v2807_v15  ;;  %v9457_v60 = vld [vmem:[#allocation4_spill] sm:$0xff] }
 0x391   : > { %v2811_v26 = vpop.permute.xlu0 %2810 }
 0x393   : > { %3484 = vmatmul.mubr.bf16.gmra.mrb[132].mxu0 %v2903_v33  ;;  %v2809_v44 = vpop.permute.xlu1 %2808 }
 0x394   : > { %3491 = vmatprep.mubr.bf16.mxu0 %v2964_v57  ;;  %v2918_v23 = vsel %vm1295_vm8, %v7952_v39, %v2809_v44  ;;  %v2921_v57 = vsel %vm1295_vm8, %v7972_v32, %v2811_v26 }
 0x395   : > { %v2849_v53 = vpop.permute.xlu0 %2848 }
 0x396   : > { %v2996_v19 = vsel %vm1295_vm8, %v9454_v59, %v2849_v53 }
 0x397   : > { %v2843_v62 = vpop.permute.xlu1 %2842 }
 0x399   : > { %v2853_v41 = vpop.permute.xlu0 %2852 }
 0x39a   : > { %v3004_v20 = vsel %vm1295_vm8, %v9456_v35, %v2853_v41 }
 0x39b   : > { %3492 = vmatmul.mubr.bf16.gmra.mrb[136].mxu0 %v2906_v48  ;;  %v2847_v45 = vpop.permute.xlu1 %2846 }
 0x39c   : > { %3499 = vmatprep.mubr.bf16.mxu0 %v2968_v21  ;;  %v2992_v17 = vsel %vm1295_vm8, %v9453_v38, %v2847_v45 }
 0x39d   : > { %3581 = vmatmul.mubr.bf16.gmra.mrb[100].mxu1 %v2992_v17 }
 0x39e   : > { %3588 = vmatprep.mubr.bf16.mxu1 %v2888_v50  ;;  %v2976_v50 = vsel %vm1295_vm8, %v8093_v49, %v2839_v25 }
 0x39f   : > { %v2851_v24 = vpop.permute.xlu1 %2850 }
 0x3a0   : > { %v3000_v43 = vsel %vm1295_vm8, %v9455_v0, %v2851_v24 }
 0x3a3   : > { %3500 = vmatmul.mubr.bf16.gmra.mrb[140].mxu0 %v2909_v22  ;;  %v2855_v25 = vpop.permute.xlu1 %2854 }
 0x3a4   : > { %3507 = vmatprep.mubr.bf16.mxu0 %v2972_v42  ;;  %v3008_v15 = vsel %vm1295_vm8, %v9457_v60, %v2855_v25 }
 0x3a5   : > { %3589 = vmatmul.mubr.bf16.gmra.mrb[104].mxu1 %v2996_v19 }
 0x3a6   : > { %3596 = vmatprep.mubr.bf16.mxu1 %v2891_v51  ;;  %v2980_v51 = vsel %vm1295_vm8, %v8123_v58, %v2841_v40  ;;  %v2857_v40 = vpop.permute.xlu0 %2856 }
 0x3a7   : > { %v2859_v44 = vpop.permute.xlu1 %2858 }
 0x3aa   : > { %v2861_v32 = vpop.permute.xlu0 %2860 }
 0x3ab   : > { %3508 = vmatmul.mubr.bf16.gmra.mrb[144].mxu0 %v2912_v47 }
 0x3ac   : > { %3515 = vmatprep.mubr.bf16.mxu0 %v2976_v50 }
 0x3ad   : > { %3597 = vmatmul.mubr.bf16.gmra.mrb[108].mxu1 %v3000_v43 }
 0x3ae   : > { %3604 = vmatprep.mubr.bf16.mxu1 %v2894_v29  ;;  %v2984_v29 = vsel %vm1295_vm8, %v8130_v52, %v2843_v62 }
 0x3b3   : > { %3516 = vmatmul.mubr.bf16.gmra.mrb[148].mxu0 %v2915_v46 }
 0x3b4   : > { %3523 = vmatprep.mubr.bf16.mxu0 %v2980_v51 }
 0x3b5   : > { %3605 = vmatmul.mubr.bf16.gmra.mrb[112].mxu1 %v3004_v20 }
 0x3b6   : > { %3612 = vmatprep.mubr.bf16.mxu1 %v2897_v61  ;;  %v9458_v61 = vld [vmem:[#allocation2_spill] sm:$0xff] }
 0x3b7   : > { %v3012_v39 = vsel %vm1295_vm8, %v9458_v61, %v2857_v40 }
 0x3bb   : > { %3524 = vmatmul.mubr.bf16.gmra.mrb[152].mxu0 %v2918_v23 }
 0x3bc   : > { %3531 = vmatprep.mubr.bf16.mxu0 %v2984_v29 }
 0x3bd   : > { %3613 = vmatmul.mubr.bf16.gmra.mrb[116].mxu1 %v3008_v15 }
 0x3be   : > { %3620 = vmatprep.mubr.bf16.mxu1 %v2900_v7  ;;  %v3016_v7 = vsel %vm1295_vm8, %v7866_v30, %v2859_v44 }
 0x3c3   : > { %3532 = vmatmul.mubr.bf16.gmra.mrb[156].mxu0 %v2921_v57 }
 0x3c4   : > { %6317 = vmatprep.mubr.msk.bf16.mxu0 %vm1295_vm8, %v8039_v36  ;;  %v3020_v36 = vsel %vm1295_vm8, %v7881_v11, %v2861_v32 }
 0x3c5   : > { %3621 = vmatmul.mubr.bf16.gmra.mrb[120].mxu1 %v3012_v39 }
 0x3c6   : > { %3628 = vmatprep.mubr.bf16.mxu1 %v2903_v33 }
 0x3cb   : > { %6318 = vmatmul.mubr.msk.bf16.vlgmr.msra.gmra.mrb[160].mxu0 %vm1295_vm8, %v8018_v14  ;;  %v2863_v14 = vpop.permute.xlu1 %2862 }
 0x3cc   : > { %6321 = vmatprep.mubr.msk.bf16.mxu0 %vm1295_vm8, %v8053_v1  ;;  %v3024_v30 = vsel %vm1295_vm8, %v7945_v8, %v2863_v14 }
 0x3cd   : > { %3629 = vmatmul.mubr.bf16.gmra.mrb[124].mxu1 %v3016_v7 }
 0x3ce   : > { %3636 = vmatprep.mubr.bf16.mxu1 %v2906_v48 }
 0x3d3   : > { %6322 = vmatmul.mubr.msk.bf16.gmra.mrb[164].mxu0 %vm1295_vm8, %v8033_v13  ;;  %v2865_v13 = vpop.permute.xlu0 %2864 }
 0x3d4   : > { %6325 = vmatprep.mubr.msk.bf16.mxu0 %vm1295_vm8, %v8069_v2  ;;  %v3028_v11 = vsel %vm1295_vm8, %v7956_v55, %v2865_v13 }
 0x3d5   : > { %3637 = vmatmul.mubr.bf16.gmra.mrb[128].mxu1 %v3020_v36 }
 0x3d6   : > { %3644 = vmatprep.mubr.bf16.mxu1 %v2909_v22 }
 0x3d7   : > { %v2869_v1 = vpop.permute.xlu0 %2868 }
 0x3d8   : > { %v3036_v55 = vsel %vm1295_vm8, %v7993_v12, %v2869_v1 }
 0x3db   : > { %6326 = vmatmul.mubr.msk.bf16.gmra.mrb[168].mxu0 %vm1295_vm8, %v8047_v3  ;;  %v2867_v3 = vpop.permute.xlu1 %2866  ;;  %v2877_v2 = vpop.permute.xlu0 %2876 }
 0x3dc   : > { %6329 = vmatprep.mubr.msk.bf16.mxu0 %vm1295_vm8, %v8082_v63  ;;  %v3032_v8 = vsel %vm1295_vm8, %v7986_v9, %v2867_v3 }
 0x3dd   : > { %3645 = vmatmul.mubr.bf16.gmra.mrb[132].mxu1 %v3024_v30 }
 0x3de   : > { %3652 = vmatprep.mubr.bf16.mxu1 %v2912_v47 }
 0x3e3   : > { %6330 = vmatmul.mubr.msk.bf16.gmra.mrb[172].mxu0 %vm1295_vm8, %v8061_v31  ;;  %v2871_v31 = vpop.permute.xlu1 %2870 }
 0x3e4   : > { %6333 = vmatprep.mubr.msk.bf16.mxu0 %vm1295_vm8, %v8098_v10  ;;  %v3040_v9 = vsel %vm1295_vm8, %v8012_v34, %v2871_v31 }
 0x3e5   : > { %3653 = vmatmul.mubr.bf16.gmra.mrb[136].mxu1 %v3028_v11 }
 0x3e6   : > { %3660 = vmatprep.mubr.bf16.mxu1 %v2915_v46 }
 0x3e7   : > { %v2873_v63 = vpop.permute.xlu1 %2872 }
 0x3e8   : > { %v3044_v12 = vsel %vm1295_vm8, %v8005_v28, %v2873_v63 }
 0x3eb   : > { %6334 = vmatmul.mubr.msk.bf16.gmra.mrb[176].mxu0 %vm1295_vm8, %v8078_v37  ;;  %v3051_v37 = vsel %vm1295_vm8, %v8025_v4, %v2877_v2 }
 0x3ec   : > { %6337 = vmatprep.mubr.msk.bf16.mxu0 %vm1295_vm8, %v8111_v6 }
 0x3ed   : > { %3661 = vmatmul.mubr.bf16.gmra.mrb[140].mxu1 %v3032_v8 }
 0x3ee   : > { %3668 = vmatprep.mubr.bf16.mxu1 %v2918_v23 }
 0x3f3   : > { %6338 = vmatmul.mubr.msk.bf16.gmra.mrb[180].mxu0 %vm1295_vm8, %v8093_v49  ;;  %v2875_v49 = vpop.permute.xlu0 %2874 }
 0x3f4   : > { %6341 = vmatprep.mubr.msk.bf16.mxu0 %vm1295_vm8, %v8123_v58  ;;  %v3048_v34 = vsel %vm1295_vm8, %v8105_v5, %v2875_v49 }
 0x3f5   : > { %3669 = vmatmul.mubr.bf16.gmra.mrb[144].mxu1 %v3036_v55  ;;  %v8317_v55 = vld [vmem:[%s9408_s6] ss:$0 sm:$0xff] }
 0x3f6   : > { %3676 = vmatprep.mubr.bf16.mxu1 %v2921_v57 }
 0x3fb   : > { %6342 = vmatmul.mubr.msk.bf16.gmra.mrb[184].mxu0 %vm1295_vm8, %v8130_v52 }
 0x3fc   : > { %6345 = vmatprep.mubr.msk.bf16.mxu0 %vm1295_vm8, %v8118_v16 }
 0x3fd   : > { %3677 = vmatmul.mubr.bf16.gmra.mrb[148].mxu1 %v3040_v9 }
 0x3fe   : > { %3684 = vmatprep.mubr.bf16.mxu1 %v3051_v37 }
 0x403   : > { %6346 = vmatmul.mubr.msk.bf16.gmra.mrb[188].mxu0 %vm1295_vm8, %v9444_v54 }
 0x405   : > { %3685 = vmatmul.mubr.bf16.gmra.mrb[152].mxu1 %v3044_v12 }
 0x406   : > { %5541 = vmatprep.mubr.msk.bf16.mxu1 %vm7191_vm9, %v9442_v27 }
 0x40d   : > { %3693 = vmatmul.mubr.bf16.gmra.mrb[156].mxu1 %v3048_v34 }
 0x41e   : > { %v5875_v10 = vpop.f32.mrb[96].mxu0 }
 0x41f   : > { %v5876_v4 = vpop.f32.mrb[97].mxu0 }
 0x420   : > { %v5877_v6 = vadd.f32 %v5876_v4, %v5875_v10  ;;  %v5878_v16 = vpop.f32.mrb[98].mxu0 }
 0x421   : > { %v5879_v58 = vpop.f32.mrb[99].mxu0 }
 0x422   : > { %v5880_v52 = vadd.f32 %v5879_v58, %v5878_v16  ;;  %v3414_v37 = vadd.f32 %v5877_v6, %v8317_v55 }
 0x424   : > { %v3417_v10 = vadd.f32 %v5880_v52, %v8317_v55 }
 0x426   : > { %v5881_v33 = vpop.f32.mrb[100].mxu0 }
 0x427   : > { %v5882_v62 = vpop.f32.mrb[101].mxu0 }
 0x428   : > { %v8280_v48 = vadd.f32 %v5882_v62, %v5881_v33  ;;  %v5884_v28 = vpop.f32.mrb[102].mxu0 }
 0x429   : > { %v5885_v21 = vpop.f32.mrb[103].mxu0 }
 0x42a   : > { %v8282_v26 = vadd.f32 %v5885_v21, %v5884_v28 }
 0x42e   : > { %v5887_v27 = vpop.f32.mrb[104].mxu0 }
 0x42f   : > { %v5888_v56 = vpop.f32.mrb[105].mxu0 }
 0x430   : > { %v8284_v45 = vadd.f32 %v5888_v56, %v5887_v27  ;;  %v5890_v5 = vpop.f32.mrb[106].mxu0 }
 0x431   : > { %v5891_v38 = vpop.f32.mrb[107].mxu0 }
 0x432   : > { %v8286_v17 = vadd.f32 %v5891_v38, %v5890_v5 }
 0x436   : > { %v5893_v53 = vpop.f32.mrb[108].mxu0 }
 0x437   : > { %v5894_v22 = vpop.f32.mrb[109].mxu0 }
 0x438   : > { %v8290_v42 = vadd.f32 %v5894_v22, %v5893_v53  ;;  %v5896_v59 = vpop.f32.mrb[110].mxu0 }
 0x439   : > { %v5897_v19 = vpop.f32.mrb[111].mxu0 }
 0x43a   : > { %v8292_v24 = vadd.f32 %v5897_v19, %v5896_v59  ;;  %v3422_v19 = vadd.f32 %v8280_v48, %v8317_v55 }
 0x43e   : > { %v5899_v47 = vpop.f32.mrb[112].mxu0 }
 0x43f   : > { %v5900_v50 = vpop.f32.mrb[113].mxu0 }
 0x440   : > { %v8296_v0 = vadd.f32 %v5900_v50, %v5899_v47  ;;  %v5902_v43 = vpop.f32.mrb[114].mxu0 }
 0x441   : > { %v5903_v41 = vpop.f32.mrb[115].mxu0 }
 0x442   : > { %v8298_v46 = vadd.f32 %v5903_v41, %v5902_v43  ;;  %v6504_v43 = vld [vmem:[%s9409_s7 + $0x40] sm:$0xff]  }
 0x443   : > { %v6505_v41 = vld [vmem:[%s9409_s7] sm:$0xff]   ;;  %6385 = vmatprep.subr.bf16.mxu1 %v6504_v43  ;;  %6103 = vmatprep.subr.bf16.mxu0 %v6504_v43 }
 0x444   : > { %6393 = vmatpush3.bf16.msra.mxu1 %v6505_v41  ;;  %6104 = vmatpush3.bf16.msra.mxu0 %v6505_v41 }
 0x446   : > { %v5905_v51 = vpop.f32.mrb[116].mxu0 }
 0x447   : > { %v5906_v35 = vpop.f32.mrb[117].mxu0 }
 0x448   : > { %v8300_v20 = vadd.f32 %v5906_v35, %v5905_v51  ;;  %v5908_v25 = vpop.f32.mrb[118].mxu0  ;;  %v3425_v35 = vadd.f32 %v8282_v26, %v8317_v55  ;;  %v3430_v26 = vadd.f32 %v8284_v45, %v8317_v55 }
 0x449   : > { %v5909_v23 = vpop.f32.mrb[119].mxu0 }
 0x44a   : > { %v8302_v29 = vadd.f32 %v5909_v23, %v5908_v25 }
 0x44e   : > { %v5911_v60 = vpop.f32.mrb[120].mxu0 }
 0x44f   : > { %v5912_v15 = vpop.f32.mrb[121].mxu0 }
 0x450   : > { %v8304_v40 = vadd.f32 %v5912_v15, %v5911_v60  ;;  %v5914_v57 = vpop.f32.mrb[122].mxu0 }
 0x451   : > { %v5915_v61 = vpop.f32.mrb[123].mxu0 }
 0x452   : > { %v8306_v39 = vadd.f32 %v5915_v61, %v5914_v57 }
 0x456   : > { %v5917_v44 = vpop.f32.mrb[124].mxu0 }
 0x457   : > { %v5918_v7 = vpop.f32.mrb[125].mxu0 }
 0x458   : > { %v8308_v32 = vadd.f32 %v5918_v7, %v5917_v44  ;;  %v5920_v36 = vpop.f32.mrb[126].mxu0 }
 0x459   : > { %v5921_v14 = vpop.f32.mrb[127].mxu0 }
 0x45a   : > { %v8310_v30 = vadd.f32 %v5921_v14, %v5920_v36 }
 0x45e   : > { %v5923_v13 = vpop.f32.mrb[128].mxu0 }
 0x45f   : > { %v5924_v11 = vpop.f32.mrb[129].mxu0 }
 0x460   : > { %v8312_v3 = vadd.f32 %v5924_v11, %v5923_v13  ;;  %v5926_v8 = vpop.f32.mrb[130].mxu0 }
 0x461   : > { %v5927_v1 = vpop.f32.mrb[131].mxu0 }
 0x462   : > { %v8319_v31 = vadd.f32 %v5927_v1, %v5926_v8  ;;  %v5987_v2 = vpop.f32.mrb[96].mxu1  ;;  %v3433_v1 = vadd.f32 %v8286_v17, %v8317_v55 }
 0x463   : > { %v5988_v9 = vpop.f32.mrb[97].mxu1 }
 0x464   : > { %v5989_v63 = vadd.f32 %v5988_v9, %v5987_v2  ;;  %v5990_v12 = vpop.f32.mrb[98].mxu1 }
 0x465   : > { %v5991_v49 = vpop.f32.mrb[99].mxu1 }
 0x466   : > { %v5929_v34 = vpop.f32.mrb[132].mxu0  ;;  %v5992_v4 = vadd.f32 %v5991_v49, %v5990_v12  ;;  %v8323_v58 = vadd.f32 %v5989_v63, %v3414_v37  ;;  %v6506_v63 = vld [vmem:[%s9409_s7 + $0x48] sm:$0xff]  }
 0x467   : > { %v5930_v16 = vpop.f32.mrb[133].mxu0  ;;  %6386 = vmatprep.subr.bf16.mxu1 %v6506_v63  ;;  %6105 = vmatprep.subr.bf16.mxu0 %v6506_v63 }
 0x468   : > { %v8325_v33 = vadd.f32 %v5930_v16, %v5929_v34  ;;  %v5932_v62 = vpop.f32.mrb[134].mxu0  ;;  %v8327_v21 = vadd.f32 %v5992_v4, %v3417_v10 }
 0x469   : > { %v5933_v28 = vpop.f32.mrb[135].mxu0 }
 0x46a   : > { %v8329_v27 = vadd.f32 %v5933_v28, %v5932_v62  ;;  %v6507_v62 = vld [vmem:[%s9409_s7 + $0x8] sm:$0xff]   ;;  %v3438_v28 = vadd.f32 %v8290_v42, %v8317_v55 }
 0x46b   : > { %6394 = vmatpush3.bf16.msra.mxu1 %v6507_v62  ;;  %6106 = vmatpush3.bf16.msra.mxu0 %v6507_v62  ;;  %v3457_v62 = vadd.f32 %v8302_v29, %v8317_v55 }
 0x46e   : > { %v5935_v56 = vpop.f32.mrb[136].mxu0 }
 0x46f   : > { %v5936_v6 = vpop.f32.mrb[137].mxu0 }
 0x470   : > { %v8331_v5 = vadd.f32 %v5936_v6, %v5935_v56  ;;  %v5938_v38 = vpop.f32.mrb[138].mxu0  ;;  %v5993_v53 = vpop.f32.mrb[100].mxu1 }
 0x471   : > { %v5939_v22 = vpop.f32.mrb[139].mxu0  ;;  %v5994_v52 = vpop.f32.mrb[101].mxu1 }
 0x472   : > { %v8333_v59 = vadd.f32 %v5939_v22, %v5938_v38  ;;  %v5995_v47 = vadd.f32 %v5994_v52, %v5993_v53  ;;  %v5996_v50 = vpop.f32.mrb[102].mxu1  ;;  %v3441_v53 = vadd.f32 %v8292_v24, %v8317_v55 }
 0x473   : > { %v5997_v51 = vpop.f32.mrb[103].mxu1 }
 0x474   : > { %v5998_v25 = vadd.f32 %v5997_v51, %v5996_v50  ;;  %v8345_v23 = vadd.f32 %v5995_v47, %v3422_v19 }
 0x476   : > { %v5941_v48 = vpop.f32.mrb[140].mxu0  ;;  %v8347_v15 = vadd.f32 %v5998_v25, %v3425_v35 }
 0x477   : > { %v5942_v60 = vpop.f32.mrb[141].mxu0 }
 0x478   : > { %v8349_v57 = vadd.f32 %v5942_v60, %v5941_v48  ;;  %v5944_v61 = vpop.f32.mrb[142].mxu0  ;;  %v5999_v44 = vpop.f32.mrb[104].mxu1  ;;  %v3446_v48 = vadd.f32 %v8296_v0, %v8317_v55 }
 0x479   : > { %v5945_v7 = vpop.f32.mrb[143].mxu0  ;;  %v6000_v36 = vpop.f32.mrb[105].mxu1 }
 0x47a   : > { %v8351_v14 = vadd.f32 %v5945_v7, %v5944_v61  ;;  %v6001_v13 = vadd.f32 %v6000_v36, %v5999_v44  ;;  %v6002_v11 = vpop.f32.mrb[106].mxu1  ;;  %v3449_v44 = vadd.f32 %v8298_v46, %v8317_v55 }
 0x47b   : > { %v6003_v8 = vpop.f32.mrb[107].mxu1 }
 0x47c   : > { %v6004_v2 = vadd.f32 %v6003_v8, %v6002_v11  ;;  %v8357_v9 = vadd.f32 %v6001_v13, %v3430_v26  ;;  %v6508_v13 = vld [vmem:[%s9409_s7 + $0x50] sm:$0xff]  }
 0x47d   : > { %6387 = vmatprep.subr.bf16.mxu1 %v6508_v13  ;;  %6107 = vmatprep.subr.bf16.mxu0 %v6508_v13 }
 0x47e   : > { %v5947_v37 = vpop.f32.mrb[144].mxu0  ;;  %v8362_v49 = vadd.f32 %v6004_v2, %v3433_v1 }
 0x47f   : > { %v5948_v12 = vpop.f32.mrb[145].mxu0 }
 0x480   : > { %v8364_v34 = vadd.f32 %v5948_v12, %v5947_v37  ;;  %v5950_v45 = vpop.f32.mrb[146].mxu0  ;;  %v6005_v10 = vpop.f32.mrb[108].mxu1  ;;  %v6509_v12 = vld [vmem:[%s9409_s7 + $0x10] sm:$0xff]  }
 0x481   : > { %v5951_v4 = vpop.f32.mrb[147].mxu0  ;;  %v6006_v16 = vpop.f32.mrb[109].mxu1  ;;  %6395 = vmatpush3.bf16.msra.mxu1 %v6509_v12  ;;  %6108 = vmatpush3.bf16.msra.mxu0 %v6509_v12 }
 0x482   : > { %v8366_v17 = vadd.f32 %v5951_v4, %v5950_v45  ;;  %v6007_v56 = vadd.f32 %v6006_v16, %v6005_v10  ;;  %v6008_v6 = vpop.f32.mrb[110].mxu1  ;;  %v3454_v45 = vadd.f32 %v8300_v20, %v8317_v55 }
 0x483   : > { %v6009_v38 = vpop.f32.mrb[111].mxu1 }
 0x484   : > { %v6010_v22 = vadd.f32 %v6009_v38, %v6008_v6  ;;  %v8375_v52 = vadd.f32 %v6007_v56, %v3438_v28 }
 0x486   : > { %v5953_v19 = vpop.f32.mrb[148].mxu0  ;;  %v8377_v50 = vadd.f32 %v6010_v22, %v3441_v53 }
 0x487   : > { %v5954_v47 = vpop.f32.mrb[149].mxu0 }
 0x488   : > { %v8379_v43 = vadd.f32 %v5954_v47, %v5953_v19  ;;  %v5956_v41 = vpop.f32.mrb[150].mxu0  ;;  %v6011_v51 = vpop.f32.mrb[112].mxu1 }
 0x489   : > { %v5957_v42 = vpop.f32.mrb[151].mxu0  ;;  %v6012_v35 = vpop.f32.mrb[113].mxu1 }
 0x48a   : > { %v8381_v25 = vadd.f32 %v5957_v42, %v5956_v41  ;;  %v6013_v60 = vadd.f32 %v6012_v35, %v6011_v51  ;;  %v6014_v24 = vpop.f32.mrb[114].mxu1  ;;  %v3462_v42 = vadd.f32 %v8304_v40, %v8317_v55 }
 0x48b   : > { %v6015_v61 = vpop.f32.mrb[115].mxu1 }
 0x48c   : > { %v6016_v7 = vadd.f32 %v6015_v61, %v6014_v24  ;;  %v8387_v36 = vadd.f32 %v6013_v60, %v3446_v48  ;;  %v3465_v60 = vadd.f32 %v8306_v39, %v8317_v55 }
 0x48e   : > { %v5959_v26 = vpop.f32.mrb[152].mxu0  ;;  %v8392_v8 = vadd.f32 %v6016_v7, %v3449_v44  ;;  %v6510_v7 = vld [vmem:[%s9409_s7 + $0x58] sm:$0xff]  }
 0x48f   : > { %v5960_v11 = vpop.f32.mrb[153].mxu0  ;;  %6109 = vmatprep.subr.bf16.mxu0 %v6510_v7  ;;  %6388 = vmatprep.subr.bf16.mxu1 %v6510_v7 }
 0x490   : > { %v8394_v1 = vadd.f32 %v5960_v11, %v5959_v26  ;;  %v5962_v0 = vpop.f32.mrb[154].mxu0  ;;  %v6017_v2 = vpop.f32.mrb[116].mxu1  ;;  %v6511_v26 = vld [vmem:[%s9409_s7 + $0x18] sm:$0xff]  }
 0x491   : > { %v5963_v37 = vpop.f32.mrb[155].mxu0  ;;  %v6018_v63 = vpop.f32.mrb[117].mxu1  ;;  %6110 = vmatpush3.bf16.msra.mxu0 %v6511_v26  ;;  %6396 = vmatpush3.bf16.msra.mxu1 %v6511_v26 }
 0x492   : > { %v8396_v46 = vadd.f32 %v5963_v37, %v5962_v0  ;;  %v6019_v10 = vadd.f32 %v6018_v63, %v6017_v2  ;;  %v6020_v4 = vpop.f32.mrb[118].mxu1 }
 0x493   : > { %v6021_v16 = vpop.f32.mrb[119].mxu1 }
 0x494   : > { %v6022_v28 = vadd.f32 %v6021_v16, %v6020_v4  ;;  %v8405_v56 = vadd.f32 %v6019_v10, %v3454_v45  ;;  %v3470_v10 = vadd.f32 %v8308_v32, %v8317_v55 }
 0x496   : > { %v5965_v6 = vpop.f32.mrb[156].mxu0  ;;  %v8407_v53 = vadd.f32 %v6022_v28, %v3457_v62  ;;  %v3473_v28 = vadd.f32 %v8310_v30, %v8317_v55  ;;  %v6515_v30 = vld [vmem:[%s9409_s7 + $0x28] sm:$0xff]  }
 0x497   : > { %v5966_v38 = vpop.f32.mrb[157].mxu0 }
 0x498   : > { %v8409_v22 = vadd.f32 %v5966_v38, %v5965_v6  ;;  %v5968_v19 = vpop.f32.mrb[158].mxu0  ;;  %v6023_v47 = vpop.f32.mrb[120].mxu1 }
 0x499   : > { %v5969_v20 = vpop.f32.mrb[159].mxu0  ;;  %v6024_v41 = vpop.f32.mrb[121].mxu1 }
 0x49a   : > { %v8411_v51 = vadd.f32 %v5969_v20, %v5968_v19  ;;  %v6025_v35 = vadd.f32 %v6024_v41, %v6023_v47  ;;  %v6026_v29 = vpop.f32.mrb[122].mxu1 }
 0x49b   : > { %v6027_v48 = vpop.f32.mrb[123].mxu1 }
 0x49c   : > { %v6028_v24 = vadd.f32 %v6027_v48, %v6026_v29  ;;  %v8417_v61 = vadd.f32 %v6025_v35, %v3462_v42  ;;  %v6514_v42 = vld [vmem:[%s9409_s7 + $0x68] sm:$0xff]  }
 0x49e   : > { %v6319_v44 = vpop.f32.mrb[160].mxu0  ;;  %v8426_v11 = vadd.f32 %v6028_v24, %v3465_v60 }
 0x49f   : > { %v3744_v40 = vadd.f32 %v6319_v44, %v8345_v23  ;;  %v3735_v13 = vpop.f32.mrb[161].mxu0  ;;  %v6512_v23 = vld [vmem:[%s9409_s7 + $0x60] sm:$0xff]  }
 0x4a0   : > { %v3736_v0 = vadd.f32 %v3735_v13, %v8323_v58  ;;  %v6320_v39 = vpop.f32.mrb[162].mxu0  ;;  %v6029_v2 = vpop.f32.mrb[124].mxu1  ;;  %v6513_v58 = vld [vmem:[%s9409_s7 + $0x20] sm:$0xff]   ;;  %6111 = vmatprep.subr.bf16.mxu0 %v6512_v23  ;;  %6389 = vmatprep.subr.bf16.mxu1 %v6512_v23 }
 0x4a1   : > { %v3747_v37 = vadd.f32 %v6320_v39, %v8347_v15  ;;  %v3738_v63 = vpop.f32.mrb[163].mxu0  ;;  %v6030_v12 = vpop.f32.mrb[125].mxu1  ;;  %v3864_v15 = vmax.f32 %v3744_v40, 0.0  ;;  %6112 = vmatpush3.bf16.msra.mxu0 %v6513_v58  ;;  %6397 = vmatpush3.bf16.msra.mxu1 %v6513_v58 }
 0x4a2   : > { %v3739_v45 = vadd.f32 %v3738_v63, %v8327_v21  ;;  %v6031_v4 = vadd.f32 %v6030_v12, %v6029_v2  ;;  %v6032_v16 = vpop.f32.mrb[126].mxu1  ;;  %v3862_v21 = vmax.f32 %v3736_v0, 0.0  ;;  %6113 = vmatprep.subr.bf16.mxu0 %v6514_v42  ;;  %6390 = vmatprep.subr.bf16.mxu1 %v6514_v42 }
 0x4a3   : > { %v3865_v62 = vmax.f32 %v3747_v37, 0.0  ;;  %v6033_v6 = vpop.f32.mrb[127].mxu1 }
 0x4a4   : > { %v3863_v38 = vmax.f32 %v3739_v45, 0.0  ;;  %v6034_v19 = vadd.f32 %v6033_v6, %v6032_v16  ;;  %v8441_v20 = vadd.f32 %v6031_v4, %v3470_v10  ;;  %v6517_v45 = vld [vmem:[%s9409_s7 + $0x30] sm:$0xff]  }
 0x4a5   : > { %v3895_v47 = vpack.c.bf16 %v3865_v62, %v3864_v15  ;;  %6114 = vmatpush3.bf16.msra.mxu0 %v6515_v30  ;;  %6398 = vmatpush3.bf16.msra.mxu1 %v6515_v30  ;;  %v6518_v30 = vld [vmem:[%s9409_s7 + $0x78] sm:$0xff]  }
 0x4a6   : > { %v3894_v41 = vpack.c.bf16 %v3863_v38, %v3862_v21  ;;  %v6323_v32 = vpop.f32.mrb[164].mxu0  ;;  %v8450_v60 = vadd.f32 %v6034_v19, %v3473_v28 }
 0x4a7   : > { %v3918_v35 = vshrl.u32 %v3895_v47, 16  ;;  %v3760_v29 = vadd.f32 %v6323_v32, %v8375_v52  ;;  %v3751_v48 = vpop.f32.mrb[165].mxu0  ;;  %v3921_v13 = vshll.u32 %v3895_v47, 16 }
 0x4a8   : > { %v3911_v24 = vshrl.u32 %v3894_v41, 16  ;;  %v3752_v44 = vadd.f32 %v3751_v48, %v8357_v9  ;;  %v6324_v7 = vpop.f32.mrb[166].mxu0  ;;  %v6035_v26 = vpop.f32.mrb[128].mxu1  ;;  %v3914_v52 = vshll.u32 %v3894_v41, 16  ;;  %v6516_v9 = vld [vmem:[%s9409_s7 + $0x70] sm:$0xff]  }
 0x4a9   : > { %v3920_v40 = vrot.slane %v3918_v35, 7  ;;  %v3763_v0 = vadd.f32 %v6324_v7, %v8377_v50  ;;  %v3754_v39 = vpop.f32.mrb[167].mxu0  ;;  %v6036_v2 = vpop.f32.mrb[129].mxu1  ;;  %v3868_v63 = vmax.f32 %v3760_v29, 0.0  ;;  %6115 = vmatprep.subr.bf16.mxu0 %v6516_v9  ;;  %6391 = vmatprep.subr.bf16.mxu1 %v6516_v9  ;;  %v6519_v35 = vld [vmem:[%s9409_s7 + $0x38] sm:$0xff]  }
 0x4aa   : > { %v3913_v37 = vrot.slane %v3911_v24, 7  ;;  %v3755_v12 = vadd.f32 %v3754_v39, %v8362_v49  ;;  %v8461_v23 = vadd.f32 %v6036_v2, %v6035_v26  ;;  %v6038_v50 = vpop.f32.mrb[130].mxu1  ;;  %v3866_v49 = vmax.f32 %v3752_v44, 0.0  ;;  %6116 = vmatpush3.bf16.msra.mxu0 %v6517_v45  ;;  %6399 = vmatpush3.bf16.msra.mxu1 %v6517_v45 }
 0x4ab   : > { %v3923_v58 = vor.u32 %v3921_v13, %v3920_v40  ;;  %v8465_v10 = vsel %vm6698_vm5, %v3920_v40, 0  ;;  %v3869_v4 = vmax.f32 %v3763_v0, 0.0  ;;  %v6039_v16 = vpop.f32.mrb[131].mxu1  ;;  %v3478_v44 = vadd.f32 %v8312_v3, %v8317_v55  ;;  %6117 = vmatprep.subr.bf16.mxu0 %v6518_v30  ;;  %6392 = vmatprep.subr.bf16.mxu1 %v6518_v30 }
 0x4ac   : > { %v3916_v15 = vor.u32 %v3914_v52, %v3913_v37  ;;  %v3867_v62 = vmax.f32 %v3755_v12, 0.0  ;;  %v8467_v28 = vadd.f32 %v6039_v16, %v6038_v50  ;;  %v8471_v6 = vsel %vm6698_vm5, %v3913_v37, 0 }
 0x4ad   : > { %v8473_v21 = vpack.c.bf16 %v3869_v4, %v3868_v63  ;;  %v8477_v38 = vsel %vm6698_vm5, 0, %v3923_v58  ;;  %v4300_v32 = vrot.slane %v8465_v10, 1  ;;  %v3486_v0 = vadd.f32 %v8325_v33, %v8317_v55 }
 0x4ae   : > { %v8479_v19 = vpack.c.bf16 %v3867_v62, %v3866_v49  ;;  %v6327_v47 = vpop.f32.mrb[168].mxu0  ;;  %4486 = vrot.lane.b32.xlu1 %v8477_v38, %s6533_s17  ;;  %4424 = vrot.lane.b32.xlu0 %v8477_v38, %s6535_s20  ;;  %v4299_v41 = vrot.slane %v8477_v38, 1  ;;  %v8489_v42 = vsel %vm6698_vm5, 0, %v3916_v15  ;;  %v4099_v33 = vshrl.u32 %v8477_v38, 16 }
 0x4af   : > { %v3932_v29 = vshrl.u32 %v8473_v21, 16  ;;  %v3776_v48 = vadd.f32 %v6327_v47, %v8405_v56  ;;  %v3767_v24 = vpop.f32.mrb[169].mxu0  ;;  %v4296_v13 = vrot.slane %v8489_v42, 1  ;;  %v3489_v56 = vadd.f32 %v8329_v27, %v8317_v55  ;;  %6118 = vmatpush3.bf16.msra.mxu0 %v6519_v35  ;;  %6400 = vmatpush3.bf16.msra.mxu1 %v6519_v35 }
 0x4b0   : > { %v3768_v7 = vadd.f32 %v3767_v24, %v8387_v36  ;;  %v6328_v26 = vpop.f32.mrb[170].mxu0  ;;  %v8503_v40 = vsel %vm1132_vm7, %v4299_v41, %v4300_v32  ;;  %v6041_v39 = vpop.f32.mrb[132].mxu1  ;;  %v4297_v36 = vrot.slane %v8471_v6, 1  ;;  %v3925_v52 = vshrl.u32 %v8479_v19, 16 }
 0x4b1   : > { %v3779_v2 = vadd.f32 %v6328_v26, %v8407_v53  ;;  %v3770_v3 = vpop.f32.mrb[171].mxu0  ;;  %v6042_v37 = vpop.f32.mrb[133].mxu1  ;;  %v4101_v27 = vshll.u32 %v8477_v38, 16  ;;  %v8523_v53 = vld [vmem:[%s9409_s7 + $0x80] sm:$0xff]   ;;  %v3934_v45 = vrot.slane %v3932_v29, 7  ;;  %v3872_v50 = vmax.f32 %v3776_v48, 0.0 }
 0x4b2   : > { %v3771_v63 = vadd.f32 %v3770_v3, %v8392_v8  ;;  %4456 = vrot.lane.b32.xlu1 %v8503_v40, %s6534_s24  ;;  %4422 = vrot.lane.b32.xlu0 %v8489_v42, %s6535_s20  ;;  %v6043_v12 = vadd.f32 %v6042_v37, %v6041_v39  ;;  %v6044_v9 = vpop.f32.mrb[134].mxu1  ;;  %v3870_v4 = vmax.f32 %v3768_v7, 0.0  ;;  %v4298_v15 = vsel %vm1132_vm7, %v4296_v13, %v4297_v36 }
 0x4b3   : > { %v3873_v8 = vmax.f32 %v3779_v2, 0.0  ;;  %v6045_v58 = vpop.f32.mrb[135].mxu1  ;;  %v4103_v49 = vrot.slane %v4101_v27, 1  ;;  %6349 = vmatprep.subr.bf16.mxu0 %v8523_v53  ;;  %v4106_v41 = vshll.u32 %v8465_v10, 16  ;;  %v3639_v48 = vadd.f32 %v8461_v23, %v3478_v44 }
 0x4b4   : > { %v3871_v16 = vmax.f32 %v3771_v63, 0.0  ;;  %v6046_v62 = vadd.f32 %v6045_v58, %v6044_v9  ;;  %v3647_v32 = vadd.f32 %v6043_v12, %v3486_v0  ;;  %v3935_v24 = vshll.u32 %v8473_v21, 16 }
 0x4b5   : > { %v8527_v47 = vpack.c.bf16 %v3873_v8, %v3872_v50  ;;  %v4104_v29 = vor.u32 %v4103_v49, %v4099_v33  ;;  %v4108_v13 = vrot.slane %v4106_v41, 1  ;;  %v3481_v10 = vadd.f32 %v8319_v31, %v8317_v55 }
 0x4b6   : > { %v8530_v30 = vpack.c.bf16 %v3871_v16, %v3870_v4  ;;  %v6331_v35 = vpop.f32.mrb[172].mxu0  ;;  %4394 = vrot.lane.b32.xlu0 %v8503_v40, %s6533_s17  ;;  %4454 = vrot.lane.b32.xlu1 %v4298_v15, %s6534_s24  ;;  %v3927_v0 = vrot.slane %v3925_v52, 7  ;;  %v3650_v3 = vadd.f32 %v6046_v62, %v3489_v56  ;;  %v3937_v36 = vor.u32 %v3935_v24, %v3934_v45 }
 0x4b7   : > { %v3792_v7 = vadd.f32 %v6331_v35, %v8441_v20  ;;  %v3783_v26 = vpop.f32.mrb[173].mxu0  ;;  %v8543_v23 = vsel %vm912_vm6, %v4104_v29, %v4108_v13  ;;  %v3928_v20 = vshll.u32 %v8479_v19, 16  ;;  %v3642_v31 = vadd.f32 %v8467_v28, %v3481_v10 }
 0x4b8   : > { %v3784_v39 = vadd.f32 %v3783_v26, %v8417_v61  ;;  %v6332_v2 = vpop.f32.mrb[174].mxu0  ;;  %v6047_v37 = vpop.f32.mrb[136].mxu1  ;;  %v4089_v58 = vshll.u32 %v8489_v42, 16  ;;  %v4094_v16 = vshll.u32 %v8471_v6, 16  ;;  %v4087_v41 = vshrl.u32 %v8489_v42, 16 }
 0x4b9   : > { %v3795_v63 = vadd.f32 %v6332_v2, %v8450_v60  ;;  %v3786_v33 = vpop.f32.mrb[175].mxu0  ;;  %v6048_v21 = vpop.f32.mrb[137].mxu1  ;;  %v3876_v52 = vmax.f32 %v3792_v7, 0.0  ;;  %v3930_v27 = vor.u32 %v3928_v20, %v3927_v0  ;;  %v3494_v29 = vadd.f32 %v8331_v5, %v8317_v55 }
 0x4ba   : > { %v3787_v44 = vadd.f32 %v3786_v33, %v8426_v11  ;;  %4518 = vrot.lane.b32.xlu1 %v8543_v23, %s6535_s20  ;;  %4392 = vrot.lane.b32.xlu0 %v4298_v15, %s6533_s17  ;;  %v6049_v61 = vadd.f32 %v6048_v21, %v6047_v37  ;;  %v6050_v56 = vpop.f32.mrb[138].mxu1  ;;  %v3874_v9 = vmax.f32 %v3784_v39, 0.0  ;;  %v8555_v11 = vsel %vm6698_vm5, 0, %v3937_v36 }
 0x4bb   : > { %v3877_v60 = vmax.f32 %v3795_v63, 0.0  ;;  %v6051_v12 = vpop.f32.mrb[139].mxu1  ;;  %v8567_v15 = vsel %vm6698_vm5, %v3934_v45, 0  ;;  %v4091_v35 = vrot.slane %v4089_v58, 1  ;;  %v3497_v24 = vadd.f32 %v8333_v59, %v8317_v55 }
 0x4bc   : > { %v3875_v50 = vmax.f32 %v3787_v44, 0.0  ;;  %v6052_v8 = vadd.f32 %v6051_v12, %v6050_v56  ;;  %v4305_v13 = vrot.slane %v8555_v11, 1  ;;  %v3502_v6 = vadd.f32 %v8349_v57, %v8317_v55 }
 0x4bd   : > { %v8551_v19 = vpack.c.bf16 %v3877_v60, %v3876_v52  ;;  %v8579_v39 = vsel %vm6698_vm5, 0, %v3930_v27  ;;  %v4092_v2 = vor.u32 %v4091_v35, %v4087_v41  ;;  %v3505_v5 = vadd.f32 %v8351_v14, %v8317_v55 }
 0x4be   : > { %v8558_v4 = vpack.c.bf16 %v3875_v50, %v3874_v9  ;;  %v6335_v28 = vpop.f32.mrb[176].mxu0  ;;  %4490 = vrot.lane.b32.xlu1 %v8555_v11, %s6533_s17  ;;  %4362 = vrot.lane.b32.xlu0 %v8543_v23, %s6534_s24  ;;  %v4306_v37 = vrot.slane %v8567_v15, 1  ;;  %v8588_v57 = vsel %vm6698_vm5, %v3927_v0, 0  ;;  %v3655_v27 = vadd.f32 %v6049_v61, %v3494_v29 }
 0x4bf   : > { %v3808_v49 = vadd.f32 %v6335_v28, %v3647_v32  ;;  %v3799_v62 = vpop.f32.mrb[177].mxu0  ;;  %v3658_v50 = vadd.f32 %v6052_v8, %v3497_v24  ;;  %v4302_v58 = vrot.slane %v8579_v39, 1  ;;  %v3510_v8 = vadd.f32 %v8364_v34, %v8317_v55 }
 0x4c0   : > { %v3800_v7 = vadd.f32 %v3799_v62, %v3639_v48  ;;  %v6336_v26 = vpop.f32.mrb[178].mxu0  ;;  %v6053_v45 = vpop.f32.mrb[140].mxu1  ;;  %v4096_v48 = vrot.slane %v4094_v16, 1  ;;  %v4303_v62 = vrot.slane %v8588_v57, 1  ;;  %v3513_v24 = vadd.f32 %v8366_v17, %v8317_v55 }
 0x4c1   : > { %v3811_v10 = vadd.f32 %v6336_v26, %v3650_v3  ;;  %v3802_v32 = vpop.f32.mrb[179].mxu0  ;;  %v6054_v36 = vpop.f32.mrb[141].mxu1  ;;  %v3880_v33 = vmax.f32 %v3808_v49, 0.0  ;;  %v4123_v34 = vshrl.u32 %v8555_v11, 16 }
 0x4c2   : > { %v3803_v59 = vadd.f32 %v3802_v32, %v3642_v31  ;;  %4488 = vrot.lane.b32.xlu1 %v8579_v39, %s6533_s17  ;;  %v6055_v3 = vadd.f32 %v6054_v36, %v6053_v45  ;;  %v6056_v63 = vpop.f32.mrb[142].mxu1  ;;  %v3878_v44 = vmax.f32 %v3800_v7, 0.0  ;;  %v8591_v14 = vsel %vm912_vm6, %v4092_v2, %v4096_v48 }
 0x4c3   : > { %v3881_v20 = vmax.f32 %v3811_v10, 0.0  ;;  %v6057_v21 = vpop.f32.mrb[143].mxu1  ;;  %v8594_v31 = vsel %vm1132_vm7, %v4305_v13, %v4306_v37  ;;  %4360 = vrot.lane.b32.xlu0 %v8591_v14, %s6534_s24  ;;  %v8609_v26 = vsel %vm1132_vm7, %v4302_v58, %v4303_v62  ;;  %v4125_v45 = vshll.u32 %v8555_v11, 16 }
 0x4c4   : > { %v3879_v56 = vmax.f32 %v3803_v59, 0.0  ;;  %v6058_v52 = vadd.f32 %v6057_v21, %v6056_v63  ;;  %v3663_v0 = vadd.f32 %v6055_v3, %v3502_v6  ;;  %v3946_v10 = vshrl.u32 %v8527_v47, 16 }
 0x4c5   : > { %v8596_v60 = vpack.c.bf16 %v3881_v20, %v3880_v33  ;;  %v4127_v3 = vrot.slane %v4125_v45, 1  ;;  %v4130_v33 = vshll.u32 %v8567_v15, 16 }
 0x4c6   : > { %v8600_v12 = vpack.c.bf16 %v3879_v56, %v3878_v44  ;;  %v6339_v9 = vpop.f32.mrb[180].mxu0  ;;  %4460 = vrot.lane.b32.xlu1 %v8594_v31, %s6534_s24  ;;  %v3666_v49 = vadd.f32 %v6058_v52, %v3505_v5  ;;  %v4113_v52 = vshll.u32 %v8579_v39, 16  ;;  %v3948_v62 = vrot.slane %v3946_v10, 7 }
 0x4c7   : > { %v3824_v28 = vadd.f32 %v6339_v9, %v3663_v0  ;;  %v3815_v16 = vpop.f32.mrb[181].mxu0  ;;  %4428 = vrot.lane.b32.xlu0 %v8555_v11, %s6535_s20  ;;  %v4128_v56 = vor.u32 %v4127_v3, %v4123_v34  ;;  %v4132_v0 = vrot.slane %v4130_v33, 1 }
 0x4c8   : > { %v3816_v41 = vadd.f32 %v3815_v16, %v3655_v27  ;;  %v6340_v35 = vpop.f32.mrb[182].mxu0  ;;  %v6059_v7 = vpop.f32.mrb[144].mxu1  ;;  %v4111_v16 = vshrl.u32 %v8579_v39, 16 }
 0x4c9   : > { %v3827_v61 = vadd.f32 %v6340_v35, %v3666_v49  ;;  %v3818_v29 = vpop.f32.mrb[183].mxu0  ;;  %v6060_v13 = vpop.f32.mrb[145].mxu1  ;;  %v3884_v5 = vmax.f32 %v3824_v28, 0.0  ;;  %v4115_v49 = vrot.slane %v4113_v52, 1  ;;  %v8631_v15 = vsel %vm912_vm6, %v4128_v56, %v4132_v0 }
 0x4ca   : > { %v3819_v6 = vadd.f32 %v3818_v29, %v3658_v50  ;;  %4458 = vrot.lane.b32.xlu1 %v8609_v26, %s6534_s24  ;;  %v6061_v32 = vadd.f32 %v6060_v13, %v6059_v7  ;;  %v6062_v2 = vpop.f32.mrb[146].mxu1  ;;  %v3882_v48 = vmax.f32 %v3816_v41, 0.0  ;;  %v3939_v50 = vshrl.u32 %v8530_v30, 16 }
 0x4cb   : > { %v3885_v36 = vmax.f32 %v3827_v61, 0.0  ;;  %v6063_v59 = vpop.f32.mrb[147].mxu1  ;;  %4426 = vrot.lane.b32.xlu0 %v8579_v39, %s6535_s20  ;;  %v4118_v7 = vshll.u32 %v8588_v57, 16  ;;  %v3949_v13 = vshll.u32 %v8527_v47, 16 }
 0x4cc   : > { %v3883_v37 = vmax.f32 %v3819_v6, 0.0  ;;  %v6064_v17 = vadd.f32 %v6063_v59, %v6062_v2  ;;  %v3671_v20 = vadd.f32 %v6061_v32, %v3510_v8  ;;  %v4116_v8 = vor.u32 %v4115_v49, %v4111_v16 }
 0x4cd   : > { %v8620_v63 = vpack.c.bf16 %v3885_v36, %v3884_v5  ;;  %v4120_v10 = vrot.slane %v4118_v7, 1  ;;  %v3521_v32 = vadd.f32 %v8381_v25, %v8317_v55  ;;  %v3941_v2 = vrot.slane %v3939_v50, 7 }
 0x4ce   : > { %v8625_v21 = vpack.c.bf16 %v3883_v37, %v3882_v48  ;;  %v6343_v44 = vpop.f32.mrb[184].mxu0  ;;  %v3674_v9 = vadd.f32 %v6064_v17, %v3513_v24  ;;  %4522 = vrot.lane.b32.xlu1 %v8631_v15, %s6535_s20  ;;  %v3518_v24 = vadd.f32 %v8379_v43, %v8317_v55  ;;  %v3951_v59 = vor.u32 %v3949_v13, %v3948_v62 }
 0x4cf   : > { %v3831_v27 = vpop.f32.mrb[185].mxu0  ;;  %4398 = vrot.lane.b32.xlu0 %v8594_v31, %s6533_s17  ;;  %v8644_v34 = vsel %vm912_vm6, %v4116_v8, %v4120_v10  ;;  %v3942_v43 = vshll.u32 %v8530_v30, 16 }
 0x4d0   : > { %v3832_v58 = vadd.f32 %v3831_v27, %v3671_v20  ;;  %v6344_v28 = vpop.f32.mrb[186].mxu0  ;;  %v6065_v41 = vpop.f32.mrb[148].mxu1  ;;  %v8657_v27 = vsel %vm6698_vm5, 0, %v3951_v59  ;;  %v3534_v59 = vadd.f32 %v8409_v22, %v8317_v55 }
 0x4d1   : > { %v3834_v35 = vpop.f32.mrb[187].mxu0  ;;  %v6066_v61 = vpop.f32.mrb[149].mxu1  ;;  %v3944_v20 = vor.u32 %v3942_v43, %v3941_v2 }
 0x4d2   : > { %v3835_v29 = vadd.f32 %v3834_v35, %v3674_v9  ;;  %v6067_v6 = vadd.f32 %v6066_v61, %v6065_v41  ;;  %v6068_v45 = vpop.f32.mrb[150].mxu1  ;;  %v3886_v57 = vmax.f32 %v3832_v58, 0.0  ;;  %4520 = vrot.lane.b32.xlu1 %v8644_v34, %s6535_s20  ;;  %v4075_v41 = vsel %vm6698_vm5, %v3948_v62, 0 }
 0x4d3   : > { %v6069_v5 = vpop.f32.mrb[151].mxu1  ;;  %4396 = vrot.lane.b32.xlu0 %v8609_v26, %s6533_s17  ;;  %v8671_v7 = vsel %vm6698_vm5, 0, %v3944_v20  ;;  %v4149_v61 = vshll.u32 %v8657_v27, 16  ;;  %v4154_v20 = vshll.u32 %v4075_v41, 16 }
 0x4d4   : > { %v3887_v36 = vmax.f32 %v3835_v29, 0.0  ;;  %v6070_v48 = vadd.f32 %v6069_v5, %v6068_v45  ;;  %v3679_v37 = vadd.f32 %v6067_v6, %v3518_v24  ;;  %v4311_v24 = vrot.slane %v8657_v27, 1 }
 0x4d5   : > { %v4312_v6 = vrot.slane %v4075_v41, 1  ;;  %v4308_v45 = vrot.slane %v8671_v7, 1  ;;  %v4151_v10 = vrot.slane %v4149_v61, 1 }
 0x4d6   : > { %v8649_v47 = vpack.c.bf16 %v3887_v36, %v3886_v57  ;;  %v6347_v25 = vpop.f32.mrb[188].mxu0  ;;  %v3840_v3 = vadd.f32 %v6343_v44, %v3679_v37  ;;  %v3682_v17 = vadd.f32 %v6070_v48, %v3521_v32  ;;  %4494 = vrot.lane.b32.xlu1 %v8657_v27, %s6533_s17  ;;  %v3526_v44 = vadd.f32 %v8394_v1, %v8317_v55 }
 0x4d7   : > { %v3847_v33 = vpop.f32.mrb[189].mxu0  ;;  %4366 = vrot.lane.b32.xlu0 %v8631_v15, %s6534_s24  ;;  %v8685_v57 = vsel %vm1132_vm7, %v4311_v24, %v4312_v6  ;;  %v4137_v36 = vshll.u32 %v8671_v7, 16  ;;  %v4147_v37 = vshrl.u32 %v8657_v27, 16 }
 0x4d8   : > { %v8653_v56 = vpop.f32.mrb[190].mxu0  ;;  %v6071_v52 = vpop.f32.mrb[152].mxu1  ;;  %v3843_v0 = vadd.f32 %v6344_v28, %v3682_v17  ;;  %v3888_v16 = vmax.f32 %v3840_v3, 0.0  ;;  %v3529_v28 = vadd.f32 %v8396_v46, %v8317_v55  ;;  %v4074_v46 = vsel %vm6698_vm5, %v3941_v2, 0 }
 0x4d9   : > { %v3850_v30 = vpop.f32.mrb[191].mxu0  ;;  %v6072_v9 = vpop.f32.mrb[153].mxu1  ;;  %v4309_v48 = vrot.slane %v4074_v46, 1  ;;  %v4142_v41 = vshll.u32 %v4074_v46, 16 }
 0x4da   : > { %v6073_v50 = vadd.f32 %v6072_v9, %v6071_v52  ;;  %v6074_v58 = vpop.f32.mrb[154].mxu1  ;;  %v3889_v49 = vmax.f32 %v3843_v0, 0.0  ;;  %4492 = vrot.lane.b32.xlu1 %v8671_v7, %s6533_s17  ;;  %v3537_v52 = vadd.f32 %v8411_v51, %v8317_v55  ;;  %v3960_v0 = vshrl.u32 %v8551_v19, 16 }
 0x4db   : > { %v6075_v35 = vpop.f32.mrb[155].mxu1  ;;  %4364 = vrot.lane.b32.xlu0 %v8644_v34, %s6534_s24  ;;  %v8699_v22 = vsel %vm1132_vm7, %v4308_v45, %v4309_v48  ;;  %v4152_v9 = vor.u32 %v4151_v10, %v4147_v37  ;;  %v4135_v55 = vshrl.u32 %v8671_v7, 16  ;;  %v4144_v46 = vrot.slane %v4142_v41, 1 }
 0x4dc   : > { %v6076_v29 = vadd.f32 %v6075_v35, %v6074_v58  ;;  %v8674_v8 = vpack.c.bf16 %v3889_v49, %v3888_v16  ;;  %v3687_v1 = vadd.f32 %v6073_v50, %v3526_v44  ;;  %v4139_v16 = vrot.slane %v4137_v36, 1 }
 0x4dd   : > { %v3953_v35 = vshrl.u32 %v8558_v4, 16  ;;  %v3962_v61 = vrot.slane %v3960_v0, 7 }
 0x4de   : > { %v3848_v62 = vadd.f32 %v3847_v33, %v3687_v1  ;;  %v3690_v13 = vadd.f32 %v6076_v29, %v3529_v28  ;;  %4464 = vrot.lane.b32.xlu1 %v8685_v57, %s6534_s24  ;;  %v4156_v28 = vrot.slane %v4154_v20, 1  ;;  %v4140_v24 = vor.u32 %v4139_v16, %v4135_v55 }
 0x4df   : > { %4432 = vrot.lane.b32.xlu0 %v8657_v27, %s6535_s20  ;;  %v3955_v45 = vrot.slane %v3953_v35, 7  ;;  %v4077_v36 = vsel %vm6698_vm5, %v3962_v61, 0 }
 0x4e0   : > { %v6077_v32 = vpop.f32.mrb[156].mxu1  ;;  %v3851_v5 = vadd.f32 %v3850_v30, %v3690_v13  ;;  %v3890_v17 = vmax.f32 %v3848_v62, 0.0  ;;  %v8711_v1 = vsel %vm912_vm6, %v4152_v9, %v4156_v28  ;;  %v4318_v48 = vrot.slane %v4077_v36, 1 }
 0x4e1   : > { %v6078_v2 = vpop.f32.mrb[157].mxu1  ;;  %v4076_v37 = vsel %vm6698_vm5, %v3955_v45, 0  ;;  %v4178_v0 = vshll.u32 %v4077_v36, 16  ;;  %v3967_v28 = vshrl.u32 %v8600_v12, 16 }
 0x4e2   : > { %v6079_v43 = vadd.f32 %v6078_v2, %v6077_v32  ;;  %v6080_v3 = vpop.f32.mrb[158].mxu1  ;;  %v3891_v33 = vmax.f32 %v3851_v5, 0.0  ;;  %4462 = vrot.lane.b32.xlu1 %v8699_v22, %s6534_s24  ;;  %v3956_v32 = vshll.u32 %v8558_v4, 16  ;;  %v4315_v20 = vrot.slane %v4076_v37, 1 }
 0x4e3   : > { %v6081_v30 = vpop.f32.mrb[159].mxu1  ;;  %4430 = vrot.lane.b32.xlu0 %v8671_v7, %s6535_s20  ;;  %v4180_v16 = vrot.slane %v4178_v0, 1 }
 0x4e4   : > { %v6082_v44 = vadd.f32 %v6081_v30, %v6080_v3  ;;  %v3695_v50 = vadd.f32 %v6079_v43, %v3534_v59  ;;  %v8701_v58 = vpack.c.bf16 %v3891_v33, %v3890_v17  ;;  %v3958_v5 = vor.u32 %v3956_v32, %v3955_v45 }
 0x4e5   : > { %v3974_v30 = vshrl.u32 %v8596_v60, 16 }
 0x4e6   : > { %v3856_v51 = vadd.f32 %v6347_v25, %v3695_v50  ;;  %v3698_v49 = vadd.f32 %v6082_v44, %v3537_v52  ;;  %4526 = vrot.lane.b32.xlu1 %v8711_v1, %s6535_s20  ;;  %v3963_v25 = vshll.u32 %v8551_v19, 16  ;;  %v8740_v59 = vsel %vm6698_vm5, 0, %v3958_v5 }
 0x4e7   : > { %4402 = vrot.lane.b32.xlu0 %v8685_v57, %s6533_s17  ;;  %v4314_v3 = vrot.slane %v8740_v59, 1  ;;  %v4161_v33 = vshll.u32 %v8740_v59, 16  ;;  %v4159_v55 = vshrl.u32 %v8740_v59, 16 }
 0x4e8   : > { %v3859_v29 = vadd.f32 %v8653_v56, %v3698_v49  ;;  %v3892_v62 = vmax.f32 %v3856_v51, 0.0  ;;  %v3965_v6 = vor.u32 %v3963_v25, %v3962_v61  ;;  %v8721_v56 = vsel %vm912_vm6, %v4140_v24, %v4144_v46 }
 0x4e9   : > { %v8762_v9 = vsel %vm1132_vm7, %v4314_v3, %v4315_v20  ;;  %v4163_v50 = vrot.slane %v4161_v33, 1  ;;  %v4166_v51 = vshll.u32 %v4076_v37, 16  ;;  %v3976_v49 = vrot.slane %v3974_v30, 7  ;;  %v4359_v20 = vpop.permute.xlu0 %4358 }
 0x4ea   : > { %v3893_v13 = vmax.f32 %v3859_v29, 0.0  ;;  %4524 = vrot.lane.b32.xlu1 %v8721_v56, %s6535_s20  ;;  %v8730_v19 = vsel %vm6698_vm5, 0, %v3965_v6  ;;  %v3977_v61 = vshll.u32 %v8596_v60, 16  ;;  %v3969_v25 = vrot.slane %v3967_v28, 7 }
 0x4eb   : > { %4400 = vrot.lane.b32.xlu0 %v8699_v22, %s6533_s17  ;;  %v4317_v4 = vrot.slane %v8730_v19, 1  ;;  %v4173_v2 = vshll.u32 %v8730_v19, 16  ;;  %v4171_v52 = vshrl.u32 %v8730_v19, 16  ;;  %v4164_v35 = vor.u32 %v4163_v50, %v4159_v55 }
 0x4ec   : > { %v8718_v10 = vpack.c.bf16 %v3893_v13, %v3892_v62  ;;  %v4168_v29 = vrot.slane %v4166_v51, 1  ;;  %v3979_v24 = vor.u32 %v3977_v61, %v3976_v49  ;;  %v3970_v13 = vshll.u32 %v8600_v12, 16 }
 0x4ed   : > { %v8751_v43 = vsel %vm1132_vm7, %v4317_v4, %v4318_v48  ;;  %v4175_v17 = vrot.slane %v4173_v2, 1  ;;  %v4079_v60 = vsel %vm6698_vm5, %v3976_v49, 0  ;;  %v4078_v36 = vsel %vm6698_vm5, %v3969_v25, 0  ;;  %v4391_v61 = vpop.permute.xlu0 %4390 }
 0x4ee   : > { %4498 = vrot.lane.b32.xlu1 %v8730_v19, %s6533_s17  ;;  %v8779_v62 = vsel %vm912_vm6, %v4164_v35, %v4168_v29  ;;  %v3972_v46 = vor.u32 %v3970_v13, %v3969_v25  ;;  %v8788_v6 = vsel %vm6698_vm5, 0, %v3979_v24  ;;  %v4324_v5 = vrot.slane %v4079_v60, 1 }
 0x4ef   : > { %4370 = vrot.lane.b32.xlu0 %v8711_v1, %s6534_s24  ;;  %v4176_v44 = vor.u32 %v4175_v17, %v4171_v52  ;;  %v4323_v12 = vrot.slane %v8788_v6, 1  ;;  %v4197_v32 = vshll.u32 %v8788_v6, 16  ;;  %v4321_v3 = vrot.slane %v4078_v36, 1 }
 0x4f0   : > { %v8798_v45 = vsel %vm6698_vm5, 0, %v3972_v46  ;;  %v4195_v17 = vshrl.u32 %v8788_v6, 16  ;;  %v4202_v33 = vshll.u32 %v4079_v60, 16  ;;  %v3988_v52 = vshrl.u32 %v8620_v63, 16 }
 0x4f1   : > { %v8771_v41 = vsel %vm912_vm6, %v4176_v44, %v4180_v16  ;;  %v8809_v4 = vsel %vm1132_vm7, %v4323_v12, %v4324_v5  ;;  %v4320_v2 = vrot.slane %v8798_v45, 1  ;;  %v4199_v48 = vrot.slane %v4197_v32, 1 }
 0x4f2   : > { %4496 = vrot.lane.b32.xlu1 %v8740_v59, %s6533_s17  ;;  %v4185_v37 = vshll.u32 %v8798_v45, 16  ;;  %v4204_v50 = vrot.slane %v4202_v33, 1  ;;  %v4183_v16 = vshrl.u32 %v8798_v45, 16  ;;  %v4190_v55 = vshll.u32 %v4078_v36, 16 }
 0x4f3   : > { %4368 = vrot.lane.b32.xlu0 %v8721_v56, %s6534_s24  ;;  %v8820_v0 = vsel %vm1132_vm7, %v4320_v2, %v4321_v3  ;;  %v4200_v30 = vor.u32 %v4199_v48, %v4195_v17  ;;  %v3990_v51 = vrot.slane %v3988_v52, 7  ;;  %v3981_v49 = vshrl.u32 %v8625_v21, 16 }
 0x4f4   : > { %v4187_v44 = vrot.slane %v4185_v37, 1  ;;  %v3991_v29 = vshll.u32 %v8620_v63, 16  ;;  %v4192_v24 = vrot.slane %v4190_v55, 1  ;;  %v3984_v60 = vshll.u32 %v8625_v21, 16 }
 0x4f5   : > { %v8829_v28 = vsel %vm912_vm6, %v4200_v30, %v4204_v50  ;;  %v3983_v13 = vrot.slane %v3981_v49, 7  ;;  %v4081_v36 = vsel %vm6698_vm5, %v3990_v51, 0  ;;  %v4552_v52 = vsel %vm4550_vm10, 0, %v4359_v20 }
 0x4f6   : > { %4468 = vrot.lane.b32.xlu1 %v8751_v43, %s6534_s24  ;;  %v4188_v35 = vor.u32 %v4187_v44, %v4183_v16  ;;  %v3993_v25 = vor.u32 %v3991_v29, %v3990_v51  ;;  %v4330_v17 = vrot.slane %v4081_v36, 1  ;;  %v4584_v20 = vsel %vm1295_vm8, %v4552_v52, %v4391_v61 }
 0x4f7   : > { %4436 = vrot.lane.b32.xlu0 %v8730_v19, %s6535_s20  ;;  %v3986_v5 = vor.u32 %v3984_v60, %v3983_v13  ;;  %v4080_v33 = vsel %vm6698_vm5, %v3983_v13, 0 }
 0x4f8   : > { %v8837_v46 = vsel %vm912_vm6, %v4188_v35, %v4192_v24  ;;  %v8848_v63 = vsel %vm6698_vm5, 0, %v3993_v25  ;;  %v4327_v35 = vrot.slane %v4080_v33, 1  ;;  %v4226_v24 = vshll.u32 %v4081_v36, 16  ;;  %v6521_v36 = vld [vmem:[%s9409_s7 + $0x88] sm:$0xff]  }
 0x4f9   : > { %9459 = vst [vmem:[#allocation5_spill] sm:$0xff] %v8848_v63  ;;  %v8860_v48 = vsel %vm6698_vm5, 0, %v3986_v5  ;;  %v4329_v37 = vrot.slane %v8848_v63, 1  ;;  %v4221_v3 = vshll.u32 %v8848_v63, 16  ;;  %v4219_v29 = vshrl.u32 %v8848_v63, 16 }
 0x4fa   : > { %4466 = vrot.lane.b32.xlu1 %v8762_v9, %s6534_s24  ;;  %v4326_v50 = vrot.slane %v8860_v48, 1  ;;  %v4209_v49 = vshll.u32 %v8860_v48, 16  ;;  %v4002_v25 = vshrl.u32 %v8674_v8, 16  ;;  %v4207_v52 = vshrl.u32 %v8860_v48, 16 }
 0x4fb   : > { %4434 = vrot.lane.b32.xlu0 %v8740_v59, %s6535_s20  ;;  %v8875_v16 = vsel %vm1132_vm7, %v4329_v37, %v4330_v17  ;;  %v4223_v51 = vrot.slane %v4221_v3, 1 }
 0x4fc   : > { %v8891_v5 = vsel %vm1132_vm7, %v4326_v50, %v4327_v35  ;;  %v4211_v3 = vrot.slane %v4209_v49, 1 }
 0x4fd   : > { %v4224_v37 = vor.u32 %v4223_v51, %v4219_v29  ;;  %v3995_v51 = vshrl.u32 %v8649_v47, 16 }
 0x4fe   : > { %4530 = vrot.lane.b32.xlu1 %v8771_v41, %s6535_s20 }
 0x4ff   : > { %4406 = vrot.lane.b32.xlu0 %v8751_v43, %s6533_s17  ;;  %v3997_v29 = vrot.slane %v3995_v51, 7 }
 0x502   : > { %4528 = vrot.lane.b32.xlu1 %v8779_v62, %s6535_s20 }
 0x503   : > { %4404 = vrot.lane.b32.xlu0 %v8762_v9, %s6533_s17 }
 0x506   : > { %4502 = vrot.lane.b32.xlu1 %v8788_v6, %s6533_s17 }
 0x507   : > { %4374 = vrot.lane.b32.xlu0 %v8771_v41, %s6534_s24 }
 0x50a   : > { %4500 = vrot.lane.b32.xlu1 %v8798_v45, %s6533_s17 }
 0x50b   : > { %4372 = vrot.lane.b32.xlu0 %v8779_v62, %s6534_s24 }
 0x50e   : > { %4472 = vrot.lane.b32.xlu1 %v8809_v4, %s6534_s24 }
 0x50f   : > { %4440 = vrot.lane.b32.xlu0 %v8788_v6, %s6535_s20 }
 0x512   : > { %4470 = vrot.lane.b32.xlu1 %v8820_v0, %s6534_s24 }
 0x513   : > { %4438 = vrot.lane.b32.xlu0 %v8798_v45, %s6535_s20 }
 0x516   : > { %4534 = vrot.lane.b32.xlu1 %v8829_v28, %s6535_s20 }
 0x517   : > { %4410 = vrot.lane.b32.xlu0 %v8809_v4, %s6533_s17 }
 0x51a   : > { %4532 = vrot.lane.b32.xlu1 %v8837_v46, %s6535_s20 }
 0x51b   : > { %4408 = vrot.lane.b32.xlu0 %v8820_v0, %s6533_s17 }
 0x51e   : > { %4506 = vrot.lane.b32.xlu1 %v8848_v63, %s6533_s17 }
 0x51f   : > { %4378 = vrot.lane.b32.xlu0 %v8829_v28, %s6534_s24 }
 0x520   : > { %v4487_v12 = vpop.permute.xlu1 %4486  ;;  %v8844_v32 = vpop.permute.xlu0 %4424 }
 0x522   : > { %4504 = vrot.lane.b32.xlu1 %v8860_v48, %s6533_s17 }
 0x523   : > { %4376 = vrot.lane.b32.xlu0 %v8837_v46, %s6534_s24 }
 0x524   : > { %v8856_v2 = vpop.permute.xlu1 %4456  ;;  %v4423_v21 = vpop.permute.xlu0 %4422 }
 0x525   : > { %v4617_v17 = vsel %vm4615_vm11, %v4584_v20, %v4423_v21  ;;  %v4212_v20 = vor.u32 %v4211_v3, %v4207_v52  ;;  %v4082_v52 = vsel %vm6698_vm5, %v3997_v29, 0 }
 0x526   : > { %4476 = vrot.lane.b32.xlu1 %v8875_v16, %s6534_s24 }
 0x527   : > { %4444 = vrot.lane.b32.xlu0 %v8848_v63, %s6535_s20 }
 0x528   : > { %v8871_v30 = vpop.permute.xlu0 %4394  ;;  %v4455_v44 = vpop.permute.xlu1 %4454 }
 0x529   : > { %v4666_v55 = vsel %vm4550_vm10, %v8591_v14, %v4455_v44  ;;  %v4214_v44 = vshll.u32 %v4080_v33, 16 }
 0x52a   : > { %v4713_v14 = vsel %vm1295_vm8, %v4666_v55, %v4487_v12  ;;  %4474 = vrot.lane.b32.xlu1 %v8891_v5, %s6534_s24  ;;  %v4228_v12 = vrot.slane %v4226_v24, 1  ;;  %v4004_v55 = vrot.slane %v4002_v25, 7  ;;  %v3998_v25 = vshll.u32 %v8649_v47, 16 }
 0x52b   : > { %4442 = vrot.lane.b32.xlu0 %v8860_v48, %s6535_s20  ;;  %v4216_v33 = vrot.slane %v4214_v44, 1 }
 0x52c   : > { %v4519_v13 = vpop.permute.xlu1 %4518  ;;  %v8887_v60 = vpop.permute.xlu0 %4392  ;;  %v8910_v21 = vsel %vm912_vm6, %v4224_v37, %v4228_v12 }
 0x52d   : > { %v4745_v61 = vsel %vm4615_vm11, %v4713_v14, %v4519_v13  ;;  %v8920_v24 = vsel %vm912_vm6, %v4212_v20, %v4216_v33  ;;  %v4000_v14 = vor.u32 %v3998_v25, %v3997_v29 }
 0x52e   : > { %5022 = vmatprep.mubr.bf16.mxu0 %v4745_v61  ;;  %4538 = vrot.lane.b32.xlu1 %v8910_v21, %s6535_s20 }
 0x52f   : > { %5023 = vmatmul.mubr.bf16.vlgmr.msra.gmra.mrb[192].mxu0 %v4617_v17  ;;  %4414 = vrot.lane.b32.xlu0 %v8875_v16, %s6533_s17  ;;  %v8947_v61 = vsel %vm6698_vm5, 0, %v4000_v14  ;;  %v4016_v14 = vshrl.u32 %v8718_v10, 16 }
 0x530   : > { %v8903_v50 = vpop.permute.xlu1 %4490  ;;  %6350 = vmatpush3.bf16.msra.mxu0 %v8523_v53  ;;  %6353 = vmatprep.mubr.msk.bf16.mxu0 %vm4550_vm10, %v8503_v40  ;;  %v8914_v49 = vpop.permute.xlu0 %4362  ;;  %v4005_v53 = vshll.u32 %v8674_v8, 16  ;;  %v4233_v20 = vshll.u32 %v8947_v61, 16 }
 0x531   : > { %6351 = vmatprep.subr.bf16.mxu0 %v6521_v36 }
 0x532   : > { %v4007_v35 = vor.u32 %v4005_v53, %v4004_v55  ;;  %4536 = vrot.lane.b32.xlu1 %v8920_v24, %s6535_s20  ;;  %v4009_v53 = vshrl.u32 %v8701_v58, 16 }
 0x533   : > { %4412 = vrot.lane.b32.xlu0 %v8891_v5, %s6533_s17 }
 0x534   : > { %v4489_v40 = vpop.permute.xlu1 %4488  ;;  %6352 = vmatpush3.bf16.msra.mxu0 %v6521_v36  ;;  %v8935_v37 = vsel %vm6698_vm5, 0, %v4007_v35 }
 0x535   : > { %v4361_v13 = vpop.permute.xlu0 %4360  ;;  %9460 = vst [vmem:[#allocation7_spill] sm:$0xff] %v8935_v37  ;;  %v4245_v3 = vshll.u32 %v8935_v37, 16  ;;  %v4243_v35 = vshrl.u32 %v8935_v37, 16 }
 0x536   : > { %4510 = vrot.lane.b32.xlu1 %v8935_v37, %s6533_s17  ;;  %v4554_v29 = vsel %vm4550_vm10, %v8489_v42, %v4361_v13  ;;  %v4669_v42 = vsel %vm4550_vm10, %v8543_v23, %v8856_v2  ;;  %v4018_v23 = vrot.slane %v4016_v14, 7 }
 0x537   : > { %6354 = vmatmul.mubr.msk.bf16.vlgmr.msra.gmra.mrb[196].mxu0 %vm4550_vm10, %v8609_v26  ;;  %4382 = vrot.lane.b32.xlu0 %v8910_v21, %s6534_s24  ;;  %v4083_v26 = vsel %vm6698_vm5, %v4004_v55, 0  ;;  %v4332_v55 = vrot.slane %v8947_v61, 1  ;;  %v4247_v51 = vrot.slane %v4245_v3, 1  ;;  %v4586_v13 = vsel %vm1295_vm8, %v4554_v29, %v8887_v60 }
 0x538   : > { %v8929_v8 = vpop.permute.xlu1 %4460  ;;  %6357 = vmatprep.mubr.msk.bf16.mxu0 %vm4550_vm10, %v8594_v31  ;;  %v4335_v31 = vrot.slane %v8935_v37, 1  ;;  %v4336_v12 = vrot.slane %v4083_v26, 1 }
 0x539   : > { %v8941_v47 = vpop.permute.xlu0 %4428  ;;  %v4248_v3 = vor.u32 %v4247_v51, %v4243_v35  ;;  %v4238_v51 = vshll.u32 %v4082_v52, 16 }
 0x53a   : > { %4508 = vrot.lane.b32.xlu1 %v8947_v61, %s6533_s17  ;;  %v8964_v44 = vsel %vm1132_vm7, %v4335_v31, %v4336_v12  ;;  %v4235_v12 = vrot.slane %v4233_v20, 1  ;;  %v4012_v20 = vshll.u32 %v8701_v58, 16  ;;  %v4620_v58 = vsel %vm4615_vm11, %v4586_v13, %v8844_v32 }
 0x53b   : > { %4380 = vrot.lane.b32.xlu0 %v8920_v24, %s6534_s24 }
 0x53c   : > { %v4459_v36 = vpop.permute.xlu1 %4458 }
 0x53d   : > { %v8955_v17 = vpop.permute.xlu0 %4426 }
 0x53e   : > { %4480 = vrot.lane.b32.xlu1 %v8964_v44, %s6534_s24 }
 0x53f   : > { %6358 = vmatmul.mubr.msk.bf16.gmra.mrb[200].mxu0 %vm4550_vm10, %v8699_v22  ;;  %4448 = vrot.lane.b32.xlu0 %v8935_v37, %s6535_s20  ;;  %v4250_v22 = vshll.u32 %v4083_v26, 16  ;;  %v4011_v26 = vrot.slane %v4009_v53, 7  ;;  %v4231_v37 = vshrl.u32 %v8947_v61, 16  ;;  %v4715_v53 = vsel %vm1295_vm8, %v4669_v42, %v4489_v40 }
 0x540   : > { %6361 = vmatprep.mubr.msk.bf16.mxu0 %vm4550_vm10, %v8685_v57  ;;  %v4333_v57 = vrot.slane %v4082_v52, 1  ;;  %v4523_v25 = vpop.permute.xlu1 %4522  ;;  %v4240_v52 = vrot.slane %v4238_v51, 1 }
 0x541   : > { %v8973_v33 = vpop.permute.xlu0 %4398  ;;  %v4252_v63 = vrot.slane %v4250_v22, 1  ;;  %v4236_v60 = vor.u32 %v4235_v12, %v4231_v37 }
 0x542   : > { %v8980_v31 = vsel %vm1132_vm7, %v4332_v55, %v4333_v57  ;;  %v4672_v55 = vsel %vm4550_vm10, %v8644_v34, %v4459_v36 }
 0x543   : > { %4446 = vrot.lane.b32.xlu0 %v8947_v61, %s6535_s20  ;;  %4478 = vrot.lane.b32.xlu1 %v8980_v31, %s6534_s24  ;;  %v9003_v2 = vsel %vm912_vm6, %v4248_v3, %v4252_v63  ;;  %v4019_v63 = vshll.u32 %v8718_v10, 16  ;;  %v9021_v29 = vsel %vm912_vm6, %v4236_v60, %v4240_v52  ;;  %v4556_v10 = vsel %vm4550_vm10, %v8477_v38, %v8914_v49 }
 0x544   : > { %v4521_v22 = vpop.permute.xlu1 %4520  ;;  %v4588_v38 = vsel %vm1295_vm8, %v4556_v10, %v8871_v30  ;;  %v4084_v3 = vsel %vm6698_vm5, %v4011_v26, 0 }
 0x545   : > { %v8994_v57 = vpop.permute.xlu0 %4396  ;;  %v4748_v34 = vsel %vm4615_vm11, %v4715_v53, %v4521_v22  ;;  %v4021_v35 = vor.u32 %v4019_v63, %v4018_v23  ;;  %v4262_v51 = vshll.u32 %v4084_v3, 16 }
 0x546   : > { %5030 = vmatprep.mubr.bf16.mxu1 %v4748_v34 }
 0x547   : > { %6362 = vmatmul.mubr.msk.bf16.gmra.mrb[204].mxu0 %vm4550_vm10, %v8762_v9  ;;  %4416 = vrot.lane.b32.xlu0 %v8980_v31, %s6533_s17  ;;  %v4014_v9 = vor.u32 %v4012_v20, %v4011_v26  ;;  %v9040_v14 = vsel %vm6698_vm5, 0, %v4021_v35  ;;  %v4085_v20 = vsel %vm6698_vm5, %v4018_v23, 0 }
 0x548   : > { %6365 = vmatprep.mubr.msk.bf16.mxu0 %vm4550_vm10, %v8751_v43  ;;  %4542 = vrot.lane.b32.xlu1 %v9003_v2, %s6535_s20  ;;  %v4717_v43 = vsel %vm1295_vm8, %v4672_v55, %v8903_v50  ;;  %v9018_v37 = vpop.permute.xlu1 %4494  ;;  %v4344_v13 = vshll.u32 %v9040_v14, 16  ;;  %v4339_v55 = vrot.slane %v4084_v3, 1  ;;  %v4349_v18 = vshll.u32 %v4085_v20, 16 }
 0x549   : > { %5031 = vmatmul.mubr.bf16.vlgmr.msra.gmra.mrb[160].mxu1 %v4620_v58  ;;  %v4751_v40 = vsel %vm4615_vm11, %v4717_v43, %v4523_v25  ;;  %v9016_v36 = vpop.permute.xlu0 %4366  ;;  %v9032_v32 = vsel %vm6698_vm5, 0, %v4014_v9  ;;  %v4264_v9 = vrot.slane %v4262_v51, 1  ;;  %v4342_v58 = vshrl.u32 %v9040_v14, 16 }
 0x54a   : > { %5038 = vmatprep.mubr.bf16.mxu1 %v4751_v40  ;;  %v4257_v49 = vshll.u32 %v9032_v32, 16  ;;  %v4338_v30 = vrot.slane %v9032_v32, 1  ;;  %v4255_v26 = vshrl.u32 %v9032_v32, 16  ;;  %v4346_v60 = vrot.slane %v4344_v13, 1 }
 0x54b   : > { %4386 = vrot.lane.b32.xlu0 %v9003_v2, %s6534_s24  ;;  %v4675_v40 = vsel %vm4550_vm10, %v8631_v15, %v8929_v8  ;;  %v4351_v10 = vrot.slane %v4349_v18, 1  ;;  %v9461_v13 = vmov 0  }
 0x54c   : > { %4540 = vrot.lane.b32.xlu1 %v9021_v29, %s6535_s20  ;;  %v4493_v25 = vpop.permute.xlu1 %4492  ;;  %v4259_v42 = vrot.slane %v4257_v49, 1  ;;  %v4340_v22 = vsel %vm1132_vm7, %v4338_v30, %v4339_v55  ;;  %v4347_v63 = vor.u32 %v4346_v60, %v4342_v58  ;;  %v4560_v30 = vsel %vm4550_vm10, %v8555_v11, %v9016_v36 }
 0x54d   : > { %v4365_v50 = vpop.permute.xlu0 %4364 }
 0x54e   : > { %v4260_v34 = vor.u32 %v4259_v42, %v4255_v26  ;;  %v4558_v23 = vsel %vm4550_vm10, %v8579_v39, %v4365_v50  ;;  %v4719_v50 = vsel %vm1295_vm8, %v4675_v40, %v4493_v25  ;;  %v9098_v49 = vsel %vm912_vm6, %v4347_v63, %v4351_v10 }
 0x54f   : > { %6366 = vmatmul.mubr.msk.bf16.gmra.mrb[208].mxu0 %vm4550_vm10, %v8820_v0  ;;  %4384 = vrot.lane.b32.xlu0 %v9021_v29, %s6534_s24  ;;  %v4623_v0 = vsel %vm4615_vm11, %v4588_v38, %v8955_v17  ;;  %v4590_v39 = vsel %vm1295_vm8, %v4558_v23, %v8994_v57  ;;  %v4356_v25 = vrot.slane %v4085_v20, 1  ;;  %v4592_v42 = vsel %vm1295_vm8, %v4560_v30, %v8973_v33 }
 0x550   : > { %6369 = vmatprep.mubr.msk.bf16.mxu0 %vm4550_vm10, %v8809_v4  ;;  %4514 = vrot.lane.b32.xlu1 %v9040_v14, %s6533_s17  ;;  %v9055_v12 = vpop.permute.xlu1 %4464  ;;  %v4626_v8 = vsel %vm4615_vm11, %v4590_v39, %v8941_v47 }
 0x551   : > { %5039 = vmatmul.mubr.bf16.gmra.mrb[164].mxu1 %v4623_v0  ;;  %v9051_v4 = vpop.permute.xlu0 %4432 }
 0x553   : > { %4418 = vrot.lane.b32.xlu0 %v8964_v44, %s6533_s17 }
 0x554   : > { %4512 = vrot.lane.b32.xlu1 %v9032_v32, %s6533_s17  ;;  %v4463_v53 = vpop.permute.xlu1 %4462 }
 0x555   : > { %v4431_v17 = vpop.permute.xlu0 %4430  ;;  %v4678_v52 = vsel %vm4550_vm10, %v8721_v56, %v4463_v53  ;;  %v4355_v56 = vrot.slane %v9040_v14, 1 }
 0x557   : > { %6370 = vmatmul.mubr.msk.bf16.gmra.mrb[212].mxu0 %vm4550_vm10, %v8891_v5  ;;  %4450 = vrot.lane.b32.xlu0 %v9032_v32, %s6535_s20  ;;  %v4357_v3 = vsel %vm1132_vm7, %v4355_v56, %v4356_v25 }
 0x558   : > { %6373 = vmatprep.mubr.msk.bf16.mxu0 %vm4550_vm10, %v8875_v16  ;;  %4482 = vrot.lane.b32.xlu1 %v4340_v22, %s6534_s24  ;;  %v4527_v43 = vpop.permute.xlu1 %4526  ;;  %v9080_v16 = vsel %vm912_vm6, %v4260_v34, %v4264_v9 }
 0x559   : > { %v9074_v5 = vpop.permute.xlu0 %4402 }
 0x55b   : > { %4420 = vrot.lane.b32.xlu0 %v4340_v22, %s6533_s17 }
 0x55c   : > { %4544 = vrot.lane.b32.xlu1 %v9080_v16, %s6535_s20  ;;  %v4525_v38 = vpop.permute.xlu1 %4524 }
 0x55d   : > { %v4401_v35 = vpop.permute.xlu0 %4400  ;;  %v4754_v15 = vsel %vm4615_vm11, %v4719_v50, %v4525_v38 }
 0x55e   : > { %5046 = vmatprep.mubr.bf16.mxu1 %v4754_v15 }
 0x55f   : > { %6374 = vmatmul.mubr.msk.bf16.gmra.mrb[216].mxu0 %vm4550_vm10, %v8980_v31  ;;  %4388 = vrot.lane.b32.xlu0 %v9080_v16, %s6534_s24 }
 0x560   : > { %6377 = vmatprep.mubr.msk.bf16.mxu0 %vm4550_vm10, %v8964_v44  ;;  %4546 = vrot.lane.b32.xlu1 %v9098_v49, %s6535_s20  ;;  %v4721_v44 = vsel %vm1295_vm8, %v4678_v52, %v9018_v37  ;;  %v4499_v0 = vpop.permute.xlu1 %4498 }
 0x561   : > { %5047 = vmatmul.mubr.bf16.gmra.mrb[168].mxu1 %v4626_v8  ;;  %v4757_v31 = vsel %vm4615_vm11, %v4721_v44, %v4527_v43  ;;  %v4371_v57 = vpop.permute.xlu0 %4370 }
 0x562   : > { %5054 = vmatprep.mubr.bf16.mxu1 %v4757_v31 }
 0x563   : > { %4452 = vrot.lane.b32.xlu0 %v9040_v14, %s6535_s20  ;;  %v4629_v14 = vsel %vm4615_vm11, %v4592_v42, %v4431_v17  ;;  %v4681_v17 = vsel %vm4550_vm10, %v8711_v1, %v9055_v12 }
 0x564   : > { %4484 = vrot.lane.b32.xlu1 %v4357_v3, %s6534_s24  ;;  %v4497_v37 = vpop.permute.xlu1 %4496 }
 0x565   : > { %v4369_v47 = vpop.permute.xlu0 %4368  ;;  %v4723_v60 = vsel %vm1295_vm8, %v4681_v17, %v4497_v37 }
 0x566   : > { %v4562_v33 = vsel %vm4550_vm10, %v8671_v7, %v4369_v47 }
 0x567   : > { %6378 = vmatmul.mubr.msk.bf16.gmra.mrb[220].mxu0 %vm4550_vm10, %v4340_v22  ;;  %v4594_v34 = vsel %vm1295_vm8, %v4562_v33, %v4401_v35 }
 0x568   : > { %6381 = vmatprep.mubr.msk.bf16.mxu0 %vm4550_vm10, %v4357_v3  ;;  %4516 = vrot.lane.b32.xlu1 %v9461_v13, %s6533_s17  ;;  %v4469_v26 = vpop.permute.xlu1 %4468  ;;  %v4632_v7 = vsel %vm4615_vm11, %v4594_v34, %v9051_v4 }
 0x569   : > { %5055 = vmatmul.mubr.bf16.gmra.mrb[172].mxu1 %v4629_v14  ;;  %v4437_v55 = vpop.permute.xlu0 %4436 }
 0x56c   : > { %4548 = vrot.lane.b32.xlu1 %v9444_v54, %s6535_s20  ;;  %v4467_v36 = vpop.permute.xlu1 %4466 }
 0x56d   : > { %v4435_v11 = vpop.permute.xlu0 %4434  ;;  %v4684_v53 = vsel %vm4550_vm10, %v8779_v62, %v4467_v36  ;;  %v4564_v62 = vsel %vm4550_vm10, %v8657_v27, %v4371_v57  ;;  %v4687_v27 = vsel %vm4550_vm10, %v8771_v41, %v4469_v26 }
 0x56e   : > { %v4725_v58 = vsel %vm1295_vm8, %v4684_v53, %v4499_v0  ;;  %v4596_v63 = vsel %vm1295_vm8, %v4564_v62, %v9074_v5 }
 0x56f   : > { %6382 = vmatmul.mubr.msk.bf16.gmra.mrb[224].mxu0 %vm4550_vm10, %v9444_v54  ;;  %v4635_v40 = vsel %vm4615_vm11, %v4596_v63, %v4435_v11 }
 0x570   : > { %v4531_v20 = vpop.permute.xlu1 %4530 }
 0x571   : > { %v4407_v51 = vpop.permute.xlu0 %4406  ;;  %v4763_v1 = vsel %vm4615_vm11, %v4725_v58, %v4531_v20 }
 0x574   : > { %v4529_v9 = vpop.permute.xlu1 %4528 }
 0x575   : > { %v4405_v22 = vpop.permute.xlu0 %4404  ;;  %v4760_v54 = vsel %vm4615_vm11, %v4723_v60, %v4529_v9 }
 0x576   : > { %5062 = vmatprep.mubr.bf16.mxu1 %v4760_v54 }
 0x577   : > { %5063 = vmatmul.mubr.bf16.gmra.mrb[176].mxu1 %v4632_v7 }
 0x578   : > { %v4503_v18 = vpop.permute.xlu1 %4502  ;;  %5070 = vmatprep.mubr.bf16.mxu1 %v4763_v1 }
 0x579   : > { %v4375_v12 = vpop.permute.xlu0 %4374 }
 0x57c   : > { %v4501_v43 = vpop.permute.xlu1 %4500 }
 0x57d   : > { %v4373_v23 = vpop.permute.xlu0 %4372  ;;  %v4727_v8 = vsel %vm1295_vm8, %v4687_v27, %v4501_v43 }
 0x57e   : > { %v4566_v50 = vsel %vm4550_vm10, %v8740_v59, %v4373_v23 }
 0x57f   : > { %5071 = vmatmul.mubr.bf16.gmra.mrb[180].mxu1 %v4635_v40  ;;  %v4598_v5 = vsel %vm1295_vm8, %v4566_v50, %v4405_v22 }
 0x580   : > { %v4473_v52 = vpop.permute.xlu1 %4472  ;;  %v4638_v57 = vsel %vm4615_vm11, %v4598_v5, %v4437_v55 }
 0x581   : > { %v4441_v4 = vpop.permute.xlu0 %4440  ;;  %v4693_v33 = vsel %vm4550_vm10, %v8829_v28, %v4473_v52 }
 0x584   : > { %v4471_v10 = vpop.permute.xlu1 %4470 }
 0x585   : > { %v4439_v35 = vpop.permute.xlu0 %4438  ;;  %v4690_v15 = vsel %vm4550_vm10, %v8837_v46, %v4471_v10  ;;  %v4568_v46 = vsel %vm4550_vm10, %v8730_v19, %v4375_v12 }
 0x586   : > { %v4729_v59 = vsel %vm1295_vm8, %v4690_v15, %v4503_v18  ;;  %v4600_v47 = vsel %vm1295_vm8, %v4568_v46, %v4407_v51 }
 0x587   : > { %v4641_v37 = vsel %vm4615_vm11, %v4600_v47, %v4439_v35 }
 0x588   : > { %v4535_v38 = vpop.permute.xlu1 %4534 }
 0x589   : > { %v4411_v39 = vpop.permute.xlu0 %4410  ;;  %v4769_v25 = vsel %vm4615_vm11, %v4729_v59, %v4535_v38 }
 0x58c   : > { %v4533_v44 = vpop.permute.xlu1 %4532 }
 0x58d   : > { %v4409_v56 = vpop.permute.xlu0 %4408  ;;  %v4766_v31 = vsel %vm4615_vm11, %v4727_v8, %v4533_v44 }
 0x58e   : > { %5078 = vmatprep.mubr.bf16.mxu1 %v4766_v31 }
 0x58f   : > { %5079 = vmatmul.mubr.bf16.gmra.mrb[184].mxu1 %v4638_v57 }
 0x590   : > { %v4507_v0 = vpop.permute.xlu1 %4506  ;;  %5086 = vmatprep.mubr.bf16.mxu1 %v4769_v25 }
 0x591   : > { %v4379_v41 = vpop.permute.xlu0 %4378 }
 0x594   : > { %v4505_v30 = vpop.permute.xlu1 %4504 }
 0x595   : > { %v4377_v3 = vpop.permute.xlu0 %4376  ;;  %v4731_v17 = vsel %vm1295_vm8, %v4693_v33, %v4505_v30 }
 0x596   : > { %v4570_v11 = vsel %vm4550_vm10, %v8798_v45, %v4377_v3 }
 0x597   : > { %5087 = vmatmul.mubr.bf16.gmra.mrb[188].mxu1 %v4641_v37  ;;  %v4602_v51 = vsel %vm1295_vm8, %v4570_v11, %v4409_v56 }
 0x598   : > { %v4477_v13 = vpop.permute.xlu1 %4476  ;;  %v4644_v34 = vsel %vm4615_vm11, %v4602_v51, %v4441_v4 }
 0x599   : > { %v4445_v42 = vpop.permute.xlu0 %4444  ;;  %v4699_v4 = vsel %vm4550_vm10, %v8910_v21, %v4477_v13 }
 0x59c   : > { %v4475_v55 = vpop.permute.xlu1 %4474 }
 0x59d   : > { %v4443_v14 = vpop.permute.xlu0 %4442  ;;  %v4696_v19 = vsel %vm4550_vm10, %v8920_v24, %v4475_v55  ;;  %v4572_v24 = vsel %vm4550_vm10, %v8788_v6, %v4379_v41 }
 0x59e   : > { %v4733_v45 = vsel %vm1295_vm8, %v4696_v19, %v4507_v0  ;;  %v4604_v58 = vsel %vm1295_vm8, %v4572_v24, %v4411_v39 }
 0x59f   : > { %v4647_v1 = vsel %vm4615_vm11, %v4604_v58, %v4443_v14  ;;  %v9463_v14 = vld [vmem:[#allocation7_spill] sm:$0xff] }
 0x5a0   : > { %v4539_v36 = vpop.permute.xlu1 %4538 }
 0x5a1   : > { %v4415_v26 = vpop.permute.xlu0 %4414  ;;  %v4775_v60 = vsel %vm4615_vm11, %v4733_v45, %v4539_v36 }
 0x5a4   : > { %v4537_v53 = vpop.permute.xlu1 %4536 }
 0x5a5   : > { %v4413_v20 = vpop.permute.xlu0 %4412  ;;  %v4772_v22 = vsel %vm4615_vm11, %v4731_v17, %v4537_v53 }
 0x5a6   : > { %5094 = vmatprep.mubr.bf16.mxu1 %v4772_v22 }
 0x5a7   : > { %5095 = vmatmul.mubr.bf16.gmra.mrb[192].mxu1 %v4644_v34 }
 0x5a8   : > { %v4511_v9 = vpop.permute.xlu1 %4510  ;;  %5102 = vmatprep.mubr.bf16.mxu1 %v4775_v60 }
 0x5a9   : > { %v4383_v28 = vpop.permute.xlu0 %4382 }
 0x5ac   : > { %v4509_v7 = vpop.permute.xlu1 %4508 }
 0x5ad   : > { %v4381_v54 = vpop.permute.xlu0 %4380  ;;  %v4735_v10 = vsel %vm1295_vm8, %v4699_v4, %v4509_v7 }
 0x5ae   : > { %v4574_v63 = vsel %vm4550_vm10, %v8860_v48, %v4381_v54 }
 0x5af   : > { %5103 = vmatmul.mubr.bf16.gmra.mrb[196].mxu1 %v4647_v1  ;;  %v4606_v35 = vsel %vm1295_vm8, %v4574_v63, %v4413_v20 }
 0x5b0   : > { %v4481_v18 = vpop.permute.xlu1 %4480  ;;  %v4650_v38 = vsel %vm4615_vm11, %v4606_v35, %v4445_v42 }
 0x5b1   : > { %v4449_v12 = vpop.permute.xlu0 %4448  ;;  %v4705_v41 = vsel %vm4550_vm10, %v9003_v2, %v4481_v18 }
 0x5b5   : > { %v4447_v62 = vpop.permute.xlu0 %4446  ;;  %v4479_v23 = vpop.permute.xlu1 %4478 }
 0x5b6   : > { %v4702_v6 = vsel %vm4550_vm10, %v9021_v29, %v4479_v23  ;;  %v9462_v29 = vld [vmem:[#allocation5_spill] sm:$0xff] }
 0x5b7   : > { %v4737_v48 = vsel %vm1295_vm8, %v4702_v6, %v4511_v9  ;;  %v4576_v56 = vsel %vm4550_vm10, %v9462_v29, %v4383_v28 }
 0x5b8   : > { %v4608_v44 = vsel %vm1295_vm8, %v4576_v56, %v4415_v26 }
 0x5b9   : > { %v4417_v43 = vpop.permute.xlu0 %4416  ;;  %v4653_v31 = vsel %vm4615_vm11, %v4608_v44, %v4447_v62 }
 0x5ba   : > { %v4543_v40 = vpop.permute.xlu1 %4542 }
 0x5bb   : > { %v4781_v27 = vsel %vm4615_vm11, %v4737_v48, %v4543_v40 }
 0x5bd   : > { %v4387_v52 = vpop.permute.xlu0 %4386 }
 0x5be   : > { %v4541_v39 = vpop.permute.xlu1 %4540  ;;  %v4580_v55 = vsel %vm4550_vm10, %v9463_v14, %v4387_v52 }
 0x5bf   : > { %v4778_v50 = vsel %vm4615_vm11, %v4735_v10, %v4541_v39 }
 0x5c0   : > { %5110 = vmatprep.mubr.bf16.mxu1 %v4778_v50 }
 0x5c1   : > { %5111 = vmatmul.mubr.bf16.gmra.mrb[200].mxu1 %v4650_v38  ;;  %v4385_v21 = vpop.permute.xlu0 %4384 }
 0x5c2   : > { %v4515_v15 = vpop.permute.xlu1 %4514  ;;  %5118 = vmatprep.mubr.bf16.mxu1 %v4781_v27  ;;  %v4578_v57 = vsel %vm4550_vm10, %v8947_v61, %v4385_v21 }
 0x5c3   : > { %v4610_v0 = vsel %vm1295_vm8, %v4578_v57, %v4417_v43 }
 0x5c4   : > { %v4656_v37 = vsel %vm4615_vm11, %v4610_v0, %v4449_v12 }
 0x5c5   : > { %v4419_v5 = vpop.permute.xlu0 %4418 }
 0x5c6   : > { %v4513_v8 = vpop.permute.xlu1 %4512  ;;  %v4612_v11 = vsel %vm1295_vm8, %v4580_v55, %v4419_v5 }
 0x5c7   : > { %v4739_v46 = vsel %vm1295_vm8, %v4705_v41, %v4513_v8 }
 0x5c9   : > { %5119 = vmatmul.mubr.bf16.gmra.mrb[204].mxu1 %v4653_v31  ;;  %v4451_v25 = vpop.permute.xlu0 %4450 }
 0x5ca   : > { %v4483_v59 = vpop.permute.xlu1 %4482  ;;  %v4659_v36 = vsel %vm4615_vm11, %v4612_v11, %v4451_v25 }
 0x5cb   : > { %v4708_v30 = vsel %vm4550_vm10, %v9080_v16, %v4483_v59 }
 0x5cc   : > { %v4741_v13 = vsel %vm1295_vm8, %v4708_v30, %v4515_v15 }
 0x5cd   : > { %v4421_v42 = vpop.permute.xlu0 %4420 }
 0x5ce   : > { %v4545_v3 = vpop.permute.xlu1 %4544 }
 0x5cf   : > { %v4784_v47 = vsel %vm4615_vm11, %v4739_v46, %v4545_v3 }
 0x5d0   : > { %5126 = vmatprep.mubr.bf16.mxu1 %v4784_v47 }
 0x5d1   : > { %5127 = vmatmul.mubr.bf16.gmra.mrb[208].mxu1 %v4656_v37  ;;  %v4389_v16 = vpop.permute.xlu0 %4388 }
 0x5d2   : > { %v4547_v61 = vpop.permute.xlu1 %4546  ;;  %v4582_v19 = vsel %vm4550_vm10, %v9032_v32, %v4389_v16 }
 0x5d3   : > { %v4787_v2 = vsel %vm4615_vm11, %v4741_v13, %v4547_v61  ;;  %v4614_v34 = vsel %vm1295_vm8, %v4582_v19, %v4421_v42 }
 0x5d4   : > { %5134 = vmatprep.mubr.bf16.mxu1 %v4787_v2 }
 0x5d5   : > { %v4453_v51 = vpop.permute.xlu0 %4452 }
 0x5d6   : > { %v4485_v26 = vpop.permute.xlu1 %4484  ;;  %v4662_v45 = vsel %vm4615_vm11, %v4614_v34, %v4453_v51 }
 0x5d7   : > { %v4711_v20 = vsel %vm4550_vm10, %v9098_v49, %v4485_v26  ;;  %v9223_v49 = vld [vmem:[%s9410_s8] ss:$0 sm:$0xff] }
 0x5d9   : > { %5135 = vmatmul.mubr.bf16.gmra.mrb[212].mxu1 %v4659_v36 }
 0x5da   : > { %v4517_v33 = vpop.permute.xlu1 %4516 }
 0x5db   : > { %v4743_v17 = vsel %vm1295_vm8, %v4711_v20, %v4517_v33 }
 0x5de   : > { %v4549_v53 = vpop.permute.xlu1 %4548 }
 0x5df   : > { %v4790_v22 = vsel %vm4615_vm11, %v4743_v17, %v4549_v53 }
 0x5e0   : > { %5142 = vmatprep.mubr.bf16.mxu1 %v4790_v22 }
 0x5e1   : > { %5143 = vmatmul.mubr.bf16.gmra.mrb[216].mxu1 %v4662_v45 }
 0x602   : > { %v6119_v60 = vpop.f32.mrb[192].mxu0 }
 0x603   : > { %v6120_v28 = vpop.f32.mrb[193].mxu0 }
 0x604   : > { %v6121_v9 = vadd.f32 %v6120_v28, %v6119_v60  ;;  %v6122_v32 = vpop.f32.mrb[194].mxu0 }
 0x605   : > { %v6123_v24 = vpop.f32.mrb[195].mxu0 }
 0x606   : > { %v6124_v54 = vadd.f32 %v6123_v24, %v6122_v32  ;;  %v5025_v58 = vadd.f32 %v6121_v9, %v9223_v49 }
 0x608   : > { %v5028_v62 = vadd.f32 %v6124_v54, %v9223_v49 }
 0x60a   : > { %v6355_v7 = vpop.f32.mrb[196].mxu0 }
 0x60b   : > { %v5185_v1 = vpop.f32.mrb[197].mxu0 }
 0x60c   : > { %v5186_v12 = vadd.f32 %v5185_v1, %v5025_v58  ;;  %v6356_v18 = vpop.f32.mrb[198].mxu0 }
 0x60d   : > { %v5188_v23 = vpop.f32.mrb[199].mxu0 }
 0x60e   : > { %5313 = vst.msk [vmem:[%s9230_s14] sm:$0xff] %vm5312_vm12, %v5186_v12  ;;  %v5189_v43 = vadd.f32 %v5188_v23, %v5028_v62 }
 0x610   : > { %5314 = vst.msk [vmem:[%s9230_s14 + $0x8] sm:$0xff] %vm5312_vm12, %v5189_v43 }
 0x612   : > { %v6359_v63 = vpop.f32.mrb[200].mxu0 }
 0x613   : > { %v5201_v40 = vpop.f32.mrb[201].mxu0 }
 0x614   : > { %v6360_v4 = vpop.f32.mrb[202].mxu0 }
 0x615   : > { %v5204_v6 = vpop.f32.mrb[203].mxu0 }
 0x61a   : > { %v9237_v52 = vpop.f32.mrb[204].mxu0 }
 0x61b   : > { %v9239_v35 = vpop.f32.mrb[205].mxu0 }
 0x61c   : > { %v9241_v10 = vpop.f32.mrb[206].mxu0  ;;  %v6125_v50 = vpop.f32.mrb[160].mxu1 }
 0x61d   : > { %v9243_v39 = vpop.f32.mrb[207].mxu0  ;;  %v6126_v38 = vpop.f32.mrb[161].mxu1 }
 0x61e   : > { %v6127_v48 = vadd.f32 %v6126_v38, %v6125_v50  ;;  %v6128_v27 = vpop.f32.mrb[162].mxu1 }
 0x61f   : > { %v6129_v21 = vpop.f32.mrb[163].mxu1 }
 0x620   : > { %v5033_v15 = vadd.f32 %v6127_v48, %v9223_v49  ;;  %v6130_v29 = vadd.f32 %v6129_v21, %v6128_v27 }
 0x622   : > { %v9246_v56 = vpop.f32.mrb[208].mxu0  ;;  %v5194_v8 = vadd.f32 %v6355_v7, %v5033_v15  ;;  %v5036_v44 = vadd.f32 %v6130_v29, %v9223_v49 }
 0x623   : > { %v9248_v5 = vpop.f32.mrb[209].mxu0 }
 0x624   : > { %v9251_v31 = vpop.f32.mrb[210].mxu0  ;;  %5315 = vst.msk [vmem:[%s9230_s14 + $0x10] sm:$0xff] %vm5312_vm12, %v5194_v8  ;;  %v5197_v59 = vadd.f32 %v6356_v18, %v5036_v44  ;;  %v6131_v25 = vpop.f32.mrb[164].mxu1 }
 0x625   : > { %v9253_v57 = vpop.f32.mrb[211].mxu0  ;;  %v6132_v41 = vpop.f32.mrb[165].mxu1 }
 0x626   : > { %5316 = vst.msk [vmem:[%s9230_s14 + $0x18] sm:$0xff] %vm5312_vm12, %v5197_v59  ;;  %v6133_v0 = vadd.f32 %v6132_v41, %v6131_v25  ;;  %v6134_v46 = vpop.f32.mrb[166].mxu1 }
 0x627   : > { %v6135_v3 = vpop.f32.mrb[167].mxu1 }
 0x628   : > { %v5041_v30 = vadd.f32 %v6133_v0, %v9223_v49  ;;  %v6136_v47 = vadd.f32 %v6135_v3, %v6134_v46 }
 0x62a   : > { %v9260_v37 = vpop.f32.mrb[212].mxu0  ;;  %v5202_v61 = vadd.f32 %v5201_v40, %v5041_v30  ;;  %v5044_v13 = vadd.f32 %v6136_v47, %v9223_v49 }
 0x62b   : > { %v9262_v42 = vpop.f32.mrb[213].mxu0 }
 0x62c   : > { %v9265_v2 = vpop.f32.mrb[214].mxu0  ;;  %5317 = vst.msk [vmem:[%s9230_s14 + $0x20] sm:$0xff] %vm5312_vm12, %v5202_v61  ;;  %v5205_v55 = vadd.f32 %v5204_v6, %v5044_v13 }
 0x62d   : > { %v9267_v14 = vpop.f32.mrb[215].mxu0 }
 0x62e   : > { %5318 = vst.msk [vmem:[%s9230_s14 + $0x28] sm:$0xff] %vm5312_vm12, %v5205_v55 }
 0x632   : > { %v9273_v26 = vpop.f32.mrb[216].mxu0 }
 0x633   : > { %v9275_v11 = vpop.f32.mrb[217].mxu0 }
 0x634   : > { %v9277_v16 = vpop.f32.mrb[218].mxu0  ;;  %v6137_v33 = vpop.f32.mrb[168].mxu1 }
 0x635   : > { %v9279_v36 = vpop.f32.mrb[219].mxu0  ;;  %v6138_v19 = vpop.f32.mrb[169].mxu1 }
 0x636   : > { %v6139_v20 = vadd.f32 %v6138_v19, %v6137_v33  ;;  %v6140_v51 = vpop.f32.mrb[170].mxu1 }
 0x637   : > { %v6141_v17 = vpop.f32.mrb[171].mxu1 }
 0x638   : > { %v5049_v53 = vadd.f32 %v6139_v20, %v9223_v49  ;;  %v6142_v22 = vadd.f32 %v6141_v17, %v6140_v51 }
 0x63a   : > { %v9282_v34 = vpop.f32.mrb[220].mxu0  ;;  %v5210_v60 = vadd.f32 %v6359_v63, %v5049_v53  ;;  %v5052_v28 = vadd.f32 %v6142_v22, %v9223_v49 }
 0x63b   : > { %v9284_v45 = vpop.f32.mrb[221].mxu0 }
 0x63c   : > { %v9287_v9 = vpop.f32.mrb[222].mxu0  ;;  %5319 = vst.msk [vmem:[%s9230_s14 + $0x30] sm:$0xff] %vm5312_vm12, %v5210_v60  ;;  %v5213_v24 = vadd.f32 %v6360_v4, %v5052_v28  ;;  %v6143_v54 = vpop.f32.mrb[172].mxu1 }
 0x63d   : > { %v9289_v32 = vpop.f32.mrb[223].mxu0  ;;  %v6144_v7 = vpop.f32.mrb[173].mxu1 }
 0x63e   : > { %5320 = vst.msk [vmem:[%s9230_s14 + $0x38] sm:$0xff] %vm5312_vm12, %v5213_v24  ;;  %v6145_v58 = vadd.f32 %v6144_v7, %v6143_v54  ;;  %v6146_v1 = vpop.f32.mrb[174].mxu1 }
 0x63f   : > { %v6147_v12 = vpop.f32.mrb[175].mxu1 }
 0x640   : > { %v5057_v18 = vadd.f32 %v6145_v58, %v9223_v49  ;;  %v6148_v62 = vadd.f32 %v6147_v12, %v6146_v1 }
 0x642   : > { %v9296_v23 = vpop.f32.mrb[224].mxu0  ;;  %v5218_v63 = vadd.f32 %v9239_v35, %v5057_v18  ;;  %v5060_v40 = vadd.f32 %v6148_v62, %v9223_v49 }
 0x643   : > { %v9298_v43 = vpop.f32.mrb[225].mxu0 }
 0x644   : > { %v9302_v4 = vpop.f32.mrb[226].mxu0  ;;  %5321 = vst.msk [vmem:[%s9230_s14 + $0x40] sm:$0xff] %vm5312_vm12, %v5218_v63  ;;  %v5221_v50 = vadd.f32 %v9243_v39, %v5060_v40 }
 0x645   : > { %v9304_v6 = vpop.f32.mrb[227].mxu0 }
 0x646   : > { %5322 = vst.msk [vmem:[%s9230_s14 + $0x48] sm:$0xff] %vm5312_vm12, %v5221_v50 }
 0x64a   : > { %v6149_v38 = vpop.f32.mrb[176].mxu1 }
 0x64b   : > { %v6150_v48 = vpop.f32.mrb[177].mxu1 }
 0x64c   : > { %v6151_v27 = vadd.f32 %v6150_v48, %v6149_v38  ;;  %v6152_v21 = vpop.f32.mrb[178].mxu1 }
 0x64d   : > { %v6153_v15 = vpop.f32.mrb[179].mxu1 }
 0x64e   : > { %v5065_v35 = vadd.f32 %v6151_v27, %v9223_v49  ;;  %v6154_v29 = vadd.f32 %v6153_v15, %v6152_v21 }
 0x650   : > { %v5226_v8 = vadd.f32 %v9237_v52, %v5065_v35  ;;  %v5068_v44 = vadd.f32 %v6154_v29, %v9223_v49 }
 0x652   : > { %5323 = vst.msk [vmem:[%s9230_s14 + $0x50] sm:$0xff] %vm5312_vm12, %v5226_v8  ;;  %v5229_v39 = vadd.f32 %v9241_v10, %v5068_v44  ;;  %v6155_v59 = vpop.f32.mrb[180].mxu1 }
 0x653   : > { %v6156_v25 = vpop.f32.mrb[181].mxu1 }
 0x654   : > { %5324 = vst.msk [vmem:[%s9230_s14 + $0x58] sm:$0xff] %vm5312_vm12, %v5229_v39  ;;  %v6157_v41 = vadd.f32 %v6156_v25, %v6155_v59  ;;  %v6158_v0 = vpop.f32.mrb[182].mxu1 }
 0x655   : > { %v6159_v46 = vpop.f32.mrb[183].mxu1 }
 0x656   : > { %v5073_v3 = vadd.f32 %v6157_v41, %v9223_v49  ;;  %v6160_v30 = vadd.f32 %v6159_v46, %v6158_v0 }
 0x658   : > { %v5234_v52 = vadd.f32 %v9248_v5, %v5073_v3  ;;  %v5076_v47 = vadd.f32 %v6160_v30, %v9223_v49 }
 0x65a   : > { %5325 = vst.msk [vmem:[%s9230_s14 + $0x60] sm:$0xff] %vm5312_vm12, %v5234_v52  ;;  %v5237_v10 = vadd.f32 %v9253_v57, %v5076_v47 }
 0x65c   : > { %5326 = vst.msk [vmem:[%s9230_s14 + $0x68] sm:$0xff] %vm5312_vm12, %v5237_v10 }
 0x662   : > { %v6161_v61 = vpop.f32.mrb[184].mxu1 }
 0x663   : > { %v6162_v13 = vpop.f32.mrb[185].mxu1 }
 0x664   : > { %v6163_v55 = vadd.f32 %v6162_v13, %v6161_v61  ;;  %v6164_v33 = vpop.f32.mrb[186].mxu1 }
 0x665   : > { %v6165_v19 = vpop.f32.mrb[187].mxu1 }
 0x666   : > { %v5081_v20 = vadd.f32 %v6163_v55, %v9223_v49  ;;  %v6166_v51 = vadd.f32 %v6165_v19, %v6164_v33 }
 0x668   : > { %v5242_v5 = vadd.f32 %v9246_v56, %v5081_v20  ;;  %v5084_v17 = vadd.f32 %v6166_v51, %v9223_v49 }
 0x66a   : > { %5327 = vst.msk [vmem:[%s9230_s14 + $0x70] sm:$0xff] %vm5312_vm12, %v5242_v5  ;;  %v5245_v57 = vadd.f32 %v9251_v31, %v5084_v17  ;;  %v6167_v53 = vpop.f32.mrb[188].mxu1 }
 0x66b   : > { %v6168_v22 = vpop.f32.mrb[189].mxu1 }
 0x66c   : > { %5328 = vst.msk [vmem:[%s9230_s14 + $0x78] sm:$0xff] %vm5312_vm12, %v5245_v57  ;;  %v6169_v60 = vadd.f32 %v6168_v22, %v6167_v53  ;;  %v6170_v28 = vpop.f32.mrb[190].mxu1 }
 0x66d   : > { %v6171_v24 = vpop.f32.mrb[191].mxu1 }
 0x66e   : > { %v5089_v54 = vadd.f32 %v6169_v60, %v9223_v49  ;;  %v6172_v7 = vadd.f32 %v6171_v24, %v6170_v28 }
 0x670   : > { %v5250_v56 = vadd.f32 %v9262_v42, %v5089_v54  ;;  %v5092_v58 = vadd.f32 %v6172_v7, %v9223_v49 }
 0x672   : > { %5329 = vst.msk [vmem:[%s9230_s14 + $0x80] sm:$0xff] %vm5312_vm12, %v5250_v56  ;;  %v5253_v31 = vadd.f32 %v9267_v14, %v5092_v58 }
 0x674   : > { %5330 = vst.msk [vmem:[%s9230_s14 + $0x88] sm:$0xff] %vm5312_vm12, %v5253_v31 }
 0x67a   : > { %v6173_v1 = vpop.f32.mrb[192].mxu1 }
 0x67b   : > { %v6174_v12 = vpop.f32.mrb[193].mxu1 }
 0x67c   : > { %v6175_v18 = vadd.f32 %v6174_v12, %v6173_v1  ;;  %v6176_v62 = vpop.f32.mrb[194].mxu1 }
 0x67d   : > { %v6177_v63 = vpop.f32.mrb[195].mxu1 }
 0x67e   : > { %v5097_v40 = vadd.f32 %v6175_v18, %v9223_v49  ;;  %v6178_v50 = vadd.f32 %v6177_v63, %v6176_v62 }
 0x680   : > { %v5258_v42 = vadd.f32 %v9260_v37, %v5097_v40  ;;  %v5100_v38 = vadd.f32 %v6178_v50, %v9223_v49 }
 0x682   : > { %5331 = vst.msk [vmem:[%s9230_s14 + $0x90] sm:$0xff] %vm5312_vm12, %v5258_v42  ;;  %v5261_v14 = vadd.f32 %v9265_v2, %v5100_v38  ;;  %v6179_v48 = vpop.f32.mrb[196].mxu1 }
 0x683   : > { %v6180_v27 = vpop.f32.mrb[197].mxu1 }
 0x684   : > { %5332 = vst.msk [vmem:[%s9230_s14 + $0x98] sm:$0xff] %vm5312_vm12, %v5261_v14  ;;  %v6181_v21 = vadd.f32 %v6180_v27, %v6179_v48  ;;  %v6182_v15 = vpop.f32.mrb[198].mxu1 }
 0x685   : > { %v6183_v35 = vpop.f32.mrb[199].mxu1 }
 0x686   : > { %v5105_v29 = vadd.f32 %v6181_v21, %v9223_v49  ;;  %v6184_v8 = vadd.f32 %v6183_v35, %v6182_v15 }
 0x688   : > { %v5266_v37 = vadd.f32 %v9275_v11, %v5105_v29  ;;  %v5108_v44 = vadd.f32 %v6184_v8, %v9223_v49 }
 0x68a   : > { %5333 = vst.msk [vmem:[%s9230_s14 + $0xa0] sm:$0xff] %vm5312_vm12, %v5266_v37  ;;  %v5269_v2 = vadd.f32 %v9279_v36, %v5108_v44 }
 0x68c   : > { %5334 = vst.msk [vmem:[%s9230_s14 + $0xa8] sm:$0xff] %vm5312_vm12, %v5269_v2 }
 0x694   : > { %v6185_v39 = vpop.f32.mrb[200].mxu1 }
 0x695   : > { %v6186_v59 = vpop.f32.mrb[201].mxu1 }
 0x696   : > { %v6187_v25 = vadd.f32 %v6186_v59, %v6185_v39  ;;  %v6188_v41 = vpop.f32.mrb[202].mxu1 }
 0x697   : > { %v6189_v0 = vpop.f32.mrb[203].mxu1 }
 0x698   : > { %v5113_v46 = vadd.f32 %v6187_v25, %v9223_v49  ;;  %v6190_v3 = vadd.f32 %v6189_v0, %v6188_v41 }
 0x69a   : > { %v5274_v11 = vadd.f32 %v9273_v26, %v5113_v46  ;;  %v5116_v30 = vadd.f32 %v6190_v3, %v9223_v49 }
 0x69c   : > { %5335 = vst.msk [vmem:[%s9230_s14 + $0xb0] sm:$0xff] %vm5312_vm12, %v5274_v11  ;;  %v5277_v36 = vadd.f32 %v9277_v16, %v5116_v30  ;;  %v6191_v52 = vpop.f32.mrb[204].mxu1 }
 0x69d   : > { %v6192_v47 = vpop.f32.mrb[205].mxu1 }
 0x69e   : > { %5336 = vst.msk [vmem:[%s9230_s14 + $0xb8] sm:$0xff] %vm5312_vm12, %v5277_v36  ;;  %v6193_v10 = vadd.f32 %v6192_v47, %v6191_v52  ;;  %v6194_v61 = vpop.f32.mrb[206].mxu1 }
 0x69f   : > { %v6195_v13 = vpop.f32.mrb[207].mxu1 }
 0x6a0   : > { %v5121_v55 = vadd.f32 %v6193_v10, %v9223_v49  ;;  %v6196_v33 = vadd.f32 %v6195_v13, %v6194_v61 }
 0x6a2   : > { %v5282_v26 = vadd.f32 %v9284_v45, %v5121_v55  ;;  %v5124_v19 = vadd.f32 %v6196_v33, %v9223_v49 }
 0x6a4   : > { %5337 = vst.msk [vmem:[%s9230_s14 + $0xc0] sm:$0xff] %vm5312_vm12, %v5282_v26  ;;  %v5285_v16 = vadd.f32 %v9289_v32, %v5124_v19  ;;  %v6197_v20 = vpop.f32.mrb[208].mxu1 }
 0x6a5   : > { %v6198_v51 = vpop.f32.mrb[209].mxu1 }
 0x6a6   : > { %5338 = vst.msk [vmem:[%s9230_s14 + $0xc8] sm:$0xff] %vm5312_vm12, %v5285_v16  ;;  %v6199_v5 = vadd.f32 %v6198_v51, %v6197_v20  ;;  %v6200_v17 = vpop.f32.mrb[210].mxu1 }
 0x6a7   : > { %v6201_v57 = vpop.f32.mrb[211].mxu1 }
 0x6a8   : > { %v5129_v53 = vadd.f32 %v6199_v5, %v9223_v49  ;;  %v6202_v22 = vadd.f32 %v6201_v57, %v6200_v17 }
 0x6aa   : > { %v5290_v45 = vadd.f32 %v9282_v34, %v5129_v53  ;;  %v5132_v60 = vadd.f32 %v6202_v22, %v9223_v49 }
 0x6ac   : > { %5339 = vst.msk [vmem:[%s9230_s14 + $0xd0] sm:$0xff] %vm5312_vm12, %v5290_v45  ;;  %v5293_v32 = vadd.f32 %v9287_v9, %v5132_v60  ;;  %v6203_v28 = vpop.f32.mrb[212].mxu1 }
 0x6ad   : > { %v6204_v24 = vpop.f32.mrb[213].mxu1 }
 0x6ae   : > { %5340 = vst.msk [vmem:[%s9230_s14 + $0xd8] sm:$0xff] %vm5312_vm12, %v5293_v32  ;;  %v6205_v54 = vadd.f32 %v6204_v24, %v6203_v28  ;;  %v6206_v7 = vpop.f32.mrb[214].mxu1 }
 0x6af   : > { %v6207_v56 = vpop.f32.mrb[215].mxu1 }
 0x6b0   : > { %v6208_v58 = vadd.f32 %v6207_v56, %v6206_v7  ;;  %v5137_v31 = vadd.f32 %v6205_v54, %v9223_v49 }
 0x6b2   : > { %v5298_v34 = vadd.f32 %v9298_v43, %v5137_v31  ;;  %v5140_v1 = vadd.f32 %v6208_v58, %v9223_v49 }
 0x6b4   : > { %5341 = vst.msk [vmem:[%s9230_s14 + $0xe0] sm:$0xff] %vm5312_vm12, %v5298_v34  ;;  %v5301_v9 = vadd.f32 %v9304_v6, %v5140_v1  ;;  %v6209_v12 = vpop.f32.mrb[216].mxu1 }
 0x6b5   : > { %v6210_v18 = vpop.f32.mrb[217].mxu1 }
 0x6b6   : > { %5342 = vst.msk [vmem:[%s9230_s14 + $0xe8] sm:$0xff] %vm5312_vm12, %v5301_v9  ;;  %v6211_v62 = vadd.f32 %v6210_v18, %v6209_v12  ;;  %v6212_v63 = vpop.f32.mrb[218].mxu1 }
 0x6b7   : > { %v6213_v40 = vpop.f32.mrb[219].mxu1 }
 0x6b8   : > { %v5145_v50 = vadd.f32 %v6211_v62, %v9223_v49  ;;  %v6214_v42 = vadd.f32 %v6213_v40, %v6212_v63 }
 0x6ba   : > { %v5306_v38 = vadd.f32 %v9296_v23, %v5145_v50  ;;  %v5148_v43 = vadd.f32 %v6214_v42, %v9223_v49 }
 0x6bc   : > { %5343 = vst.msk [vmem:[%s9230_s14 + $0xf0] sm:$0xff] %vm5312_vm12, %v5306_v38  ;;  %v5309_v14 = vadd.f32 %v9302_v4, %v5148_v43 }
 0x6be   : > { %5344 = vst.msk [vmem:[%s9230_s14 + $0xf8] sm:$0xff] %vm5312_vm12, %v5309_v14 }
 0x6bf PF: > { %s19_s30 = sadd.s32 1, %s6529_s30  }
 0x6c0   : > { %p16_p4 = scmp.ge.s32.totalorder %s19_s30, 4  }
 0x6c2   :  { %18 = sbr.rel (!%p16_p4) target bundleno = 1 (0x1), region = 86 }

</bundles_post_ra>
